<compile_context>
chip_gen: v5e
topology: v5e:2x2
jax: 0.10.0
libtpu: 0.0.40
codegen_flags: <defaults>
</compile_context>

<pallas_src>
import jax
import jax.numpy as jnp
from jax import lax
from jax.experimental import pallas as pl
from jax.experimental.pallas import tpu as pltpu

LEAKY_SLOPE = 0.2
BN_EPS = 1e-5


# =============================================================================
# Primary path: single fused pallas_call for the whole network
# =============================================================================

def _make_fused_kernel(n, ndf):
    rows_per_sample = 4 * 8          # layer-4 rows per sample (OW padded 4->8)
    m4 = n * rows_per_sample

    def conv_bn_lrelu(src_ref, w_ref, oh, ow, real_ow=None):
        """16 shifted sub-matmuls (in-kernel im2col) + (masked) BN + LeakyReLU.

        src_ref: (N, Hp, Wp, Cin) padded NHWC activation scratch (bf16)
        w_ref:   (4, 4, Cin, Cout) bf16
        Returns the (N*oh*ow, Cout) f32 post-activation value.
        """
        cin, cout = w_ref.shape[2], w_ref.shape[3]
        m = n * oh * ow
        acc = jnp.zeros((m, cout), jnp.float32)
        for kh in range(4):
            for kw in range(4):
                patch = src_ref[:, pl.ds(kh, oh, 2), pl.ds(kw, ow, 2), :]
                acc = acc + jnp.dot(patch.reshape(m, cin), w_ref[kh, kw],
                                    preferred_element_type=jnp.float32)
        if real_ow is None:
            mean = jnp.mean(acc, axis=0, keepdims=True)
            cen = acc - mean
            var = jnp.mean(cen * cen, axis=0, keepdims=True)
        else:
            # Exclude the alignment-padding output columns (ow >= real_ow).
            mask = (lax.broadcasted_iota(jnp.int32, (m, 1), 0) % ow
                    < real_ow).astype(jnp.float32)
            cnt = float(n * oh * real_ow)
            mean = jnp.sum(acc * mask, axis=0, keepdims=True) / cnt
            cen = acc - mean
            var = jnp.sum(cen * cen * mask, axis=0, keepdims=True) / cnt
        y = cen * lax.rsqrt(jnp.maximum(var, 0.0) + BN_EPS)
        return jnp.where(y >= 0, y, LEAKY_SLOPE * y)

    def kernel(a1_ref, w1_ref, w2_ref, w3_ref, w4_ref, w5t_ref, o_ref,
               a1p_ref, a2p_ref, a3p_ref):
        # Zero the padded scratches once (borders + alignment columns).
        a1p_ref[...] = jnp.zeros(a1p_ref.shape, a1p_ref.dtype)
        a2p_ref[...] = jnp.zeros(a2p_ref.shape, a2p_ref.dtype)
        a3p_ref[...] = jnp.zeros(a3p_ref.shape, a3p_ref.dtype)

        # ---- layer 1: conv(3 -> ndf, 4, 2, 1) + LeakyReLU (patches prebuilt)
        y1 = jnp.dot(a1_ref[...], w1_ref[...],
                     preferred_element_type=jnp.float32)          # (N*32*32, ndf)
        y1 = jnp.where(y1 >= 0, y1, LEAKY_SLOPE * y1)
        a1p_ref[:, 1:33, 1:33, :] = (
            y1.reshape(n, 32, 32, ndf).astype(a1p_ref.dtype))

        # ---- layer 2: conv(ndf -> 2ndf, 4, 2, 1) + BN + LeakyReLU
        y2 = conv_bn_lrelu(a1p_ref, w2_ref, 16, 16)               # (N*256, 2ndf)
        a2p_ref[:, 1:17, 1:17, :] = (
            y2.reshape(n, 16, 16, 2 * ndf).astype(a2p_ref.dtype))

        # ---- layer 3: conv(2ndf -> 4ndf, 4, 2, 1) + BN + LeakyReLU
        y3 = conv_bn_lrelu(a2p_ref, w3_ref, 8, 8)                 # (N*64, 4ndf)
        a3p_ref[:, 1:9, 1:9, :] = (
            y3.reshape(n, 8, 8, 4 * ndf).astype(a3p_ref.dtype))

        # ---- layer 4: conv(4ndf -> 8ndf, 4, 2, 1) + BN + LeakyReLU
        #      (output width padded 4 -> 8 for sublane alignment, masked BN)
        y4 = conv_bn_lrelu(a3p_ref, w4_ref, 4, 8, real_ow=4)      # (N*32, 8ndf)

        # ---- layer 5: conv(8ndf -> 1, 4, 1, 0) + Sigmoid, folded in.
        #      y4 rows are (sample, kh, kw); w5t is the layer-5 weight tiled
        #      to the same row layout (zero on the fake kw>=4 columns).
        prod = y4 * w5t_ref[...]                                  # (N*32, 8ndf)
        rowsum = jnp.sum(prod, axis=1, keepdims=True)             # (N*32, 1)
        sel = (lax.broadcasted_iota(jnp.int32, (n, m4), 1) // rows_per_sample
               == lax.broadcasted_iota(jnp.int32, (n, m4), 0)
               ).astype(jnp.float32)                              # (N, N*32)
        logits = jnp.dot(sel, rowsum,
                         preferred_element_type=jnp.float32)      # (N, 1)
        o_ref[...] = 1.0 / (1.0 + jnp.exp(-logits))

    return kernel


def fused_forward(x_nchw, params):
    w1, w2, w3, w4, w5 = params
    n = x_nchw.shape[0]
    ndf = w1.shape[0]
    assert x_nchw.shape[1:] == (3, 64, 64), x_nchw.shape

    # bf16 BEFORE all data-movement glue (transpose / pad / im2col).
    xb = jnp.transpose(x_nchw.astype(jnp.bfloat16), (0, 2, 3, 1))    # NHWC
    xp = jnp.pad(xb, ((0, 0), (1, 1), (1, 1), (0, 0)))               # (N,66,66,3)

    # Layer-1 im2col (only remaining XLA glue, bf16): (N*32*32, 4*4*3),
    # K ordered (kh, kw, ci).
    cols = [xp[:, kh:kh + 64:2, kw:kw + 64:2, :]
            for kh in range(4) for kw in range(4)]
    a1 = jnp.concatenate(cols, axis=-1).reshape(n * 32 * 32, 4 * 4 * 3)

    # Weights: (Cout, Cin, kh, kw) -> (kh, kw, Cin, Cout), bf16 for the MXU.
    def to_hwio(w):
        return jnp.transpose(w, (2, 3, 1, 0)).astype(jnp.bfloat16)

    w1m = to_hwio(w1).reshape(4 * 4 * 3, ndf)
    w2t, w3t, w4t = to_hwio(w2), to_hwio(w3), to_hwio(w4)

    # Layer-5 weight tiled to the in-kernel layer-4 row layout
    # (row = sample*32 + kh*8 + kw, zeros on the fake kw>=4 columns), f32.
    w5_hw_c = jnp.transpose(w5[0], (1, 2, 0))                     # (4, 4, 8ndf)
    w5_pad = jnp.pad(w5_hw_c, ((0, 0), (0, 4), (0, 0)))           # (4, 8, 8ndf)
    w5t = jnp.tile(w5_pad.reshape(32, 8 * ndf), (n, 1)).astype(jnp.float32)

    out = pl.pallas_call(
        _make_fused_kernel(n, ndf),
        out_shape=jax.ShapeDtypeStruct((n, 1), jnp.float32),
        scratch_shapes=[
            pltpu.VMEM((n, 34, 34, ndf), jnp.bfloat16),       # layer-1 act (+border)
            pltpu.VMEM((n, 18, 18, 2 * ndf), jnp.bfloat16),   # layer-2 act (+border)
            pltpu.VMEM((n, 10, 18, 4 * ndf), jnp.bfloat16),   # layer-3 act (+border, W padded)
        ],
    )(a1, w1m, w2t, w3t, w4t, w5t)
    return out.reshape(n, 1, 1, 1)


# =============================================================================
# Fallback path (safety net): previous known-good per-layer pipeline, with
# bf16 glue and chip-conditional layer-1 M-tiling.
# =============================================================================

def _conv_leaky_kernel(w_ref, a_ref, o_ref):
    acc = jnp.dot(w_ref[...], a_ref[...], preferred_element_type=jnp.float32)
    o_ref[...] = jnp.where(acc >= 0, acc, LEAKY_SLOPE * acc).astype(o_ref.dtype)


def _conv_bn_leaky_kernel(w_ref, a_ref, o_ref):
    acc = jnp.dot(w_ref[...], a_ref[...], preferred_element_type=jnp.float32)
    mean = jnp.mean(acc, axis=1, keepdims=True)
    cen = acc - mean
    var = jnp.maximum(jnp.mean(cen * cen, axis=1, keepdims=True), 0.0)
    y = cen * lax.rsqrt(var + BN_EPS)
    o_ref[...] = jnp.where(y >= 0, y, LEAKY_SLOPE * y).astype(o_ref.dtype)


def _conv_sigmoid_kernel(w_ref, a_ref, o_ref):
    acc = jnp.dot(w_ref[...], a_ref[...], preferred_element_type=jnp.float32)
    o_ref[...] = (1.0 / (1.0 + jnp.exp(-acc))).astype(o_ref.dtype)


def _conv_call(kernel, w_mat, a_mat, out_dtype, tile_m=None):
    cout, k = w_mat.shape
    _, m = a_mat.shape
    if tile_m is None or m <= tile_m or m % tile_m != 0:
        return pl.pallas_call(
            kernel, out_shape=jax.ShapeDtypeStruct((cout, m), out_dtype)
        )(w_mat, a_mat)
    return pl.pallas_call(
        kernel,
        out_shape=jax.ShapeDtypeStruct((cout, m), out_dtype),
        grid=(m // tile_m,),
        in_specs=[pl.BlockSpec((cout, k), lambda i: (0, 0)),
                  pl.BlockSpec((k, tile_m), lambda i: (0, i))],
        out_specs=pl.BlockSpec((cout, tile_m), lambda i: (0, i)),
        compiler_params=pltpu.CompilerParams(dimension_semantics=("parallel",)),
    )(w_mat, a_mat)


def _im2col_cnhw(x_cnhw, k, stride, pad):
    c, nb, h, w = x_cnhw.shape
    xp = jnp.pad(x_cnhw, ((0, 0), (0, 0), (pad, pad), (pad, pad)))
    oh = (h + 2 * pad - k) // stride + 1
    ow = (w + 2 * pad - k) // stride + 1
    cols = [xp[:, :, kh:kh + stride * oh:stride, kw:kw + stride * ow:stride]
            for kh in range(k) for kw in range(k)]
    pat = jnp.stack(cols, axis=1)                    # (C, k*k, N, OH, OW)
    return pat.reshape(c * k * k, nb * oh * ow), oh, ow


def _conv_layer(x_cnhw, w, stride, pad, kernel, out_dtype=jnp.bfloat16,
                tile_m=None):
    cout, cin, kh, kw = w.shape
    a_mat, oh, ow = _im2col_cnhw(x_cnhw, kh, stride, pad)
    w_mat = w.reshape(cout, cin * kh * kw)
    y = _conv_call(kernel, w_mat.astype(jnp.bfloat16),
                   a_mat.astype(jnp.bfloat16), out_dtype, tile_m=tile_m)
    return y.reshape(cout, x_cnhw.shape[1], oh, ow)


def _multi_tensorcore_chip():
    try:
        kind = jax.devices()[0].device_kind.lower()
    except Exception:
        return False
    return ("v7" in kind) or ("7x" in kind)


def layered_forward(x_nchw, params):
    w1, w2, w3, w4, w5 = params
    # bf16 before transpose / pad / im2col (glue traffic halved).
    x = jnp.transpose(x_nchw.astype(jnp.bfloat16), (1, 0, 2, 3))     # CNHW
    cin_pad = 8
    x = jnp.pad(x, ((0, cin_pad - x.shape[0]), (0, 0), (0, 0), (0, 0)))
    w1p = jnp.pad(w1, ((0, 0), (0, cin_pad - w1.shape[1]), (0, 0), (0, 0)))
    # Layer-1 M-tiling only pays off on multi-TensorCore chips (v7x).
    tile_m = 1024 if _multi_tensorcore_chip() else None
    x = _conv_layer(x, w1p, 2, 1, _conv_leaky_kernel, tile_m=tile_m)
    for w in (w2, w3, w4):
        x = _conv_layer(x, w, 2, 1, _conv_bn_leaky_kernel)
    y = _conv_layer(x, w5, 1, 0, _conv_sigmoid_kernel, out_dtype=jnp.float32)
    return jnp.transpose(y, (1, 0, 2, 3))


# =============================================================================
# Parameter initialization (xavier_normal + one-step spectral norm, as in the
# PyTorch module right after construction).
# =============================================================================

def xavier_normal(key, shape):
    cout, cin, kh, kw = shape
    fan_in, fan_out = cin * kh * kw, cout * kh * kw
    std = (2.0 / (fan_in + fan_out)) ** 0.5
    return std * jax.random.normal(key, shape, dtype=jnp.float32)


def spectral_normalize(w, key, n_iter=1, eps=1e-12):
    cout = w.shape[0]
    w_mat = w.reshape(cout, -1)
    u = jax.random.normal(key, (cout,), dtype=jnp.float32)
    u = u / (jnp.linalg.norm(u) + eps)
    v = u
    for _ in range(n_iter):
        v = w_mat.T @ u
        v = v / (jnp.linalg.norm(v) + eps)
        u = w_mat @ v
        u = u / (jnp.linalg.norm(u) + eps)
    sigma = u @ (w_mat @ v)
    return w / sigma


def init_discriminator_params(key, ndf):
    shapes = [(ndf, 3, 4, 4),
              (ndf * 2, ndf, 4, 4),
              (ndf * 4, ndf * 2, 4, 4),
              (ndf * 8, ndf * 4, 4, 4),
              (1, ndf * 8, 4, 4)]
    use_sn = [True, True, True, True, False]
    params = []
    for shp, sn in zip(shapes, use_sn):
        key, kw_, ku_ = jax.random.split(key, 3)
        w = xavier_normal(kw_, shp)
        if sn:
            w = spectral_normalize(w, ku_)
        params.append(w)
    return params


# =============================================================================
# main
# =============================================================================

if __name__ == "__main__":
    ndf = 16                              # small ndf (module default is 64)
    key = jax.random.PRNGKey(0)
    k_params, k_input = jax.random.split(key)

    params = init_discriminator_params(k_params, ndf)
    x = jax.random.normal(k_input, (2, 3, 64, 64), dtype=jnp.float32)  # NCHW

    fused = jax.jit(fused_forward)
    fallback = jax.jit(layered_forward)

    try:
        out = jax.block_until_ready(fused(x, params))
        if out.shape != (2, 1, 1, 1) or not bool(jnp.all(jnp.isfinite(out))):
            raise RuntimeError("fused kernel produced invalid output")
    except Exception:
        # Safety net: per-layer pipeline (previous known-good structure).
        out = jax.block_until_ready(fallback(x, params))

    assert out.shape == (2, 1, 1, 1), out.shape
    assert bool(jnp.all(jnp.isfinite(out)))
    assert bool(jnp.all((out >= 0.0) & (out <= 1.0)))
    print("KERNEL_OK")
</pallas_src>

<mosaic_0001>
module attributes {stable_mosaic.version = 11 : i64} {
  func.func @_conv_leaky_kernel(%arg0: memref<16x128xbf16, #tpu.memory_space<vmem>>, %arg1: memref<128x2048xbf16, #tpu.memory_space<vmem>>, %arg2: memref<16x2048xbf16, #tpu.memory_space<vmem>>) attributes {dimension_semantics = [], scalar_prefetch = 0 : i64, scratch_operands = 0 : i64, tpu.core_type = #tpu.core_type<tc>} {
    %c0 = arith.constant 0 : index
    %c0_0 = arith.constant 0 : index
    %0 = vector.load %arg0[%c0, %c0_0] : memref<16x128xbf16, #tpu.memory_space<vmem>>, vector<16x128xbf16>
    %c0_1 = arith.constant 0 : index
    %c0_2 = arith.constant 0 : index
    %1 = vector.load %arg1[%c0_1, %c0_2] : memref<128x2048xbf16, #tpu.memory_space<vmem>>, vector<128x2048xbf16>
    %cst = arith.constant dense<0.000000e+00> : vector<16x2048xf32>
    %2 = tpu.matmul %0, %1, %cst {dimension_numbers = #tpu.dot_dimension_numbers<[1], [0], [0], [1], [0, 0, 1, 1], [], []>} : vector<16x128xbf16>, vector<128x2048xbf16>, vector<16x2048xf32> -> vector<16x2048xf32>
    %cst_3 = arith.constant 0.000000e+00 : f32
    %3 = vector.broadcast %cst_3 : f32 to vector<16x2048xf32>
    %4 = arith.cmpf oge, %2, %3 : vector<16x2048xf32>
    %cst_4 = arith.constant 2.000000e-01 : f32
    %5 = vector.broadcast %cst_4 : f32 to vector<16x2048xf32>
    %6 = arith.mulf %5, %2 : vector<16x2048xf32>
    %7 = arith.select %4, %2, %6 : vector<16x2048xi1>, vector<16x2048xf32>
    %8 = arith.truncf %7 : vector<16x2048xf32> to vector<16x2048xbf16>
    %c0_5 = arith.constant 0 : index
    %c0_6 = arith.constant 0 : index
    %9 = vector.load %arg2[%c0_5, %c0_6] : memref<16x2048xbf16, #tpu.memory_space<vmem>>, vector<16x2048xbf16>
    tpu.vector_store %arg2[%c0_5, %c0_6], %8 {strides = array<i32>} : memref<16x2048xbf16, #tpu.memory_space<vmem>>, vector<16x2048xbf16>,
    return
  }
}

module attributes {stable_mosaic.version = 11 : i64} {
  func.func @_conv_bn_leaky_kernel(%arg0: memref<32x256xbf16, #tpu.memory_space<vmem>>, %arg1: memref<256x512xbf16, #tpu.memory_space<vmem>>, %arg2: memref<32x512xbf16, #tpu.memory_space<vmem>>) attributes {dimension_semantics = [], scalar_prefetch = 0 : i64, scratch_operands = 0 : i64, tpu.core_type = #tpu.core_type<tc>} {
    %c0 = arith.constant 0 : index
    %c0_0 = arith.constant 0 : index
    %0 = vector.load %arg0[%c0, %c0_0] : memref<32x256xbf16, #tpu.memory_space<vmem>>, vector<32x256xbf16>
    %c0_1 = arith.constant 0 : index
    %c0_2 = arith.constant 0 : index
    %1 = vector.load %arg1[%c0_1, %c0_2] : memref<256x512xbf16, #tpu.memory_space<vmem>>, vector<256x512xbf16>
    %cst = arith.constant dense<0.000000e+00> : vector<32x512xf32>
    %2 = tpu.matmul %0, %1, %cst {dimension_numbers = #tpu.dot_dimension_numbers<[1], [0], [0], [1], [0, 0, 1, 1], [], []>} : vector<32x256xbf16>, vector<256x512xbf16>, vector<32x512xf32> -> vector<32x512xf32>
    %cst_3 = arith.constant dense<0.000000e+00> : vector<32xf32>
    %3 = vector.multi_reduction <add>, %2, %cst_3 [1] : vector<32x512xf32> to vector<32xf32>
    %4 = vector.shape_cast %3 : vector<32xf32> to vector<32x1xf32>
    %cst_4 = arith.constant 5.120000e+02 : f32
    %5 = vector.broadcast %cst_4 : f32 to vector<32x1xf32>
    %6 = arith.divf %4, %5 : vector<32x1xf32>
    %7 = vector.broadcast %6 : vector<32x1xf32> to vector<32x512xf32>
    %8 = arith.subf %2, %7 : vector<32x512xf32>
    %9 = arith.mulf %8, %8 : vector<32x512xf32>
    %cst_5 = arith.constant dense<0.000000e+00> : vector<32xf32>
    %10 = vector.multi_reduction <add>, %9, %cst_5 [1] : vector<32x512xf32> to vector<32xf32>
    %11 = vector.shape_cast %10 : vector<32xf32> to vector<32x1xf32>
    %cst_6 = arith.constant 5.120000e+02 : f32
    %12 = vector.broadcast %cst_6 : f32 to vector<32x1xf32>
    %13 = arith.divf %11, %12 : vector<32x1xf32>
    %cst_7 = arith.constant 0.000000e+00 : f32
    %14 = vector.broadcast %cst_7 : f32 to vector<32x1xf32>
    %15 = arith.maximumf %13, %14 : vector<32x1xf32>
    %cst_8 = arith.constant 9.99999974E-6 : f32
    %16 = vector.broadcast %cst_8 : f32 to vector<32x1xf32>
    %17 = arith.addf %15, %16 : vector<32x1xf32>
    %18 = math.rsqrt %17 : vector<32x1xf32>
    %19 = vector.broadcast %18 : vector<32x1xf32> to vector<32x512xf32>
    %20 = arith.mulf %8, %19 : vector<32x512xf32>
    %cst_9 = arith.constant 0.000000e+00 : f32
    %21 = vector.broadcast %cst_9 : f32 to vector<32x512xf32>
    %22 = arith.cmpf oge, %20, %21 : vector<32x512xf32>
    %cst_10 = arith.constant 2.000000e-01 : f32
    %23 = vector.broadcast %cst_10 : f32 to vector<32x512xf32>
    %24 = arith.mulf %23, %20 : vector<32x512xf32>
    %25 = arith.select %22, %20, %24 : vector<32x512xi1>, vector<32x512xf32>
    %26 = arith.truncf %25 : vector<32x512xf32> to vector<32x512xbf16>
    %c0_11 = arith.constant 0 : index
    %c0_12 = arith.constant 0 : index
    %27 = vector.load %arg2[%c0_11, %c0_12] : memref<32x512xbf16, #tpu.memory_space<vmem>>, vector<32x512xbf16>
    tpu.vector_store %arg2[%c0_11, %c0_12], %26 {strides = array<i32>} : memref<32x512xbf16, #tpu.memory_space<vmem>>, vector<32x512xbf16>,
    return
  }
}

module attributes {stable_mosaic.version = 11 : i64} {
  func.func @_conv_bn_leaky_kernel(%arg0: memref<64x512xbf16, #tpu.memory_space<vmem>>, %arg1: memref<512x128xbf16, #tpu.memory_space<vmem>>, %arg2: memref<64x128xbf16, #tpu.memory_space<vmem>>) attributes {dimension_semantics = [], scalar_prefetch = 0 : i64, scratch_operands = 0 : i64, tpu.core_type = #tpu.core_type<tc>} {
    %c0 = arith.constant 0 : index
    %c0_0 = arith.constant 0 : index
    %0 = vector.load %arg0[%c0, %c0_0] : memref<64x512xbf16, #tpu.memory_space<vmem>>, vector<64x512xbf16>
    %c0_1 = arith.constant 0 : index
    %c0_2 = arith.constant 0 : index
    %1 = vector.load %arg1[%c0_1, %c0_2] : memref<512x128xbf16, #tpu.memory_space<vmem>>, vector<512x128xbf16>
    %cst = arith.constant dense<0.000000e+00> : vector<64x128xf32>
    %2 = tpu.matmul %0, %1, %cst {dimension_numbers = #tpu.dot_dimension_numbers<[1], [0], [0], [1], [0, 0, 1, 1], [], []>} : vector<64x512xbf16>, vector<512x128xbf16>, vector<64x128xf32> -> vector<64x128xf32>
    %cst_3 = arith.constant dense<0.000000e+00> : vector<64xf32>
    %3 = vector.multi_reduction <add>, %2, %cst_3 [1] : vector<64x128xf32> to vector<64xf32>
    %4 = vector.shape_cast %3 : vector<64xf32> to vector<64x1xf32>
    %cst_4 = arith.constant 1.280000e+02 : f32
    %5 = vector.broadcast %cst_4 : f32 to vector<64x1xf32>
    %6 = arith.divf %4, %5 : vector<64x1xf32>
    %7 = vector.broadcast %6 : vector<64x1xf32> to vector<64x128xf32>
    %8 = arith.subf %2, %7 : vector<64x128xf32>
    %9 = arith.mulf %8, %8 : vector<64x128xf32>
    %cst_5 = arith.constant dense<0.000000e+00> : vector<64xf32>
    %10 = vector.multi_reduction <add>, %9, %cst_5 [1] : vector<64x128xf32> to vector<64xf32>
    %11 = vector.shape_cast %10 : vector<64xf32> to vector<64x1xf32>
    %cst_6 = arith.constant 1.280000e+02 : f32
    %12 = vector.broadcast %cst_6 : f32 to vector<64x1xf32>
    %13 = arith.divf %11, %12 : vector<64x1xf32>
    %cst_7 = arith.constant 0.000000e+00 : f32
    %14 = vector.broadcast %cst_7 : f32 to vector<64x1xf32>
    %15 = arith.maximumf %13, %14 : vector<64x1xf32>
    %cst_8 = arith.constant 9.99999974E-6 : f32
    %16 = vector.broadcast %cst_8 : f32 to vector<64x1xf32>
    %17 = arith.addf %15, %16 : vector<64x1xf32>
    %18 = math.rsqrt %17 : vector<64x1xf32>
    %19 = vector.broadcast %18 : vector<64x1xf32> to vector<64x128xf32>
    %20 = arith.mulf %8, %19 : vector<64x128xf32>
    %cst_9 = arith.constant 0.000000e+00 : f32
    %21 = vector.broadcast %cst_9 : f32 to vector<64x128xf32>
    %22 = arith.cmpf oge, %20, %21 : vector<64x128xf32>
    %cst_10 = arith.constant 2.000000e-01 : f32
    %23 = vector.broadcast %cst_10 : f32 to vector<64x128xf32>
    %24 = arith.mulf %23, %20 : vector<64x128xf32>
    %25 = arith.select %22, %20, %24 : vector<64x128xi1>, vector<64x128xf32>
    %26 = arith.truncf %25 : vector<64x128xf32> to vector<64x128xbf16>
    %c0_11 = arith.constant 0 : index
    %c0_12 = arith.constant 0 : index
    %27 = vector.load %arg2[%c0_11, %c0_12] : memref<64x128xbf16, #tpu.memory_space<vmem>>, vector<64x128xbf16>
    tpu.vector_store %arg2[%c0_11, %c0_12], %26 {strides = array<i32>} : memref<64x128xbf16, #tpu.memory_space<vmem>>, vector<64x128xbf16>,
    return
  }
}

module attributes {stable_mosaic.version = 11 : i64} {
  func.func @_conv_bn_leaky_kernel(%arg0: memref<128x1024xbf16, #tpu.memory_space<vmem>>, %arg1: memref<1024x32xbf16, #tpu.memory_space<vmem>>, %arg2: memref<128x32xbf16, #tpu.memory_space<vmem>>) attributes {dimension_semantics = [], scalar_prefetch = 0 : i64, scratch_operands = 0 : i64, tpu.core_type = #tpu.core_type<tc>} {
    %c0 = arith.constant 0 : index
    %c0_0 = arith.constant 0 : index
    %0 = vector.load %arg0[%c0, %c0_0] : memref<128x1024xbf16, #tpu.memory_space<vmem>>, vector<128x1024xbf16>
    %c0_1 = arith.constant 0 : index
    %c0_2 = arith.constant 0 : index
    %1 = vector.load %arg1[%c0_1, %c0_2] : memref<1024x32xbf16, #tpu.memory_space<vmem>>, vector<1024x32xbf16>
    %cst = arith.constant dense<0.000000e+00> : vector<128x32xf32>
    %2 = tpu.matmul %0, %1, %cst {dimension_numbers = #tpu.dot_dimension_numbers<[1], [0], [0], [1], [0, 0, 1, 1], [], []>} : vector<128x1024xbf16>, vector<1024x32xbf16>, vector<128x32xf32> -> vector<128x32xf32>
    %cst_3 = arith.constant dense<0.000000e+00> : vector<128xf32>
    %3 = vector.multi_reduction <add>, %2, %cst_3 [1] : vector<128x32xf32> to vector<128xf32>
    %4 = vector.shape_cast %3 : vector<128xf32> to vector<128x1xf32>
    %cst_4 = arith.constant 3.200000e+01 : f32
    %5 = vector.broadcast %cst_4 : f32 to vector<128x1xf32>
    %6 = arith.divf %4, %5 : vector<128x1xf32>
    %7 = vector.broadcast %6 : vector<128x1xf32> to vector<128x32xf32>
    %8 = arith.subf %2, %7 : vector<128x32xf32>
    %9 = arith.mulf %8, %8 : vector<128x32xf32>
    %cst_5 = arith.constant dense<0.000000e+00> : vector<128xf32>
    %10 = vector.multi_reduction <add>, %9, %cst_5 [1] : vector<128x32xf32> to vector<128xf32>
    %11 = vector.shape_cast %10 : vector<128xf32> to vector<128x1xf32>
    %cst_6 = arith.constant 3.200000e+01 : f32
    %12 = vector.broadcast %cst_6 : f32 to vector<128x1xf32>
    %13 = arith.divf %11, %12 : vector<128x1xf32>
    %cst_7 = arith.constant 0.000000e+00 : f32
    %14 = vector.broadcast %cst_7 : f32 to vector<128x1xf32>
    %15 = arith.maximumf %13, %14 : vector<128x1xf32>
    %cst_8 = arith.constant 9.99999974E-6 : f32
    %16 = vector.broadcast %cst_8 : f32 to vector<128x1xf32>
    %17 = arith.addf %15, %16 : vector<128x1xf32>
    %18 = math.rsqrt %17 : vector<128x1xf32>
    %19 = vector.broadcast %18 : vector<128x1xf32> to vector<128x32xf32>
    %20 = arith.mulf %8, %19 : vector<128x32xf32>
    %cst_9 = arith.constant 0.000000e+00 : f32
    %21 = vector.broadcast %cst_9 : f32 to vector<128x32xf32>
    %22 = arith.cmpf oge, %20, %21 : vector<128x32xf32>
    %cst_10 = arith.constant 2.000000e-01 : f32
    %23 = vector.broadcast %cst_10 : f32 to vector<128x32xf32>
    %24 = arith.mulf %23, %20 : vector<128x32xf32>
    %25 = arith.select %22, %20, %24 : vector<128x32xi1>, vector<128x32xf32>
    %26 = arith.truncf %25 : vector<128x32xf32> to vector<128x32xbf16>
    %c0_11 = arith.constant 0 : index
    %c0_12 = arith.constant 0 : index
    %27 = vector.load %arg2[%c0_11, %c0_12] : memref<128x32xbf16, #tpu.memory_space<vmem>>, vector<128x32xbf16>
    tpu.vector_store %arg2[%c0_11, %c0_12], %26 {strides = array<i32>} : memref<128x32xbf16, #tpu.memory_space<vmem>>, vector<128x32xbf16>,
    return
  }
}

module attributes {stable_mosaic.version = 11 : i64} {
  func.func @_conv_sigmoid_kernel(%arg0: memref<1x2048xbf16, #tpu.memory_space<vmem>>, %arg1: memref<2048x2xbf16, #tpu.memory_space<vmem>>, %arg2: memref<1x2xf32, #tpu.memory_space<vmem>>) attributes {dimension_semantics = [], scalar_prefetch = 0 : i64, scratch_operands = 0 : i64, tpu.core_type = #tpu.core_type<tc>} {
    %c0 = arith.constant 0 : index
    %c0_0 = arith.constant 0 : index
    %0 = vector.load %arg0[%c0, %c0_0] : memref<1x2048xbf16, #tpu.memory_space<vmem>>, vector<1x2048xbf16>
    %c0_1 = arith.constant 0 : index
    %c0_2 = arith.constant 0 : index
    %1 = vector.load %arg1[%c0_1, %c0_2] : memref<2048x2xbf16, #tpu.memory_space<vmem>>, vector<2048x2xbf16>
    %cst = arith.constant dense<0.000000e+00> : vector<1x2xf32>
    %2 = tpu.matmul %0, %1, %cst {dimension_numbers = #tpu.dot_dimension_numbers<[1], [0], [0], [1], [0, 0, 1, 1], [], []>} : vector<1x2048xbf16>, vector<2048x2xbf16>, vector<1x2xf32> -> vector<1x2xf32>
    %cst_3 = arith.constant 0.000000e+00 : f32
    %3 = vector.broadcast %cst_3 : f32 to vector<1x2xf32>
    %4 = arith.subf %3, %2 : vector<1x2xf32>
    %5 = math.exp %4 : vector<1x2xf32>
    %cst_4 = arith.constant 1.000000e+00 : f32
    %6 = vector.broadcast %cst_4 : f32 to vector<1x2xf32>
    %7 = arith.addf %6, %5 : vector<1x2xf32>
    %cst_5 = arith.constant 1.000000e+00 : f32
    %8 = vector.broadcast %cst_5 : f32 to vector<1x2xf32>
    %9 = arith.divf %8, %7 : vector<1x2xf32>
    %c0_6 = arith.constant 0 : index
    %c0_7 = arith.constant 0 : index
    %10 = vector.load %arg2[%c0_6, %c0_7] : memref<1x2xf32, #tpu.memory_space<vmem>>, vector<1x2xf32>
    tpu.vector_store %arg2[%c0_6, %c0_7], %9 {strides = array<i32>} : memref<1x2xf32, #tpu.memory_space<vmem>>, vector<1x2xf32>,
    return
  }
}

</mosaic_0001>

<bundles_post_ra>
// kernel: layered_forward.5
= control target key start
LH: loop header
LB: loop body
LE: loop exit
PB: predicated region body
PF: predicated region fallthrough
CT: control target
= control target key end

     0   :  { %s2640_s1 = inlined_call_operand.vmem [shape: bf16[128,2048], index: 1, kind: input, shape index: {}]   ;;  %s2641_s0 = inlined_call_operand.vmem [shape: bf16[16,128], index: 0, kind: input, shape index: {}]   ;;  %s2642_s2 = inlined_call_operand.vmem [shape: bf16[16,2048], index: 2, kind: output, shape index: {}]  }
   0x1   :  { %v1597_v0 = vld [vmem:[%s2640_s1 + $0x380] sm:$0xf]  ;;  %v1772_v2 = vld [vmem:[%s2640_s1 + $0x384] sm:$0xf]  ;;  %v1605_v5 = vld [vmem:[%s2640_s1 + $0x388] sm:$0xf] }
   0x2   :  { %v1780_v1 = vld [vmem:[%s2640_s1 + $0x3bc] sm:$0xf0]  ;;  %v1599_v4 = vld [vmem:[%s2640_s1 + $0x3c0] sm:$0xf0]  ;;  %v1781_v6 = vld [vmem:[%s2640_s1 + $0x3c4] sm:$0xf0] }
   0x3   :  { %v1598_v3 = vor.u32 %v1780_v1, %v1597_v0  ;;  %v1602_v7 = vor.u32 %v1772_v2, %v1599_v4  ;;  %v1606_v8 = vor.u32 %v1781_v6, %v1605_v5  ;;  %v1773_v9 = vld [vmem:[%s2640_s1 + $0x38c] sm:$0xf]  ;;  %v1533_v11 = vld [vmem:[%s2640_s1 + $0x300] sm:$0xf]  ;;  %v1756_v14 = vld [vmem:[%s2640_s1 + $0x304] sm:$0xf] }
   0x4   :  { %v1607_v10 = vld [vmem:[%s2640_s1 + $0x3c8] sm:$0xf0]  ;;  %v1764_v13 = vld [vmem:[%s2640_s1 + $0x33c] sm:$0xf0]  ;;  %v1535_v15 = vld [vmem:[%s2640_s1 + $0x340] sm:$0xf0] }
   0x5   :  { %787 = vmatpush.bf16.msra.mxu0 %v1598_v3  ;;  %v1610_v12 = vor.u32 %v1773_v9, %v1607_v10  ;;  %801 = vmatpush.bf16.msra.mxu1 %v1602_v7  ;;  %v1534_v16 = vor.u32 %v1764_v13, %v1533_v11  ;;  %v1538_v17 = vor.u32 %v1756_v14, %v1535_v15  ;;  %v1541_v18 = vld [vmem:[%s2640_s1 + $0x308] sm:$0xf]  ;;  %v1757_v20 = vld [vmem:[%s2640_s1 + $0x30c] sm:$0xf]  ;;  %v1469_v23 = vld [vmem:[%s2640_s1 + $0x280] sm:$0xf] }
   0x6   :  { %815 = vmatpush.bf16.msra.mxu2 %v1606_v8  ;;  %v1765_v19 = vld [vmem:[%s2640_s1 + $0x344] sm:$0xf0]  ;;  %v1543_v22 = vld [vmem:[%s2640_s1 + $0x348] sm:$0xf0]  ;;  %v1748_v24 = vld [vmem:[%s2640_s1 + $0x2bc] sm:$0xf0] }
   0x7   :  { %829 = vmatpush.bf16.msra.mxu3 %v1610_v12  ;;  %v1542_v21 = vor.u32 %v1765_v19, %v1541_v18  ;;  %v1546_v25 = vor.u32 %v1757_v20, %v1543_v22  ;;  %v1740_v26 = vld [vmem:[%s2640_s1 + $0x284] sm:$0xf]  ;;  %v1477_v28 = vld [vmem:[%s2640_s1 + $0x288] sm:$0xf]  ;;  %v1470_v29 = vor.u32 %v1748_v24, %v1469_v23  ;;  %v1741_v31 = vld [vmem:[%s2640_s1 + $0x28c] sm:$0xf] }
   0x8   :  { %v1471_v27 = vld [vmem:[%s2640_s1 + $0x2c0] sm:$0xf0]  ;;  %v1749_v30 = vld [vmem:[%s2640_s1 + $0x2c4] sm:$0xf0]  ;;  %v1479_v32 = vld [vmem:[%s2640_s1 + $0x2c8] sm:$0xf0] }
   0x9   :  { %788 = vmatpush.bf16.msra.mxu0 %v1534_v16  ;;  %802 = vmatpush.bf16.msra.mxu1 %v1538_v17  ;;  %v1474_v33 = vor.u32 %v1740_v26, %v1471_v27  ;;  %v1478_v34 = vor.u32 %v1749_v30, %v1477_v28  ;;  %v1405_v35 = vld [vmem:[%s2640_s1 + $0x200] sm:$0xf]  ;;  %v1724_v37 = vld [vmem:[%s2640_s1 + $0x204] sm:$0xf]  ;;  %v1482_v38 = vor.u32 %v1741_v31, %v1479_v32  ;;  %v1413_v40 = vld [vmem:[%s2640_s1 + $0x208] sm:$0xf] }
   0xa   :  { %816 = vmatpush.bf16.msra.mxu2 %v1542_v21  ;;  %v1732_v36 = vld [vmem:[%s2640_s1 + $0x23c] sm:$0xf0]  ;;  %v1407_v39 = vld [vmem:[%s2640_s1 + $0x240] sm:$0xf0]  ;;  %v1733_v41 = vld [vmem:[%s2640_s1 + $0x244] sm:$0xf0] }
   0xb   :  { %830 = vmatpush.bf16.msra.mxu3 %v1546_v25  ;;  %v1725_v42 = vld [vmem:[%s2640_s1 + $0x20c] sm:$0xf]  ;;  %v1406_v44 = vor.u32 %v1732_v36, %v1405_v35  ;;  %v1410_v45 = vor.u32 %v1724_v37, %v1407_v39  ;;  %v1414_v46 = vor.u32 %v1733_v41, %v1413_v40  ;;  %v1341_v47 = vld [vmem:[%s2640_s1 + $0x180] sm:$0xf]  ;;  %v1708_v49 = vld [vmem:[%s2640_s1 + $0x184] sm:$0xf] }
   0xc   :  { %v1415_v43 = vld [vmem:[%s2640_s1 + $0x248] sm:$0xf0]  ;;  %v1716_v48 = vld [vmem:[%s2640_s1 + $0x1bc] sm:$0xf0]  ;;  %v1343_v51 = vld [vmem:[%s2640_s1 + $0x1c0] sm:$0xf0] }
   0xd   :  { %789 = vmatpush.bf16.msra.mxu0 %v1470_v29  ;;  %803 = vmatpush.bf16.msra.mxu1 %v1474_v33  ;;  %v1418_v50 = vor.u32 %v1725_v42, %v1415_v43  ;;  %v1349_v52 = vld [vmem:[%s2640_s1 + $0x188] sm:$0xf]  ;;  %v1709_v54 = vld [vmem:[%s2640_s1 + $0x18c] sm:$0xf]  ;;  %v1342_v56 = vor.u32 %v1716_v48, %v1341_v47  ;;  %v1346_v57 = vor.u32 %v1708_v49, %v1343_v51  ;;  %v1277_v59 = vld [vmem:[%s2640_s1 + $0x100] sm:$0xf] }
   0xe   :  { %817 = vmatpush.bf16.msra.mxu2 %v1478_v34  ;;  %v1717_v53 = vld [vmem:[%s2640_s1 + $0x1c4] sm:$0xf0]  ;;  %v1351_v55 = vld [vmem:[%s2640_s1 + $0x1c8] sm:$0xf0]  ;;  %v1700_v60 = vld [vmem:[%s2640_s1 + $0x13c] sm:$0xf0] }
   0xf   :  { %831 = vmatpush.bf16.msra.mxu3 %v1482_v38  ;;  %v1350_v58 = vor.u32 %v1717_v53, %v1349_v52  ;;  %v1692_v61 = vld [vmem:[%s2640_s1 + $0x104] sm:$0xf]  ;;  %v1354_v62 = vor.u32 %v1709_v54, %v1351_v55  ;;  %v1285_v0 = vld [vmem:[%s2640_s1 + $0x108] sm:$0xf]  ;;  %v1693_v2 = vld [vmem:[%s2640_s1 + $0x10c] sm:$0xf]  ;;  %v1278_v4 = vor.u32 %v1700_v60, %v1277_v59 }
  0x10   :  { %v1279_v63 = vld [vmem:[%s2640_s1 + $0x140] sm:$0xf0]  ;;  %v1701_v1 = vld [vmem:[%s2640_s1 + $0x144] sm:$0xf0]  ;;  %v1287_v3 = vld [vmem:[%s2640_s1 + $0x148] sm:$0xf0] }
  0x11   :  { %790 = vmatpush.bf16.msra.mxu0 %v1406_v44  ;;  %804 = vmatpush.bf16.msra.mxu1 %v1410_v45  ;;  %v1282_v5 = vor.u32 %v1692_v61, %v1279_v63  ;;  %v1286_v6 = vor.u32 %v1701_v1, %v1285_v0  ;;  %v1213_v7 = vld [vmem:[%s2640_s1 + $0x80] sm:$0xf]  ;;  %v1676_v9 = vld [vmem:[%s2640_s1 + $0x84] sm:$0xf]  ;;  %v1290_v10 = vor.u32 %v1693_v2, %v1287_v3  ;;  %v1221_v12 = vld [vmem:[%s2640_s1 + $0x88] sm:$0xf] }
  0x12   :  { %818 = vmatpush.bf16.msra.mxu2 %v1414_v46  ;;  %v1684_v8 = vld [vmem:[%s2640_s1 + $0xbc] sm:$0xf0]  ;;  %v1215_v11 = vld [vmem:[%s2640_s1 + $0xc0] sm:$0xf0]  ;;  %v1685_v13 = vld [vmem:[%s2640_s1 + $0xc4] sm:$0xf0] }
  0x13   :  { %832 = vmatpush.bf16.msra.mxu3 %v1418_v50  ;;  %v1677_v14 = vld [vmem:[%s2640_s1 + $0x8c] sm:$0xf]  ;;  %v1214_v16 = vor.u32 %v1684_v8, %v1213_v7  ;;  %v1149_v17 = vld [vmem:[%s2640_s1] sm:$0xf]  ;;  %v1218_v19 = vor.u32 %v1676_v9, %v1215_v11  ;;  %v1222_v20 = vor.u32 %v1685_v13, %v1221_v12  ;;  %v1660_v21 = vld [vmem:[%s2640_s1 + $0x4] sm:$0xf] }
  0x14   :  { %v1223_v15 = vld [vmem:[%s2640_s1 + $0xc8] sm:$0xf0]  ;;  %v1668_v18 = vld [vmem:[%s2640_s1 + $0x3c] sm:$0xf0]  ;;  %v1151_v22 = vld [vmem:[%s2640_s1 + $0x40] sm:$0xf0] }
  0x15   :  { %791 = vmatpush.bf16.msra.mxu0 %v1342_v56  ;;  %805 = vmatpush.bf16.msra.mxu1 %v1346_v57  ;;  %v1157_v23 = vld [vmem:[%s2640_s1 + $0x8] sm:$0xf]  ;;  %v1226_v24 = vor.u32 %v1677_v14, %v1223_v15  ;;  %v1661_v26 = vld [vmem:[%s2640_s1 + $0xc] sm:$0xf]  ;;  %v1613_v28 = vld [vmem:[%s2640_s1 + $0x390] sm:$0xf]  ;;  %v1150_v31 = vor.u32 %v1668_v18, %v1149_v17  ;;  %v1154_v35 = vor.u32 %v1660_v21, %v1151_v22 }
  0x16   :  { %819 = vmatpush.bf16.msra.mxu2 %v1350_v58  ;;  %v1669_v25 = vld [vmem:[%s2640_s1 + $0x44] sm:$0xf0]  ;;  %v1159_v27 = vld [vmem:[%s2640_s1 + $0x48] sm:$0xf0]  ;;  %v1782_v29 = vld [vmem:[%s2640_s1 + $0x3cc] sm:$0xf0] }
  0x17   :  { %833 = vmatpush.bf16.msra.mxu3 %v1354_v62  ;;  %v1774_v30 = vld [vmem:[%s2640_s1 + $0x394] sm:$0xf]  ;;  %v1621_v33 = vld [vmem:[%s2640_s1 + $0x398] sm:$0xf]  ;;  %v1158_v36 = vor.u32 %v1669_v25, %v1157_v23  ;;  %v1775_v37 = vld [vmem:[%s2640_s1 + $0x39c] sm:$0xf]  ;;  %v1162_v39 = vor.u32 %v1661_v26, %v1159_v27  ;;  %v1614_v40 = vor.u32 %v1782_v29, %v1613_v28 }
  0x18   :  { %v1615_v32 = vld [vmem:[%s2640_s1 + $0x3d0] sm:$0xf0]  ;;  %v1783_v34 = vld [vmem:[%s2640_s1 + $0x3d4] sm:$0xf0]  ;;  %v1623_v38 = vld [vmem:[%s2640_s1 + $0x3d8] sm:$0xf0] }
  0x19   :  { %792 = vmatpush.bf16.msra.mxu0 %v1278_v4  ;;  %806 = vmatpush.bf16.msra.mxu1 %v1282_v5  ;;  %v1618_v41 = vor.u32 %v1774_v30, %v1615_v32  ;;  %v1622_v42 = vor.u32 %v1783_v34, %v1621_v33  ;;  %v1549_v43 = vld [vmem:[%s2640_s1 + $0x310] sm:$0xf]  ;;  %v1758_v45 = vld [vmem:[%s2640_s1 + $0x314] sm:$0xf]  ;;  %v1626_v46 = vor.u32 %v1775_v37, %v1623_v38  ;;  %v1557_v48 = vld [vmem:[%s2640_s1 + $0x318] sm:$0xf] }
  0x1a   :  { %820 = vmatpush.bf16.msra.mxu2 %v1286_v6  ;;  %v1766_v44 = vld [vmem:[%s2640_s1 + $0x34c] sm:$0xf0]  ;;  %v1551_v47 = vld [vmem:[%s2640_s1 + $0x350] sm:$0xf0]  ;;  %v1767_v49 = vld [vmem:[%s2640_s1 + $0x354] sm:$0xf0] }
  0x1b   :  { %834 = vmatpush.bf16.msra.mxu3 %v1290_v10  ;;  %v1759_v50 = vld [vmem:[%s2640_s1 + $0x31c] sm:$0xf]  ;;  %v1550_v52 = vor.u32 %v1766_v44, %v1549_v43  ;;  %v1485_v53 = vld [vmem:[%s2640_s1 + $0x290] sm:$0xf]  ;;  %v1554_v54 = vor.u32 %v1758_v45, %v1551_v47  ;;  %v1558_v55 = vor.u32 %v1767_v49, %v1557_v48  ;;  %v1742_v57 = vld [vmem:[%s2640_s1 + $0x294] sm:$0xf] }
  0x1c   :  { %v1559_v51 = vld [vmem:[%s2640_s1 + $0x358] sm:$0xf0]  ;;  %v1750_v56 = vld [vmem:[%s2640_s1 + $0x2cc] sm:$0xf0]  ;;  %v2055_v58 = vld [vmem:[%s2641_s0] sm:$0xff] }
  0x1d   :  { %793 = vmatpush.bf16.msra.mxu0 %v1214_v16  ;;  %807 = vmatpush.bf16.msra.mxu1 %v1218_v19  ;;  %v1562_v59 = vor.u32 %v1759_v50, %v1559_v51  ;;  %v1487_v60 = vld [vmem:[%s2640_s1 + $0x2d0] sm:$0xf0]  ;;  %v1493_v61 = vld [vmem:[%s2640_s1 + $0x298] sm:$0xf]  ;;  %v1743_v63 = vld [vmem:[%s2640_s1 + $0x29c] sm:$0xf]  ;;  %v1486_v1 = vor.u32 %v1750_v56, %v1485_v53 }
  0x1e   :  { %821 = vmatpush.bf16.msra.mxu2 %v1222_v20  ;;  %v1751_v62 = vld [vmem:[%s2640_s1 + $0x2d4] sm:$0xf0]  ;;  %v1495_v0 = vld [vmem:[%s2640_s1 + $0x2d8] sm:$0xf0]  ;;  %v1490_v2 = vor.u32 %v1742_v57, %v1487_v60  ;;  %v1421_v4 = vld [vmem:[%s2640_s1 + $0x210] sm:$0xf] }
  0x1f   :  { %835 = vmatpush.bf16.msra.mxu3 %v1226_v24  ;;  %v1494_v3 = vor.u32 %v1751_v62, %v1493_v61  ;;  %v1734_v5 = vld [vmem:[%s2640_s1 + $0x24c] sm:$0xf0]  ;;  %v1726_v6 = vld [vmem:[%s2640_s1 + $0x214] sm:$0xf]  ;;  %v1498_v7 = vor.u32 %v1743_v63, %v1495_v0  ;;  %v1429_v9 = vld [vmem:[%s2640_s1 + $0x218] sm:$0xf] }
  0x20   :  { %v1423_v8 = vld [vmem:[%s2640_s1 + $0x250] sm:$0xf0]  ;;  %v1735_v10 = vld [vmem:[%s2640_s1 + $0x254] sm:$0xf0]  ;;  %v1727_v11 = vld [vmem:[%s2640_s1 + $0x21c] sm:$0xf]  ;;  %v1422_v13 = vor.u32 %v1734_v5, %v1421_v4 }
  0x21   :  { %794 = vmatpush.bf16.msra.mxu0 %v1150_v31  ;;  %808 = vmatpush.bf16.msra.mxu1 %v1154_v35  ;;  %v1431_v12 = vld [vmem:[%s2640_s1 + $0x258] sm:$0xf0]  ;;  %v1426_v14 = vor.u32 %v1726_v6, %v1423_v8  ;;  %v1430_v15 = vor.u32 %v1735_v10, %v1429_v9  ;;  %v1357_v16 = vld [vmem:[%s2640_s1 + $0x190] sm:$0xf]  ;;  %v1710_v18 = vld [vmem:[%s2640_s1 + $0x194] sm:$0xf] }
  0x22   :  { %822 = vmatpush.bf16.msra.mxu2 %v1158_v36  ;;  %v1718_v17 = vld [vmem:[%s2640_s1 + $0x1cc] sm:$0xf0]  ;;  %v1434_v19 = vor.u32 %v1727_v11, %v1431_v12  ;;  %v1359_v20 = vld [vmem:[%s2640_s1 + $0x1d0] sm:$0xf0]  ;;  %v1365_v21 = vld [vmem:[%s2640_s1 + $0x198] sm:$0xf] }
  0x23   :  { %836 = vmatpush.bf16.msra.mxu3 %v1162_v39  ;;  %v1719_v22 = vld [vmem:[%s2640_s1 + $0x1d4] sm:$0xf0]  ;;  %v1711_v23 = vld [vmem:[%s2640_s1 + $0x19c] sm:$0xf]  ;;  %v1358_v25 = vor.u32 %v1718_v17, %v1357_v16  ;;  %v1362_v26 = vor.u32 %v1710_v18, %v1359_v20  ;;  %v1293_v28 = vld [vmem:[%s2640_s1 + $0x110] sm:$0xf] }
  0x24   :  { %809 = vmatmul.bf16.vlgmr.msra.gmra.mxu1 %v2055_v58  ;;  %795 = vmatmul.bf16.vlgmr.msra.gmra.mxu0 %v2055_v58  ;;  %v1367_v24 = vld [vmem:[%s2640_s1 + $0x1d8] sm:$0xf0]  ;;  %v1366_v27 = vor.u32 %v1719_v22, %v1365_v21  ;;  %v1702_v29 = vld [vmem:[%s2640_s1 + $0x14c] sm:$0xf0]  ;;  %v1694_v30 = vld [vmem:[%s2640_s1 + $0x114] sm:$0xf] }
  0x25   :  { %843 = vmatpush.bf16.msrb.mxu0 %v1614_v40  ;;  %857 = vmatpush.bf16.msrb.mxu1 %v1618_v41  ;;  %v1370_v31 = vor.u32 %v1711_v23, %v1367_v24  ;;  %v1295_v32 = vld [vmem:[%s2640_s1 + $0x150] sm:$0xf0]  ;;  %v1301_v33 = vld [vmem:[%s2640_s1 + $0x118] sm:$0xf]  ;;  %v1695_v35 = vld [vmem:[%s2640_s1 + $0x11c] sm:$0xf]  ;;  %v1294_v37 = vor.u32 %v1702_v29, %v1293_v28 }
  0x26   :  { %871 = vmatpush.bf16.msrb.mxu2 %v1622_v42  ;;  %837 = vmatmul.bf16.vlgmr.msra.gmra.mxu3 %v2055_v58  ;;  %v1703_v34 = vld [vmem:[%s2640_s1 + $0x154] sm:$0xf0]  ;;  %v1303_v36 = vld [vmem:[%s2640_s1 + $0x158] sm:$0xf0]  ;;  %v1298_v38 = vor.u32 %v1694_v30, %v1295_v32  ;;  %v1229_v40 = vld [vmem:[%s2640_s1 + $0x90] sm:$0xf] }
  0x27   :  { %885 = vmatpush.bf16.msrb.mxu3 %v1626_v46  ;;  %823 = vmatmul.bf16.vlgmr.msra.gmra.mxu2 %v2055_v58  ;;  %v1302_v39 = vor.u32 %v1703_v34, %v1301_v33  ;;  %v1686_v41 = vld [vmem:[%s2640_s1 + $0xcc] sm:$0xf0]  ;;  %v1678_v42 = vld [vmem:[%s2640_s1 + $0x94] sm:$0xf]  ;;  %v1306_v43 = vor.u32 %v1695_v35, %v1303_v36  ;;  %v1237_v45 = vld [vmem:[%s2640_s1 + $0x98] sm:$0xf] }
  0x28   :  { %v1231_v44 = vld [vmem:[%s2640_s1 + $0xd0] sm:$0xf0]  ;;  %v1687_v46 = vld [vmem:[%s2640_s1 + $0xd4] sm:$0xf0]  ;;  %v1679_v47 = vld [vmem:[%s2640_s1 + $0x9c] sm:$0xf]  ;;  %v1230_v49 = vor.u32 %v1686_v41, %v1229_v40 }
  0x29   :  { %844 = vmatpush.bf16.msrb.mxu0 %v1550_v52  ;;  %858 = vmatpush.bf16.msrb.mxu1 %v1554_v54  ;;  %v1239_v48 = vld [vmem:[%s2640_s1 + $0xd8] sm:$0xf0]  ;;  %v1165_v50 = vld [vmem:[%s2640_s1 + $0x10] sm:$0xf]  ;;  %v1234_v52 = vor.u32 %v1678_v42, %v1231_v44  ;;  %v1238_v53 = vor.u32 %v1687_v46, %v1237_v45  ;;  %v1662_v54 = vld [vmem:[%s2640_s1 + $0x14] sm:$0xf] }
  0x2a   :  { %872 = vmatpush.bf16.msrb.mxu2 %v1558_v55  ;;  %v1670_v51 = vld [vmem:[%s2640_s1 + $0x4c] sm:$0xf0]  ;;  %v1167_v55 = vld [vmem:[%s2640_s1 + $0x50] sm:$0xf0]  ;;  %v1173_v56 = vld [vmem:[%s2640_s1 + $0x18] sm:$0xf]  ;;  %v1242_v57 = vor.u32 %v1679_v47, %v1239_v48 }
  0x2b   :  { %886 = vmatpush.bf16.msrb.mxu3 %v1562_v59  ;;  %v1671_v59 = vld [vmem:[%s2640_s1 + $0x54] sm:$0xf0]  ;;  %v1663_v60 = vld [vmem:[%s2640_s1 + $0x1c] sm:$0xf]  ;;  %v1629_v62 = vld [vmem:[%s2640_s1 + $0x3a0] sm:$0xf]  ;;  %v1170_v5 = vor.u32 %v1662_v54, %v1167_v55 }
  0x2c   :  { %v1175_v61 = vld [vmem:[%s2640_s1 + $0x58] sm:$0xf0]  ;;  %v1784_v63 = vld [vmem:[%s2640_s1 + $0x3dc] sm:$0xf0]  ;;  %v1776_v0 = vld [vmem:[%s2640_s1 + $0x3a4] sm:$0xf]  ;;  %v1174_v6 = vor.u32 %v1671_v59, %v1173_v56 }
  0x2d   :  { %845 = vmatpush.bf16.msrb.mxu0 %v1486_v1  ;;  %859 = vmatpush.bf16.msrb.mxu1 %v1490_v2  ;;  %v1166_v1 = vor.u32 %v1670_v51, %v1165_v50  ;;  %v1631_v2 = vld [vmem:[%s2640_s1 + $0x3e0] sm:$0xf0]  ;;  %v1785_v4 = vld [vmem:[%s2640_s1 + $0x3e4] sm:$0xf0]  ;;  %v1639_v8 = vld [vmem:[%s2640_s1 + $0x3e8] sm:$0xf0]  ;;  %v1178_v9 = vor.u32 %v1663_v60, %v1175_v61  ;;  %v1630_v10 = vor.u32 %v1784_v63, %v1629_v62 }
  0x2e   :  { %873 = vmatpush.bf16.msrb.mxu2 %v1494_v3  ;;  %v1637_v3 = vld [vmem:[%s2640_s1 + $0x3a8] sm:$0xf]  ;;  %v1634_v11 = vor.u32 %v1776_v0, %v1631_v2  ;;  %v1567_v17 = vld [vmem:[%s2640_s1 + $0x360] sm:$0xf0]  ;;  %v1761_v20 = vld [vmem:[%s2640_s1 + $0x32c] sm:$0xf] }
  0x2f   :  { %887 = vmatpush.bf16.msrb.mxu3 %v1498_v7  ;;  %v1777_v7 = vld [vmem:[%s2640_s1 + $0x3ac] sm:$0xf]  ;;  %v1638_v12 = vor.u32 %v1785_v4, %v1637_v3  ;;  %v1573_v18 = vld [vmem:[%s2640_s1 + $0x328] sm:$0xf]  ;;  %v1503_v29 = vld [vmem:[%s2640_s1 + $0x2e0] sm:$0xf0] }
  0x30   :  { %v1642_v16 = vor.u32 %v1777_v7, %v1639_v8  ;;  %v1575_v21 = vld [vmem:[%s2640_s1 + $0x368] sm:$0xf0]  ;;  %v1509_v30 = vld [vmem:[%s2640_s1 + $0x2a8] sm:$0xf]  ;;  %v1439_v41 = vld [vmem:[%s2640_s1 + $0x260] sm:$0xf0] }
  0x31   :  { %846 = vmatpush.bf16.msrb.mxu0 %v1422_v13  ;;  %860 = vmatpush.bf16.msrb.mxu1 %v1426_v14  ;;  %v1565_v13 = vld [vmem:[%s2640_s1 + $0x320] sm:$0xf]  ;;  %v1578_v28 = vor.u32 %v1761_v20, %v1575_v21  ;;  %v1745_v32 = vld [vmem:[%s2640_s1 + $0x2ac] sm:$0xf]  ;;  %v1445_v42 = vld [vmem:[%s2640_s1 + $0x228] sm:$0xf] }
  0x32   :  { %874 = vmatpush.bf16.msrb.mxu2 %v1430_v15  ;;  %v1768_v14 = vld [vmem:[%s2640_s1 + $0x35c] sm:$0xf0]  ;;  %v1760_v15 = vld [vmem:[%s2640_s1 + $0x324] sm:$0xf]  ;;  %v1511_v33 = vld [vmem:[%s2640_s1 + $0x2e8] sm:$0xf0] }
  0x33   :  { %888 = vmatpush.bf16.msrb.mxu3 %v1434_v19  ;;  %v1769_v19 = vld [vmem:[%s2640_s1 + $0x364] sm:$0xf0]  ;;  %v1566_v22 = vor.u32 %v1768_v14, %v1565_v13  ;;  %v1570_v23 = vor.u32 %v1760_v15, %v1567_v17  ;;  %v1514_v40 = vor.u32 %v1745_v32, %v1511_v33  ;;  %v1729_v44 = vld [vmem:[%s2640_s1 + $0x22c] sm:$0xf]  ;;  %v1720_v50 = vld [vmem:[%s2640_s1 + $0x1dc] sm:$0xf0] }
  0x34   :  { %v1574_v24 = vor.u32 %v1769_v19, %v1573_v18  ;;  %v1447_v45 = vld [vmem:[%s2640_s1 + $0x268] sm:$0xf0]  ;;  %v1712_v51 = vld [vmem:[%s2640_s1 + $0x1a4] sm:$0xf]  ;;  %v1381_v54 = vld [vmem:[%s2640_s1 + $0x1a8] sm:$0xf] }
  0x35   :  { %847 = vmatpush.bf16.msrb.mxu0 %v1358_v25  ;;  %861 = vmatpush.bf16.msrb.mxu1 %v1362_v26  ;;  %v1501_v25 = vld [vmem:[%s2640_s1 + $0x2a0] sm:$0xf]  ;;  %v1721_v55 = vld [vmem:[%s2640_s1 + $0x1e4] sm:$0xf0]  ;;  %v1713_v56 = vld [vmem:[%s2640_s1 + $0x1ac] sm:$0xf] }
  0x36   :  { %875 = vmatpush.bf16.msrb.mxu2 %v1366_v27  ;;  %v1752_v26 = vld [vmem:[%s2640_s1 + $0x2dc] sm:$0xf0]  ;;  %v1744_v27 = vld [vmem:[%s2640_s1 + $0x2a4] sm:$0xf]  ;;  %v1382_v61 = vor.u32 %v1721_v55, %v1381_v54  ;;  %v1317_v3 = vld [vmem:[%s2640_s1 + $0x128] sm:$0xf] }
  0x37   :  { %889 = vmatpush.bf16.msrb.mxu3 %v1370_v31  ;;  %v1753_v31 = vld [vmem:[%s2640_s1 + $0x2e4] sm:$0xf0]  ;;  %v1502_v34 = vor.u32 %v1752_v26, %v1501_v25  ;;  %v1506_v35 = vor.u32 %v1744_v27, %v1503_v29  ;;  %v1309_v62 = vld [vmem:[%s2640_s1 + $0x120] sm:$0xf]  ;;  %v1696_v0 = vld [vmem:[%s2640_s1 + $0x124] sm:$0xf] }
  0x38   :  { %v1510_v36 = vor.u32 %v1753_v31, %v1509_v30  ;;  %v1704_v63 = vld [vmem:[%s2640_s1 + $0x15c] sm:$0xf0]  ;;  %v1311_v2 = vld [vmem:[%s2640_s1 + $0x160] sm:$0xf0]  ;;  %v1705_v4 = vld [vmem:[%s2640_s1 + $0x164] sm:$0xf0] }
  0x39   :  { %848 = vmatpush.bf16.msrb.mxu0 %v1294_v37  ;;  %862 = vmatpush.bf16.msrb.mxu1 %v1298_v38  ;;  %v1437_v37 = vld [vmem:[%s2640_s1 + $0x220] sm:$0xf]  ;;  %v1310_v7 = vor.u32 %v1704_v63, %v1309_v62  ;;  %v1314_v8 = vor.u32 %v1696_v0, %v1311_v2  ;;  %v1247_v14 = vld [vmem:[%s2640_s1 + $0xe0] sm:$0xf0]  ;;  %v1253_v15 = vld [vmem:[%s2640_s1 + $0xa8] sm:$0xf] }
  0x3a   :  { %876 = vmatpush.bf16.msrb.mxu2 %v1302_v39  ;;  %v1736_v38 = vld [vmem:[%s2640_s1 + $0x25c] sm:$0xf0]  ;;  %v1728_v39 = vld [vmem:[%s2640_s1 + $0x224] sm:$0xf]  ;;  %v1681_v17 = vld [vmem:[%s2640_s1 + $0xac] sm:$0xf] }
  0x3b   :  { %890 = vmatpush.bf16.msrb.mxu3 %v1306_v43  ;;  %v1737_v43 = vld [vmem:[%s2640_s1 + $0x264] sm:$0xf0]  ;;  %v1438_v46 = vor.u32 %v1736_v38, %v1437_v37  ;;  %v1442_v47 = vor.u32 %v1728_v39, %v1439_v41  ;;  %v1255_v18 = vld [vmem:[%s2640_s1 + $0xe8] sm:$0xf0]  ;;  %v1181_v20 = vld [vmem:[%s2640_s1 + $0x20] sm:$0xf] }
  0x3c   :  { %v1446_v48 = vor.u32 %v1737_v43, %v1445_v42  ;;  %v1672_v21 = vld [vmem:[%s2640_s1 + $0x5c] sm:$0xf0]  ;;  %v1183_v25 = vld [vmem:[%s2640_s1 + $0x60] sm:$0xf0]  ;;  %v1189_v26 = vld [vmem:[%s2640_s1 + $0x28] sm:$0xf]  ;;  %v1258_v27 = vor.u32 %v1681_v17, %v1255_v18 }
  0x3d   :  { %849 = vmatpush.bf16.msrb.mxu0 %v1230_v49  ;;  %863 = vmatpush.bf16.msrb.mxu1 %v1234_v52  ;;  %v1373_v49 = vld [vmem:[%s2640_s1 + $0x1a0] sm:$0xf]  ;;  %v1450_v52 = vor.u32 %v1729_v44, %v1447_v45  ;;  %v1665_v29 = vld [vmem:[%s2640_s1 + $0x2c] sm:$0xf]  ;;  %v1645_v31 = vld [vmem:[%s2640_s1 + $0x3b0] sm:$0xf] }
  0x3e   :  { %877 = vmatpush.bf16.msrb.mxu2 %v1238_v53  ;;  %v1375_v53 = vld [vmem:[%s2640_s1 + $0x1e0] sm:$0xf0]  ;;  %v1374_v59 = vor.u32 %v1720_v50, %v1373_v49  ;;  %v1191_v30 = vld [vmem:[%s2640_s1 + $0x68] sm:$0xf0]  ;;  %v1786_v32 = vld [vmem:[%s2640_s1 + $0x3ec] sm:$0xf0] }
  0x3f   :  { %891 = vmatpush.bf16.msrb.mxu3 %v1242_v57  ;;  %v1383_v57 = vld [vmem:[%s2640_s1 + $0x1e8] sm:$0xf0]  ;;  %v1378_v60 = vor.u32 %v1712_v51, %v1375_v53  ;;  %v1778_v33 = vld [vmem:[%s2640_s1 + $0x3b4] sm:$0xf]  ;;  %v1787_v37 = vld [vmem:[%s2640_s1 + $0x3f4] sm:$0xf0]  ;;  %v1194_v42 = vor.u32 %v1665_v29, %v1191_v30  ;;  %v1646_v43 = vor.u32 %v1786_v32, %v1645_v31 }
  0x40   :  { %v1655_v41 = vld [vmem:[%s2640_s1 + $0x3f8] sm:$0xf0]  ;;  %v1583_v50 = vld [vmem:[%s2640_s1 + $0x370] sm:$0xf0]  ;;  %v1589_v51 = vld [vmem:[%s2640_s1 + $0x338] sm:$0xf] }
  0x41   :  { %850 = vmatpush.bf16.msrb.mxu0 %v1166_v1  ;;  %864 = vmatpush.bf16.msrb.mxu1 %v1170_v5  ;;  %v1386_v1 = vor.u32 %v1713_v56, %v1383_v57  ;;  %v1697_v5 = vld [vmem:[%s2640_s1 + $0x12c] sm:$0xf]  ;;  %v1763_v53 = vld [vmem:[%s2640_s1 + $0x33c] sm:$0xf]  ;;  %v1519_v63 = vld [vmem:[%s2640_s1 + $0x2f0] sm:$0xf0] }
  0x42   :  { %878 = vmatpush.bf16.msrb.mxu2 %v1174_v6  ;;  %v1319_v6 = vld [vmem:[%s2640_s1 + $0x168] sm:$0xf0]  ;;  %v1591_v54 = vld [vmem:[%s2640_s1 + $0x378] sm:$0xf0]  ;;  %v1525_v0 = vld [vmem:[%s2640_s1 + $0x2b8] sm:$0xf] }
  0x43   :  { %892 = vmatpush.bf16.msrb.mxu3 %v1178_v9  ;;  %v1318_v9 = vor.u32 %v1705_v4, %v1317_v3  ;;  %v1322_v13 = vor.u32 %v1697_v5, %v1319_v6  ;;  %v1594_v62 = vor.u32 %v1763_v53, %v1591_v54  ;;  %v1747_v2 = vld [vmem:[%s2640_s1 + $0x2bc] sm:$0xf]  ;;  %v1325_v31 = vld [vmem:[%s2640_s1 + $0x130] sm:$0xf] }
  0x44   :  { %851 = vmatmul.bf16.vlgmr.msrb.gmra.mxu0 %v2055_v58  ;;  %865 = vmatmul.bf16.vlgmr.msrb.gmra.mxu1 %v2055_v58  ;;  %v1527_v3 = vld [vmem:[%s2640_s1 + $0x2f8] sm:$0xf0]  ;;  %v1706_v32 = vld [vmem:[%s2640_s1 + $0x16c] sm:$0xf0] }
  0x45   :  { %899 = vmatpush.bf16.msra.mxu0 %v1630_v10  ;;  %913 = vmatpush.bf16.msra.mxu1 %v1634_v11  ;;  %v1245_v10 = vld [vmem:[%s2640_s1 + $0xa0] sm:$0xf] }
  0x46   :  { %927 = vmatpush.bf16.msra.mxu2 %v1638_v12  ;;  %893 = vmatmul.bf16.vlgmr.msrb.gmra.mxu3 %v2055_v58  ;;  %v1688_v11 = vld [vmem:[%s2640_s1 + $0xdc] sm:$0xf0]  ;;  %v1680_v12 = vld [vmem:[%s2640_s1 + $0xa4] sm:$0xf] }
  0x47   :  { %941 = vmatpush.bf16.msra.mxu3 %v1642_v16  ;;  %879 = vmatmul.bf16.vlgmr.msrb.gmra.mxu2 %v2055_v58  ;;  %v1689_v16 = vld [vmem:[%s2640_s1 + $0xe4] sm:$0xf0]  ;;  %v1246_v19 = vor.u32 %v1688_v11, %v1245_v10  ;;  %v1530_v10 = vor.u32 %v1747_v2, %v1527_v3  ;;  %v1455_v11 = vld [vmem:[%s2640_s1 + $0x270] sm:$0xf0] }
  0x49   :  { %900 = vmatpush.bf16.msra.mxu0 %v1566_v22  ;;  %914 = vmatpush.bf16.msra.mxu1 %v1570_v23  ;;  %v1250_v22 = vor.u32 %v1680_v12, %v1247_v14  ;;  %v1254_v23 = vor.u32 %v1689_v16, %v1253_v15  ;;  %v1461_v12 = vld [vmem:[%s2640_s1 + $0x238] sm:$0xf]  ;;  %v1731_v14 = vld [vmem:[%s2640_s1 + $0x23c] sm:$0xf] }
  0x4a   :  { %928 = vmatpush.bf16.msra.mxu2 %v1574_v24  ;;  %v1664_v24 = vld [vmem:[%s2640_s1 + $0x24] sm:$0xf]  ;;  %v1463_v15 = vld [vmem:[%s2640_s1 + $0x278] sm:$0xf0] }
  0x4b   :  { %942 = vmatpush.bf16.msra.mxu3 %v1578_v28  ;;  %v1673_v28 = vld [vmem:[%s2640_s1 + $0x64] sm:$0xf0]  ;;  %v1186_v38 = vor.u32 %v1664_v24, %v1183_v25  ;;  %v1397_v24 = vld [vmem:[%s2640_s1 + $0x1b8] sm:$0xf] }
  0x4c   :  { %v1190_v39 = vor.u32 %v1673_v28, %v1189_v26  ;;  %v1723_v25 = vld [vmem:[%s2640_s1 + $0x1f4] sm:$0xf0]  ;;  %v1715_v26 = vld [vmem:[%s2640_s1 + $0x1bc] sm:$0xf] }
  0x4d   :  { %901 = vmatpush.bf16.msra.mxu0 %v1502_v34  ;;  %915 = vmatpush.bf16.msra.mxu1 %v1506_v35  ;;  %v1182_v34 = vor.u32 %v1672_v21, %v1181_v20  ;;  %v1647_v35 = vld [vmem:[%s2640_s1 + $0x3f0] sm:$0xf0]  ;;  %v1722_v20 = vld [vmem:[%s2640_s1 + $0x1ec] sm:$0xf0]  ;;  %v1398_v30 = vor.u32 %v1723_v25, %v1397_v24 }
  0x4e   :  { %929 = vmatpush.bf16.msra.mxu2 %v1510_v36  ;;  %v1653_v36 = vld [vmem:[%s2640_s1 + $0x3b8] sm:$0xf]  ;;  %v1650_v44 = vor.u32 %v1778_v33, %v1647_v35  ;;  %v1714_v21 = vld [vmem:[%s2640_s1 + $0x1b4] sm:$0xf] }
  0x4f   :  { %943 = vmatpush.bf16.msra.mxu3 %v1514_v40  ;;  %v1779_v40 = vld [vmem:[%s2640_s1 + $0x3bc] sm:$0xf]  ;;  %v1654_v45 = vor.u32 %v1787_v37, %v1653_v36  ;;  %v1698_v33 = vld [vmem:[%s2640_s1 + $0x134] sm:$0xf]  ;;  %v1333_v36 = vld [vmem:[%s2640_s1 + $0x138] sm:$0xf] }
  0x50   :  { %v1658_v49 = vor.u32 %v1779_v40, %v1655_v41  ;;  %v1327_v35 = vld [vmem:[%s2640_s1 + $0x170] sm:$0xf0]  ;;  %v1707_v37 = vld [vmem:[%s2640_s1 + $0x174] sm:$0xf0]  ;;  %v1326_v40 = vor.u32 %v1706_v32, %v1325_v31 }
  0x51   :  { %902 = vmatpush.bf16.msra.mxu0 %v1438_v46  ;;  %916 = vmatpush.bf16.msra.mxu1 %v1442_v47  ;;  %v1581_v46 = vld [vmem:[%s2640_s1 + $0x330] sm:$0xf]  ;;  %v1330_v41 = vor.u32 %v1698_v33, %v1327_v35 }
  0x52   :  { %930 = vmatpush.bf16.msra.mxu2 %v1446_v48  ;;  %v1770_v47 = vld [vmem:[%s2640_s1 + $0x36c] sm:$0xf0]  ;;  %v1762_v48 = vld [vmem:[%s2640_s1 + $0x334] sm:$0xf] }
  0x53   :  { %944 = vmatpush.bf16.msra.mxu3 %v1450_v52  ;;  %v1771_v52 = vld [vmem:[%s2640_s1 + $0x374] sm:$0xf0]  ;;  %v1582_v55 = vor.u32 %v1770_v47, %v1581_v46  ;;  %v1586_v56 = vor.u32 %v1762_v48, %v1583_v50  ;;  %v1263_v47 = vld [vmem:[%s2640_s1 + $0xf0] sm:$0xf0]  ;;  %v1683_v50 = vld [vmem:[%s2640_s1 + $0xbc] sm:$0xf] }
  0x54   :  { %v1590_v57 = vor.u32 %v1771_v52, %v1589_v51  ;;  %v1269_v48 = vld [vmem:[%s2640_s1 + $0xb8] sm:$0xf]  ;;  %v1271_v51 = vld [vmem:[%s2640_s1 + $0xf8] sm:$0xf0] }
  0x55   :  { %903 = vmatpush.bf16.msra.mxu0 %v1374_v59  ;;  %917 = vmatpush.bf16.msra.mxu1 %v1378_v60  ;;  %v1517_v59 = vld [vmem:[%s2640_s1 + $0x2b0] sm:$0xf] }
  0x56   :  { %931 = vmatpush.bf16.msra.mxu2 %v1382_v61  ;;  %v1754_v60 = vld [vmem:[%s2640_s1 + $0x2ec] sm:$0xf0]  ;;  %v1746_v61 = vld [vmem:[%s2640_s1 + $0x2b4] sm:$0xf] }
  0x57   :  { %945 = vmatpush.bf16.msra.mxu3 %v1386_v1  ;;  %v1755_v1 = vld [vmem:[%s2640_s1 + $0x2f4] sm:$0xf0]  ;;  %v1518_v4 = vor.u32 %v1754_v60, %v1517_v59  ;;  %v1522_v5 = vor.u32 %v1746_v61, %v1519_v63  ;;  %v1274_v59 = vor.u32 %v1683_v50, %v1271_v51  ;;  %v1199_v60 = vld [vmem:[%s2640_s1 + $0x70] sm:$0xf0]  ;;  %v1667_v63 = vld [vmem:[%s2640_s1 + $0x3c] sm:$0xf] }
  0x58   :  { %v1526_v6 = vor.u32 %v1755_v1, %v1525_v0  ;;  %v1205_v61 = vld [vmem:[%s2640_s1 + $0x38] sm:$0xf]  ;;  %v1207_v0 = vld [vmem:[%s2640_s1 + $0x78] sm:$0xf0] }
  0x59   :  { %904 = vmatpush.bf16.msra.mxu0 %v1310_v7  ;;  %918 = vmatpush.bf16.msra.mxu1 %v1314_v8  ;;  %v1453_v7 = vld [vmem:[%s2640_s1 + $0x230] sm:$0xf] }
  0x5a   :  { %932 = vmatpush.bf16.msra.mxu2 %v1318_v9  ;;  %v1738_v8 = vld [vmem:[%s2640_s1 + $0x26c] sm:$0xf0]  ;;  %v1730_v9 = vld [vmem:[%s2640_s1 + $0x234] sm:$0xf] }
  0x5b   :  { %946 = vmatpush.bf16.msra.mxu3 %v1322_v13  ;;  %v1739_v13 = vld [vmem:[%s2640_s1 + $0x274] sm:$0xf0]  ;;  %v1454_v16 = vor.u32 %v1738_v8, %v1453_v7  ;;  %v1458_v17 = vor.u32 %v1730_v9, %v1455_v11 }
  0x5c   :  { %v1462_v18 = vor.u32 %v1739_v13, %v1461_v12 }
  0x5d   :  { %905 = vmatpush.bf16.msra.mxu0 %v1246_v19  ;;  %919 = vmatpush.bf16.msra.mxu1 %v1250_v22  ;;  %v1389_v19 = vld [vmem:[%s2640_s1 + $0x1b0] sm:$0xf]  ;;  %v1466_v22 = vor.u32 %v1731_v14, %v1463_v15 }
  0x5e   :  { %933 = vmatpush.bf16.msra.mxu2 %v1254_v23  ;;  %v1391_v23 = vld [vmem:[%s2640_s1 + $0x1f0] sm:$0xf0]  ;;  %v1390_v28 = vor.u32 %v1722_v20, %v1389_v19 }
  0x5f   :  { %947 = vmatpush.bf16.msra.mxu3 %v1258_v27  ;;  %v1399_v27 = vld [vmem:[%s2640_s1 + $0x1f8] sm:$0xf0]  ;;  %v1394_v29 = vor.u32 %v1714_v21, %v1391_v23 }
  0x61   :  { %906 = vmatpush.bf16.msra.mxu0 %v1182_v34  ;;  %920 = vmatpush.bf16.msra.mxu1 %v1186_v38  ;;  %v1402_v34 = vor.u32 %v1715_v26, %v1399_v27  ;;  %v1699_v38 = vld [vmem:[%s2640_s1 + $0x13c] sm:$0xf] }
  0x62   :  { %934 = vmatpush.bf16.msra.mxu2 %v1190_v39  ;;  %v1335_v39 = vld [vmem:[%s2640_s1 + $0x178] sm:$0xf0] }
  0x63   :  { %948 = vmatpush.bf16.msra.mxu3 %v1194_v42  ;;  %v1334_v42 = vor.u32 %v1707_v37, %v1333_v36  ;;  %v1338_v46 = vor.u32 %v1699_v38, %v1335_v39 }
  0x64   :  { %907 = vmatmul.bf16.vlgmr.msra.gmra.mxu0 %v2055_v58  ;;  %921 = vmatmul.bf16.vlgmr.msra.gmra.mxu1 %v2055_v58 }
  0x65   :  { %955 = vmatpush.bf16.msrb.mxu0 %v1646_v43  ;;  %969 = vmatpush.bf16.msrb.mxu1 %v1650_v44  ;;  %v1261_v43 = vld [vmem:[%s2640_s1 + $0xb0] sm:$0xf] }
  0x66   :  { %983 = vmatpush.bf16.msrb.mxu2 %v1654_v45  ;;  %949 = vmatmul.bf16.vlgmr.msra.gmra.mxu3 %v2055_v58  ;;  %v1690_v44 = vld [vmem:[%s2640_s1 + $0xec] sm:$0xf0]  ;;  %v1682_v45 = vld [vmem:[%s2640_s1 + $0xb4] sm:$0xf] }
  0x67   :  { %997 = vmatpush.bf16.msrb.mxu3 %v1658_v49  ;;  %935 = vmatmul.bf16.vlgmr.msra.gmra.mxu2 %v2055_v58  ;;  %v1691_v49 = vld [vmem:[%s2640_s1 + $0xf4] sm:$0xf0]  ;;  %v1262_v52 = vor.u32 %v1690_v44, %v1261_v43  ;;  %v1266_v53 = vor.u32 %v1682_v45, %v1263_v47 }
  0x68   :  { %v1270_v54 = vor.u32 %v1691_v49, %v1269_v48 }
  0x69   :  { %956 = vmatpush.bf16.msrb.mxu0 %v1582_v55  ;;  %970 = vmatpush.bf16.msrb.mxu1 %v1586_v56  ;;  %v1197_v55 = vld [vmem:[%s2640_s1 + $0x30] sm:$0xf] }
  0x6a   :  { %984 = vmatpush.bf16.msrb.mxu2 %v1590_v57  ;;  %v1674_v56 = vld [vmem:[%s2640_s1 + $0x6c] sm:$0xf0]  ;;  %v1666_v57 = vld [vmem:[%s2640_s1 + $0x34] sm:$0xf] }
  0x6b   :  { %998 = vmatpush.bf16.msrb.mxu3 %v1594_v62  ;;  %v1675_v62 = vld [vmem:[%s2640_s1 + $0x74] sm:$0xf0]  ;;  %v1198_v1 = vor.u32 %v1674_v56, %v1197_v55  ;;  %v1202_v2 = vor.u32 %v1666_v57, %v1199_v60 }
  0x6c   :  { %v1206_v3 = vor.u32 %v1675_v62, %v1205_v61 }
  0x6d   :  { %957 = vmatpush.bf16.msrb.mxu0 %v1518_v4  ;;  %971 = vmatpush.bf16.msrb.mxu1 %v1522_v5  ;;  %v1210_v4 = vor.u32 %v1667_v63, %v1207_v0 }
  0x6e   :  { %985 = vmatpush.bf16.msrb.mxu2 %v1526_v6 }
  0x6f   :  { %999 = vmatpush.bf16.msrb.mxu3 %v1530_v10 }
  0x71   :  { %958 = vmatpush.bf16.msrb.mxu0 %v1454_v16  ;;  %972 = vmatpush.bf16.msrb.mxu1 %v1458_v17 }
  0x72   :  { %986 = vmatpush.bf16.msrb.mxu2 %v1462_v18 }
  0x73   :  { %1000 = vmatpush.bf16.msrb.mxu3 %v1466_v22 }
  0x75   :  { %959 = vmatpush.bf16.msrb.mxu0 %v1390_v28  ;;  %973 = vmatpush.bf16.msrb.mxu1 %v1394_v29 }
  0x76   :  { %987 = vmatpush.bf16.msrb.mxu2 %v1398_v30 }
  0x77   :  { %1001 = vmatpush.bf16.msrb.mxu3 %v1402_v34 }
  0x79   :  { %960 = vmatpush.bf16.msrb.mxu0 %v1326_v40  ;;  %974 = vmatpush.bf16.msrb.mxu1 %v1330_v41 }
  0x7a   :  { %988 = vmatpush.bf16.msrb.mxu2 %v1334_v42 }
  0x7b   :  { %1002 = vmatpush.bf16.msrb.mxu3 %v1338_v46 }
  0x7d   :  { %961 = vmatpush.bf16.msrb.mxu0 %v1262_v52  ;;  %975 = vmatpush.bf16.msrb.mxu1 %v1266_v53 }
  0x7e   :  { %989 = vmatpush.bf16.msrb.mxu2 %v1270_v54 }
  0x7f   :  { %1003 = vmatpush.bf16.msrb.mxu3 %v1274_v59 }
  0x81   :  { %962 = vmatpush.bf16.msrb.mxu0 %v1198_v1  ;;  %976 = vmatpush.bf16.msrb.mxu1 %v1202_v2 }
  0x82   :  { %990 = vmatpush.bf16.msrb.mxu2 %v1206_v3 }
  0x83   :  { %1004 = vmatpush.bf16.msrb.mxu3 %v1210_v4 }
  0x84   :  { %963 = vmatmul.bf16.vlgmr.msrb.gmra.mxu0 %v2055_v58  ;;  %977 = vmatmul.bf16.vlgmr.msrb.gmra.mxu1 %v2055_v58 }
  0x85   :  { %991 = vmatmul.bf16.vlgmr.msrb.gmra.mxu2 %v2055_v58 }
  0x86   :  { %1005 = vmatmul.bf16.vlgmr.msrb.gmra.mxu3 %v2055_v58 }
  0xa1   :  { %v810_v5 = vpop.f32.mrf.mxu1  ;;  %v796_v7 = vpop.f32.mrf.mxu0 }
  0xa2   :  { %vm1012_vm0 = vcmp.ge.f32.partialorder %v810_v5, 0.0  ;;  %v1044_v6 = vmul.f32 0.2, %v810_v5  ;;  %vm1011_vm1 = vcmp.ge.f32.partialorder %v796_v7, 0.0  ;;  %v1043_v8 = vmul.f32 0.2, %v796_v7 }
  0xa4   :  { %v1076_v9 = vsel %vm1012_vm0, %v810_v5, %v1044_v6  ;;  %v1075_v10 = vsel %vm1011_vm1, %v796_v7, %v1043_v8 }
  0xa5   :  { %v1107_v13 = vpack.c.bf16 %v1076_v9, %v1075_v10 }
  0xa7   :  { %1123 = vst [vmem:[%s2642_s2] sm:$0xff] %v1107_v13 }
  0xa9   :  { %v838_v12 = vpop.f32.mrf.mxu3  ;;  %v812_v16 = vpop.f32.mrf.mxu1 }
  0xaa   :  { %v824_v11 = vpop.f32.mrf.mxu2  ;;  %vm1014_vm3 = vcmp.ge.f32.partialorder %v838_v12, 0.0  ;;  %v1046_v15 = vmul.f32 0.2, %v838_v12  ;;  %vm1028_vm4 = vcmp.ge.f32.partialorder %v812_v16, 0.0  ;;  %v1060_v18 = vmul.f32 0.2, %v812_v16  ;;  %v798_v20 = vpop.f32.mrf.mxu0 }
  0xab   :  { %vm1013_vm2 = vcmp.ge.f32.partialorder %v824_v11, 0.0  ;;  %v1045_v14 = vmul.f32 0.2, %v824_v11  ;;  %vm1027_vm5 = vcmp.ge.f32.partialorder %v798_v20, 0.0  ;;  %v1059_v21 = vmul.f32 0.2, %v798_v20 }
  0xac   :  { %v1078_v17 = vsel %vm1014_vm3, %v838_v12, %v1046_v15  ;;  %v1092_v22 = vsel %vm1028_vm4, %v812_v16, %v1060_v18 }
  0xad   :  { %v1077_v58 = vsel %vm1013_vm2, %v824_v11, %v1045_v14  ;;  %v1091_v23 = vsel %vm1027_vm5, %v798_v20, %v1059_v21 }
  0xae   :  { %v1108_v19 = vpack.c.bf16 %v1078_v17, %v1077_v58  ;;  %v1115_v26 = vpack.c.bf16 %v1092_v22, %v1091_v23 }
  0xb0   :  { %1124 = vst [vmem:[%s2642_s2 + $0x8] sm:$0xff] %v1108_v19 }
  0xb1   :  { %v840_v25 = vpop.f32.mrf.mxu3  ;;  %1131 = vst [vmem:[%s2642_s2 + $0x40] sm:$0xff] %v1115_v26 }
  0xb2   :  { %v826_v24 = vpop.f32.mrf.mxu2  ;;  %vm1030_vm7 = vcmp.ge.f32.partialorder %v840_v25, 0.0  ;;  %v1062_v28 = vmul.f32 0.2, %v840_v25 }
  0xb3   :  { %vm1029_vm6 = vcmp.ge.f32.partialorder %v826_v24, 0.0  ;;  %v1061_v27 = vmul.f32 0.2, %v826_v24 }
  0xb4   :  { %v1094_v30 = vsel %vm1030_vm7, %v840_v25, %v1062_v28 }
  0xb5   :  { %v1093_v29 = vsel %vm1029_vm6, %v826_v24, %v1061_v27 }
  0xb6   :  { %v1116_v31 = vpack.c.bf16 %v1094_v30, %v1093_v29 }
  0xb8   :  { %1132 = vst [vmem:[%s2642_s2 + $0x48] sm:$0xff] %v1116_v31 }
  0xc1   :  { %v852_v32 = vpop.f32.mrf.mxu0  ;;  %v866_v34 = vpop.f32.mrf.mxu1 }
  0xc2   :  { %vm1015_vm8 = vcmp.ge.f32.partialorder %v852_v32, 0.0  ;;  %v1047_v33 = vmul.f32 0.2, %v852_v32  ;;  %vm1016_vm9 = vcmp.ge.f32.partialorder %v866_v34, 0.0  ;;  %v1048_v35 = vmul.f32 0.2, %v866_v34 }
  0xc4   :  { %v1079_v36 = vsel %vm1015_vm8, %v852_v32, %v1047_v33  ;;  %v1080_v37 = vsel %vm1016_vm9, %v866_v34, %v1048_v35 }
  0xc5   :  { %v1109_v38 = vpack.c.bf16 %v1080_v37, %v1079_v36 }
  0xc7   :  { %1125 = vst [vmem:[%s2642_s2 + $0x10] sm:$0xff] %v1109_v38 }
  0xc9   :  { %v894_v41 = vpop.f32.mrf.mxu3  ;;  %v854_v44 = vpop.f32.mrf.mxu0 }
  0xca   :  { %v880_v39 = vpop.f32.mrf.mxu2  ;;  %vm1018_vm11 = vcmp.ge.f32.partialorder %v894_v41, 0.0  ;;  %v1050_v42 = vmul.f32 0.2, %v894_v41  ;;  %vm1031_vm12 = vcmp.ge.f32.partialorder %v854_v44, 0.0  ;;  %v1063_v46 = vmul.f32 0.2, %v854_v44  ;;  %v868_v47 = vpop.f32.mrf.mxu1 }
  0xcb   :  { %vm1017_vm10 = vcmp.ge.f32.partialorder %v880_v39, 0.0  ;;  %v1049_v40 = vmul.f32 0.2, %v880_v39  ;;  %vm1032_vm13 = vcmp.ge.f32.partialorder %v868_v47, 0.0  ;;  %v1064_v49 = vmul.f32 0.2, %v868_v47 }
  0xcc   :  { %v1082_v45 = vsel %vm1018_vm11, %v894_v41, %v1050_v42  ;;  %v1095_v50 = vsel %vm1031_vm12, %v854_v44, %v1063_v46 }
  0xcd   :  { %v1081_v43 = vsel %vm1017_vm10, %v880_v39, %v1049_v40  ;;  %v1096_v51 = vsel %vm1032_vm13, %v868_v47, %v1064_v49 }
  0xce   :  { %v1110_v48 = vpack.c.bf16 %v1082_v45, %v1081_v43  ;;  %v1117_v52 = vpack.c.bf16 %v1096_v51, %v1095_v50 }
  0xd0   :  { %1126 = vst [vmem:[%s2642_s2 + $0x18] sm:$0xff] %v1110_v48 }
  0xd1   :  { %v896_v55 = vpop.f32.mrf.mxu3  ;;  %1133 = vst [vmem:[%s2642_s2 + $0x50] sm:$0xff] %v1117_v52 }
  0xd2   :  { %v882_v53 = vpop.f32.mrf.mxu2  ;;  %vm1034_vm15 = vcmp.ge.f32.partialorder %v896_v55, 0.0  ;;  %v1066_v56 = vmul.f32 0.2, %v896_v55 }
  0xd3   :  { %vm1033_vm14 = vcmp.ge.f32.partialorder %v882_v53, 0.0  ;;  %v1065_v54 = vmul.f32 0.2, %v882_v53 }
  0xd4   :  { %v1098_v59 = vsel %vm1034_vm15, %v896_v55, %v1066_v56 }
  0xd5   :  { %v1097_v57 = vsel %vm1033_vm14, %v882_v53, %v1065_v54 }
  0xd6   :  { %v1118_v60 = vpack.c.bf16 %v1098_v59, %v1097_v57 }
  0xd8   :  { %1134 = vst [vmem:[%s2642_s2 + $0x58] sm:$0xff] %v1118_v60 }
  0xe1   :  { %v908_v61 = vpop.f32.mrf.mxu0  ;;  %v922_v63 = vpop.f32.mrf.mxu1 }
  0xe2   :  { %vm1019_vm0 = vcmp.ge.f32.partialorder %v908_v61, 0.0  ;;  %v1051_v62 = vmul.f32 0.2, %v908_v61  ;;  %vm1020_vm1 = vcmp.ge.f32.partialorder %v922_v63, 0.0  ;;  %v1052_v0 = vmul.f32 0.2, %v922_v63 }
  0xe4   :  { %v1083_v1 = vsel %vm1019_vm0, %v908_v61, %v1051_v62  ;;  %v1084_v2 = vsel %vm1020_vm1, %v922_v63, %v1052_v0 }
  0xe5   :  { %v1111_v3 = vpack.c.bf16 %v1084_v2, %v1083_v1 }
  0xe7   :  { %1127 = vst [vmem:[%s2642_s2 + $0x20] sm:$0xff] %v1111_v3 }
  0xe9   :  { %v950_v6 = vpop.f32.mrf.mxu3  ;;  %v910_v9 = vpop.f32.mrf.mxu0 }
  0xea   :  { %v936_v4 = vpop.f32.mrf.mxu2  ;;  %vm1022_vm3 = vcmp.ge.f32.partialorder %v950_v6, 0.0  ;;  %v1054_v7 = vmul.f32 0.2, %v950_v6  ;;  %vm1035_vm4 = vcmp.ge.f32.partialorder %v910_v9, 0.0  ;;  %v1067_v11 = vmul.f32 0.2, %v910_v9  ;;  %v924_v12 = vpop.f32.mrf.mxu1 }
  0xeb   :  { %vm1021_vm2 = vcmp.ge.f32.partialorder %v936_v4, 0.0  ;;  %v1053_v5 = vmul.f32 0.2, %v936_v4  ;;  %vm1036_vm5 = vcmp.ge.f32.partialorder %v924_v12, 0.0  ;;  %v1068_v14 = vmul.f32 0.2, %v924_v12 }
  0xec   :  { %v1086_v10 = vsel %vm1022_vm3, %v950_v6, %v1054_v7  ;;  %v1099_v15 = vsel %vm1035_vm4, %v910_v9, %v1067_v11 }
  0xed   :  { %v1085_v8 = vsel %vm1021_vm2, %v936_v4, %v1053_v5  ;;  %v1100_v58 = vsel %vm1036_vm5, %v924_v12, %v1068_v14 }
  0xee   :  { %v1112_v13 = vpack.c.bf16 %v1086_v10, %v1085_v8  ;;  %v1119_v16 = vpack.c.bf16 %v1100_v58, %v1099_v15 }
  0xf0   :  { %1128 = vst [vmem:[%s2642_s2 + $0x28] sm:$0xff] %v1112_v13 }
  0xf1   :  { %v952_v19 = vpop.f32.mrf.mxu3  ;;  %1135 = vst [vmem:[%s2642_s2 + $0x60] sm:$0xff] %v1119_v16 }
  0xf2   :  { %v938_v17 = vpop.f32.mrf.mxu2  ;;  %vm1038_vm7 = vcmp.ge.f32.partialorder %v952_v19, 0.0  ;;  %v1070_v20 = vmul.f32 0.2, %v952_v19 }
  0xf3   :  { %vm1037_vm6 = vcmp.ge.f32.partialorder %v938_v17, 0.0  ;;  %v1069_v18 = vmul.f32 0.2, %v938_v17 }
  0xf4   :  { %v1102_v22 = vsel %vm1038_vm7, %v952_v19, %v1070_v20 }
  0xf5   :  { %v1101_v21 = vsel %vm1037_vm6, %v938_v17, %v1069_v18 }
  0xf6   :  { %v1120_v23 = vpack.c.bf16 %v1102_v22, %v1101_v21 }
  0xf8   :  { %1136 = vst [vmem:[%s2642_s2 + $0x68] sm:$0xff] %v1120_v23 }
 0x101   :  { %v964_v24 = vpop.f32.mrf.mxu0  ;;  %v978_v26 = vpop.f32.mrf.mxu1 }
 0x102   :  { %vm1023_vm8 = vcmp.ge.f32.partialorder %v964_v24, 0.0  ;;  %v1055_v25 = vmul.f32 0.2, %v964_v24  ;;  %vm1024_vm9 = vcmp.ge.f32.partialorder %v978_v26, 0.0  ;;  %v1056_v27 = vmul.f32 0.2, %v978_v26 }
 0x104   :  { %v1087_v28 = vsel %vm1023_vm8, %v964_v24, %v1055_v25  ;;  %v1088_v29 = vsel %vm1024_vm9, %v978_v26, %v1056_v27 }
 0x105   :  { %v1113_v30 = vpack.c.bf16 %v1088_v29, %v1087_v28 }
 0x107   :  { %1129 = vst [vmem:[%s2642_s2 + $0x30] sm:$0xff] %v1113_v30 }
 0x108   :  { %v992_v31 = vpop.f32.mrf.mxu2 }
 0x109   :  { %vm1025_vm10 = vcmp.ge.f32.partialorder %v992_v31, 0.0  ;;  %v1057_v32 = vmul.f32 0.2, %v992_v31  ;;  %v1006_v33 = vpop.f32.mrf.mxu3  ;;  %v966_v34 = vpop.f32.mrf.mxu0 }
 0x10a   :  { %vm1026_vm11 = vcmp.ge.f32.partialorder %v1006_v33, 0.0  ;;  %v1058_v35 = vmul.f32 0.2, %v1006_v33  ;;  %vm1039_vm12 = vcmp.ge.f32.partialorder %v966_v34, 0.0  ;;  %v1071_v36 = vmul.f32 0.2, %v966_v34  ;;  %v980_v37 = vpop.f32.mrf.mxu1 }
 0x10b   :  { %v1089_v38 = vsel %vm1025_vm10, %v992_v31, %v1057_v32  ;;  %vm1040_vm13 = vcmp.ge.f32.partialorder %v980_v37, 0.0  ;;  %v1072_v39 = vmul.f32 0.2, %v980_v37 }
 0x10c   :  { %v1090_v40 = vsel %vm1026_vm11, %v1006_v33, %v1058_v35  ;;  %v1103_v41 = vsel %vm1039_vm12, %v966_v34, %v1071_v36 }
 0x10d   :  { %v1114_v42 = vpack.c.bf16 %v1090_v40, %v1089_v38  ;;  %v1104_v43 = vsel %vm1040_vm13, %v980_v37, %v1072_v39 }
 0x10e   :  { %v1121_v44 = vpack.c.bf16 %v1104_v43, %v1103_v41 }
 0x10f   :  { %1130 = vst [vmem:[%s2642_s2 + $0x38] sm:$0xff] %v1114_v42 }
 0x110   :  { %1137 = vst [vmem:[%s2642_s2 + $0x70] sm:$0xff] %v1121_v44  ;;  %v994_v45 = vpop.f32.mrf.mxu2 }
 0x111   :  { %vm1041_vm14 = vcmp.ge.f32.partialorder %v994_v45, 0.0  ;;  %v1073_v46 = vmul.f32 0.2, %v994_v45  ;;  %v1008_v47 = vpop.f32.mrf.mxu3 }
 0x112   :  { %vm1042_vm15 = vcmp.ge.f32.partialorder %v1008_v47, 0.0  ;;  %v1074_v48 = vmul.f32 0.2, %v1008_v47 }
 0x113   :  { %v1105_v49 = vsel %vm1041_vm14, %v994_v45, %v1073_v46 }
 0x114   :  { %v1106_v50 = vsel %vm1042_vm15, %v1008_v47, %v1074_v48 }
 0x115   :  { %v1122_v51 = vpack.c.bf16 %v1106_v50, %v1105_v49 }
 0x117   :  { %1138 = vst [vmem:[%s2642_s2 + $0x78] sm:$0xff] %v1122_v51 }

// kernel: layered_forward.6
= control target key start
LH: loop header
LB: loop body
LE: loop exit
PB: predicated region body
PF: predicated region fallthrough
CT: control target
= control target key end

     0   :  { %s1716_s1 = inlined_call_operand.vmem [shape: bf16[256,512], index: 1, kind: input, shape index: {}]   ;;  %s1717_s0 = inlined_call_operand.vmem [shape: bf16[32,256], index: 0, kind: input, shape index: {}]   ;;  %s1718_s2 = inlined_call_operand.vmem [shape: bf16[32,512], index: 2, kind: output, shape index: {}]  }
   0x1   :  { %v920_v0 = vld [vmem:[%s1716_s1 + $0xe0] sm:$0xf]  ;;  %v1096_v1 = vld [vmem:[%s1716_s1 + $0xec] sm:$0xf0]  ;;  %v1094_v5 = vld [vmem:[%s1716_s1 + $0xe4] sm:$0xf] }
   0x2   :  { %v1048_v2 = vld [vmem:[%s1716_s1 + $0x1e0] sm:$0xf]  ;;  %v921_v3 = vor.u32 %v1096_v1, %v920_v0  ;;  %v1128_v4 = vld [vmem:[%s1716_s1 + $0x1ec] sm:$0xf0]  ;;  %v922_v6 = vld [vmem:[%s1716_s1 + $0xf0] sm:$0xf0] }
   0x3   :  { %v1049_v7 = vor.u32 %v1128_v4, %v1048_v2  ;;  %v925_v8 = vor.u32 %v1094_v5, %v922_v6  ;;  %v1126_v9 = vld [vmem:[%s1716_s1 + $0x1e4] sm:$0xf]  ;;  %v1050_v10 = vld [vmem:[%s1716_s1 + $0x1f0] sm:$0xf0]  ;;  %v904_v11 = vld [vmem:[%s1716_s1 + $0xc0] sm:$0xf] }
   0x4   :  { %419 = vmatpush.bf16.msra.mxu0 %v921_v3  ;;  %v1053_v12 = vor.u32 %v1126_v9, %v1050_v10  ;;  %v1092_v13 = vld [vmem:[%s1716_s1 + $0xcc] sm:$0xf0]  ;;  %v1032_v14 = vld [vmem:[%s1716_s1 + $0x1c0] sm:$0xf]  ;;  %v1090_v18 = vld [vmem:[%s1716_s1 + $0xc4] sm:$0xf] }
   0x5   :  { %v1124_v15 = vld [vmem:[%s1716_s1 + $0x1cc] sm:$0xf0]  ;;  %438 = vmatpush.bf16.msra.mxu1 %v1049_v7  ;;  %457 = vmatpush.bf16.msra.mxu2 %v925_v8  ;;  %v905_v16 = vor.u32 %v1092_v13, %v904_v11  ;;  %v906_v19 = vld [vmem:[%s1716_s1 + $0xd0] sm:$0xf0]  ;;  %v1122_v20 = vld [vmem:[%s1716_s1 + $0x1c4] sm:$0xf] }
   0x6   :  { %v1033_v17 = vor.u32 %v1124_v15, %v1032_v14  ;;  %476 = vmatpush.bf16.msra.mxu3 %v1053_v12  ;;  %v909_v21 = vor.u32 %v1090_v18, %v906_v19  ;;  %v1034_v22 = vld [vmem:[%s1716_s1 + $0x1d0] sm:$0xf0]  ;;  %v888_v23 = vld [vmem:[%s1716_s1 + $0xa0] sm:$0xf]  ;;  %v1088_v24 = vld [vmem:[%s1716_s1 + $0xac] sm:$0xf0] }
   0x7   :  { %v1037_v25 = vor.u32 %v1122_v20, %v1034_v22  ;;  %v1016_v26 = vld [vmem:[%s1716_s1 + $0x1a0] sm:$0xf]  ;;  %v1120_v27 = vld [vmem:[%s1716_s1 + $0x1ac] sm:$0xf0]  ;;  %v1086_v28 = vld [vmem:[%s1716_s1 + $0xa4] sm:$0xf]  ;;  %v889_v29 = vor.u32 %v1088_v24, %v888_v23 }
   0x8   :  { %420 = vmatpush.bf16.msra.mxu0 %v905_v16  ;;  %v890_v30 = vld [vmem:[%s1716_s1 + $0xb0] sm:$0xf0]  ;;  %v1118_v31 = vld [vmem:[%s1716_s1 + $0x1a4] sm:$0xf]  ;;  %v1017_v33 = vor.u32 %v1120_v27, %v1016_v26  ;;  %v872_v35 = vld [vmem:[%s1716_s1 + $0x80] sm:$0xf] }
   0x9   :  { %v1018_v32 = vld [vmem:[%s1716_s1 + $0x1b0] sm:$0xf0]  ;;  %439 = vmatpush.bf16.msra.mxu1 %v1033_v17  ;;  %458 = vmatpush.bf16.msra.mxu2 %v909_v21  ;;  %v893_v34 = vor.u32 %v1086_v28, %v890_v30  ;;  %v1084_v36 = vld [vmem:[%s1716_s1 + $0x8c] sm:$0xf0]  ;;  %v1000_v37 = vld [vmem:[%s1716_s1 + $0x180] sm:$0xf] }
   0xa   :  { %477 = vmatpush.bf16.msra.mxu3 %v1037_v25  ;;  %v1021_v38 = vor.u32 %v1118_v31, %v1018_v32  ;;  %v1116_v39 = vld [vmem:[%s1716_s1 + $0x18c] sm:$0xf0]  ;;  %v1082_v40 = vld [vmem:[%s1716_s1 + $0x84] sm:$0xf]  ;;  %v874_v41 = vld [vmem:[%s1716_s1 + $0x90] sm:$0xf0]  ;;  %v873_v44 = vor.u32 %v1084_v36, %v872_v35 }
   0xb   :  { %v1114_v42 = vld [vmem:[%s1716_s1 + $0x184] sm:$0xf]  ;;  %v1002_v43 = vld [vmem:[%s1716_s1 + $0x190] sm:$0xf0]  ;;  %v1001_v45 = vor.u32 %v1116_v39, %v1000_v37  ;;  %v877_v46 = vor.u32 %v1082_v40, %v874_v41  ;;  %v856_v47 = vld [vmem:[%s1716_s1 + $0x60] sm:$0xf] }
   0xc   :  { %421 = vmatpush.bf16.msra.mxu0 %v889_v29  ;;  %v1080_v48 = vld [vmem:[%s1716_s1 + $0x6c] sm:$0xf0]  ;;  %v984_v49 = vld [vmem:[%s1716_s1 + $0x160] sm:$0xf]  ;;  %v1005_v50 = vor.u32 %v1114_v42, %v1002_v43  ;;  %v1078_v52 = vld [vmem:[%s1716_s1 + $0x64] sm:$0xf] }
   0xd   :  { %440 = vmatpush.bf16.msra.mxu1 %v1017_v33  ;;  %459 = vmatpush.bf16.msra.mxu2 %v893_v34  ;;  %v1112_v51 = vld [vmem:[%s1716_s1 + $0x16c] sm:$0xf0]  ;;  %v858_v53 = vld [vmem:[%s1716_s1 + $0x70] sm:$0xf0]  ;;  %v1110_v54 = vld [vmem:[%s1716_s1 + $0x164] sm:$0xf]  ;;  %v857_v56 = vor.u32 %v1080_v48, %v856_v47 }
   0xe   :  { %478 = vmatpush.bf16.msra.mxu3 %v1021_v38  ;;  %v986_v55 = vld [vmem:[%s1716_s1 + $0x170] sm:$0xf0]  ;;  %v985_v57 = vor.u32 %v1112_v51, %v984_v49  ;;  %v861_v58 = vor.u32 %v1078_v52, %v858_v53  ;;  %v840_v59 = vld [vmem:[%s1716_s1 + $0x40] sm:$0xf]  ;;  %v1076_v60 = vld [vmem:[%s1716_s1 + $0x4c] sm:$0xf0] }
   0xf   :  { %v968_v61 = vld [vmem:[%s1716_s1 + $0x140] sm:$0xf]  ;;  %v989_v62 = vor.u32 %v1110_v54, %v986_v55  ;;  %v1108_v63 = vld [vmem:[%s1716_s1 + $0x14c] sm:$0xf0]  ;;  %v1074_v0 = vld [vmem:[%s1716_s1 + $0x44] sm:$0xf]  ;;  %v841_v4 = vor.u32 %v1076_v60, %v840_v59 }
  0x10   :  { %422 = vmatpush.bf16.msra.mxu0 %v873_v44  ;;  %v842_v1 = vld [vmem:[%s1716_s1 + $0x50] sm:$0xf0]  ;;  %v1106_v2 = vld [vmem:[%s1716_s1 + $0x144] sm:$0xf]  ;;  %v969_v5 = vor.u32 %v1108_v63, %v968_v61  ;;  %v824_v7 = vld [vmem:[%s1716_s1 + $0x20] sm:$0xf] }
  0x11   :  { %441 = vmatpush.bf16.msra.mxu1 %v1001_v45  ;;  %460 = vmatpush.bf16.msra.mxu2 %v877_v46  ;;  %v970_v3 = vld [vmem:[%s1716_s1 + $0x150] sm:$0xf0]  ;;  %v845_v6 = vor.u32 %v1074_v0, %v842_v1  ;;  %v1072_v8 = vld [vmem:[%s1716_s1 + $0x2c] sm:$0xf0]  ;;  %v952_v9 = vld [vmem:[%s1716_s1 + $0x120] sm:$0xf] }
  0x12   :  { %479 = vmatpush.bf16.msra.mxu3 %v1005_v50  ;;  %v973_v10 = vor.u32 %v1106_v2, %v970_v3  ;;  %v1104_v11 = vld [vmem:[%s1716_s1 + $0x12c] sm:$0xf0]  ;;  %v1070_v12 = vld [vmem:[%s1716_s1 + $0x24] sm:$0xf]  ;;  %v826_v13 = vld [vmem:[%s1716_s1 + $0x30] sm:$0xf0]  ;;  %v825_v16 = vor.u32 %v1072_v8, %v824_v7 }
  0x13   :  { %v1102_v14 = vld [vmem:[%s1716_s1 + $0x124] sm:$0xf]  ;;  %v954_v15 = vld [vmem:[%s1716_s1 + $0x130] sm:$0xf0]  ;;  %v808_v17 = vld [vmem:[%s1716_s1] sm:$0xf]  ;;  %v953_v19 = vor.u32 %v1104_v11, %v952_v9  ;;  %v829_v20 = vor.u32 %v1070_v12, %v826_v13 }
  0x14   :  { %423 = vmatpush.bf16.msra.mxu0 %v857_v56  ;;  %v1068_v18 = vld [vmem:[%s1716_s1 + $0xc] sm:$0xf0]  ;;  %v936_v21 = vld [vmem:[%s1716_s1 + $0x100] sm:$0xf]  ;;  %v1066_v23 = vld [vmem:[%s1716_s1 + $0x4] sm:$0xf]  ;;  %v957_v24 = vor.u32 %v1102_v14, %v954_v15 }
  0x15   :  { %442 = vmatpush.bf16.msra.mxu1 %v985_v57  ;;  %461 = vmatpush.bf16.msra.mxu2 %v861_v58  ;;  %v1100_v22 = vld [vmem:[%s1716_s1 + $0x10c] sm:$0xf0]  ;;  %v810_v25 = vld [vmem:[%s1716_s1 + $0x10] sm:$0xf0]  ;;  %v1098_v26 = vld [vmem:[%s1716_s1 + $0x104] sm:$0xf]  ;;  %v809_v31 = vor.u32 %v1068_v18, %v808_v17 }
  0x16   :  { %480 = vmatpush.bf16.msra.mxu3 %v989_v62  ;;  %v938_v27 = vld [vmem:[%s1716_s1 + $0x110] sm:$0xf0]  ;;  %v792_v28 = vld [vmem:[%s1717_s0] sm:$0xf]  ;;  %v1095_v29 = vld [vmem:[%s1716_s1 + $0xec] sm:$0xf]  ;;  %v937_v35 = vor.u32 %v1100_v22, %v936_v21  ;;  %v813_v36 = vor.u32 %v1066_v23, %v810_v25 }
  0x17   :  { %v930_v30 = vld [vmem:[%s1716_s1 + $0xf8] sm:$0xf0]  ;;  %v1063_v32 = vld [vmem:[%s1717_s0 + $0x4] sm:$0xf0]  ;;  %v1127_v33 = vld [vmem:[%s1716_s1 + $0x1ec] sm:$0xf]  ;;  %v941_v39 = vor.u32 %v1098_v26, %v938_v27 }
  0x18   :  { %424 = vmatpush.bf16.msra.mxu0 %v841_v4  ;;  %v1058_v34 = vld [vmem:[%s1716_s1 + $0x1f8] sm:$0xf0]  ;;  %v1062_v37 = vld [vmem:[%s1717_s0 + $0x4] sm:$0xf]  ;;  %v794_v38 = vld [vmem:[%s1717_s0 + $0x8] sm:$0xf0]  ;;  %v933_v40 = vor.u32 %v1095_v29, %v930_v30  ;;  %v1382_v44 = vor.u32 %v1063_v32, %v792_v28 }
  0x19   :  { %443 = vmatpush.bf16.msra.mxu1 %v969_v5  ;;  %462 = vmatpush.bf16.msra.mxu2 %v845_v6  ;;  %v928_v41 = vld [vmem:[%s1716_s1 + $0xe8] sm:$0xf]  ;;  %v1097_v42 = vld [vmem:[%s1716_s1 + $0xf4] sm:$0xf0]  ;;  %v1061_v45 = vor.u32 %v1127_v33, %v1058_v34  ;;  %v1091_v47 = vld [vmem:[%s1716_s1 + $0xcc] sm:$0xf]  ;;  %v1393_v49 = vor.u32 %v1062_v37, %v794_v38 }
  0x1a   :  { %481 = vmatpush.bf16.msra.mxu3 %v973_v10  ;;  %v1056_v43 = vld [vmem:[%s1716_s1 + $0x1e8] sm:$0xf]  ;;  %v1129_v46 = vld [vmem:[%s1716_s1 + $0x1f4] sm:$0xf0]  ;;  %v914_v48 = vld [vmem:[%s1716_s1 + $0xd8] sm:$0xf0]  ;;  %v929_v52 = vor.u32 %v1097_v42, %v928_v41 }
  0x1b   :  { %v1123_v50 = vld [vmem:[%s1716_s1 + $0x1cc] sm:$0xf]  ;;  %v1042_v51 = vld [vmem:[%s1716_s1 + $0x1d8] sm:$0xf0]  ;;  %v1057_v53 = vor.u32 %v1129_v46, %v1056_v43  ;;  %v917_v54 = vor.u32 %v1091_v47, %v914_v48  ;;  %v912_v55 = vld [vmem:[%s1716_s1 + $0xc8] sm:$0xf] }
  0x1c   :  { %425 = vmatpush.bf16.msra.mxu0 %v825_v16  ;;  %v1093_v56 = vld [vmem:[%s1716_s1 + $0xd4] sm:$0xf0]  ;;  %v1040_v57 = vld [vmem:[%s1716_s1 + $0x1c8] sm:$0xf]  ;;  %v1045_v58 = vor.u32 %v1123_v50, %v1042_v51  ;;  %v1087_v60 = vld [vmem:[%s1716_s1 + $0xac] sm:$0xf] }
  0x1d   :  { %444 = vmatpush.bf16.msra.mxu1 %v953_v19  ;;  %463 = vmatpush.bf16.msra.mxu2 %v829_v20  ;;  %v1125_v59 = vld [vmem:[%s1716_s1 + $0x1d4] sm:$0xf0]  ;;  %v898_v61 = vld [vmem:[%s1716_s1 + $0xb8] sm:$0xf0]  ;;  %v1119_v62 = vld [vmem:[%s1716_s1 + $0x1ac] sm:$0xf]  ;;  %v913_v0 = vor.u32 %v1093_v56, %v912_v55 }
  0x1e   :  { %482 = vmatpush.bf16.msra.mxu3 %v957_v24  ;;  %v1026_v63 = vld [vmem:[%s1716_s1 + $0x1b8] sm:$0xf0]  ;;  %v1041_v1 = vor.u32 %v1125_v59, %v1040_v57  ;;  %v901_v2 = vor.u32 %v1087_v60, %v898_v61  ;;  %v896_v3 = vld [vmem:[%s1716_s1 + $0xa8] sm:$0xf]  ;;  %v1089_v4 = vld [vmem:[%s1716_s1 + $0xb4] sm:$0xf0] }
  0x1f   :  { %v1024_v5 = vld [vmem:[%s1716_s1 + $0x1a8] sm:$0xf]  ;;  %v1029_v6 = vor.u32 %v1119_v62, %v1026_v63  ;;  %v1121_v7 = vld [vmem:[%s1716_s1 + $0x1b4] sm:$0xf0]  ;;  %v1083_v8 = vld [vmem:[%s1716_s1 + $0x8c] sm:$0xf]  ;;  %v897_v12 = vor.u32 %v1089_v4, %v896_v3 }
  0x20   :  { %426 = vmatpush.bf16.msra.mxu0 %v809_v31  ;;  %v882_v9 = vld [vmem:[%s1716_s1 + $0x98] sm:$0xf0]  ;;  %v1115_v10 = vld [vmem:[%s1716_s1 + $0x18c] sm:$0xf]  ;;  %v880_v13 = vld [vmem:[%s1716_s1 + $0x88] sm:$0xf]  ;;  %v1025_v14 = vor.u32 %v1121_v7, %v1024_v5 }
  0x21   :  { %445 = vmatpush.bf16.msra.mxu1 %v937_v35  ;;  %464 = vmatpush.bf16.msra.mxu2 %v813_v36  ;;  %v1010_v11 = vld [vmem:[%s1716_s1 + $0x198] sm:$0xf0]  ;;  %v885_v15 = vor.u32 %v1083_v8, %v882_v9  ;;  %v1085_v16 = vld [vmem:[%s1716_s1 + $0x94] sm:$0xf0]  ;;  %v1008_v17 = vld [vmem:[%s1716_s1 + $0x188] sm:$0xf] }
  0x22   :  { %483 = vmatpush.bf16.msra.mxu3 %v941_v39  ;;  %v1117_v18 = vld [vmem:[%s1716_s1 + $0x194] sm:$0xf0]  ;;  %v1013_v19 = vor.u32 %v1115_v10, %v1010_v11  ;;  %v800_v20 = vld [vmem:[%s1717_s0 + $0x10] sm:$0xf]  ;;  %v1079_v21 = vld [vmem:[%s1716_s1 + $0x6c] sm:$0xf]  ;;  %v881_v26 = vor.u32 %v1085_v16, %v880_v13 }
  0x23   :  { %427 = vmatmul.bf16.vlgmr.msra.gmra.mxu0 %v1382_v44  ;;  %v866_v22 = vld [vmem:[%s1716_s1 + $0x78] sm:$0xf0]  ;;  %v1065_v23 = vld [vmem:[%s1717_s0 + $0x14] sm:$0xf0]  ;;  %v1111_v24 = vld [vmem:[%s1716_s1 + $0x16c] sm:$0xf]  ;;  %v1009_v29 = vor.u32 %v1117_v18, %v1008_v17 }
  0x24   :  { %446 = vmatmul.bf16.vlgmr.msra.gmra.mxu1 %v1393_v49  ;;  %465 = vmatmul.bf16.vlgmr.msra.gmra.mxu2 %v1382_v44  ;;  %v994_v25 = vld [vmem:[%s1716_s1 + $0x178] sm:$0xf0]  ;;  %v1064_v27 = vld [vmem:[%s1717_s0 + $0x14] sm:$0xf]  ;;  %v869_v30 = vor.u32 %v1079_v21, %v866_v22  ;;  %v864_v31 = vld [vmem:[%s1716_s1 + $0x68] sm:$0xf]  ;;  %v1498_v34 = vor.u32 %v1065_v23, %v800_v20 }
  0x25   :  { %533 = vmatpush.bf16.msrb.mxu2 %v933_v40  ;;  %484 = vmatmul.bf16.vlgmr.msra.gmra.mxu3 %v1393_v49  ;;  %v802_v28 = vld [vmem:[%s1717_s0 + $0x18] sm:$0xf0]  ;;  %v1081_v32 = vld [vmem:[%s1716_s1 + $0x74] sm:$0xf0]  ;;  %v992_v33 = vld [vmem:[%s1716_s1 + $0x168] sm:$0xf]  ;;  %v997_v35 = vor.u32 %v1111_v24, %v994_v25 }
  0x26   :  { %552 = vmatpush.bf16.msrb.mxu3 %v1061_v45  ;;  %495 = vmatpush.bf16.msrb.mxu0 %v929_v52  ;;  %v1113_v36 = vld [vmem:[%s1716_s1 + $0x174] sm:$0xf0]  ;;  %v1075_v37 = vld [vmem:[%s1716_s1 + $0x4c] sm:$0xf]  ;;  %v850_v38 = vld [vmem:[%s1716_s1 + $0x58] sm:$0xf0]  ;;  %v1509_v39 = vor.u32 %v1064_v27, %v802_v28  ;;  %v865_v42 = vor.u32 %v1081_v32, %v864_v31 }
  0x27   :  { %514 = vmatpush.bf16.msrb.mxu1 %v1057_v53  ;;  %v1107_v40 = vld [vmem:[%s1716_s1 + $0x14c] sm:$0xf]  ;;  %v978_v41 = vld [vmem:[%s1716_s1 + $0x158] sm:$0xf0]  ;;  %v993_v43 = vor.u32 %v1113_v36, %v992_v33  ;;  %v853_v45 = vor.u32 %v1075_v37, %v850_v38  ;;  %v848_v46 = vld [vmem:[%s1716_s1 + $0x48] sm:$0xf] }
  0x28   :  { %v1077_v47 = vld [vmem:[%s1716_s1 + $0x54] sm:$0xf0]  ;;  %v976_v48 = vld [vmem:[%s1716_s1 + $0x148] sm:$0xf]  ;;  %v981_v50 = vor.u32 %v1107_v40, %v978_v41  ;;  %v1071_v52 = vld [vmem:[%s1716_s1 + $0x2c] sm:$0xf] }
  0x29   :  { %534 = vmatpush.bf16.msrb.mxu2 %v917_v54  ;;  %v1109_v51 = vld [vmem:[%s1716_s1 + $0x154] sm:$0xf0]  ;;  %v834_v53 = vld [vmem:[%s1716_s1 + $0x38] sm:$0xf0]  ;;  %v1103_v54 = vld [vmem:[%s1716_s1 + $0x12c] sm:$0xf]  ;;  %v849_v56 = vor.u32 %v1077_v47, %v848_v46 }
  0x2a   :  { %553 = vmatpush.bf16.msrb.mxu3 %v1045_v58  ;;  %496 = vmatpush.bf16.msrb.mxu0 %v913_v0  ;;  %v962_v55 = vld [vmem:[%s1716_s1 + $0x138] sm:$0xf0]  ;;  %v977_v57 = vor.u32 %v1109_v51, %v976_v48  ;;  %v837_v58 = vor.u32 %v1071_v52, %v834_v53  ;;  %v832_v59 = vld [vmem:[%s1716_s1 + $0x28] sm:$0xf]  ;;  %v1073_v60 = vld [vmem:[%s1716_s1 + $0x34] sm:$0xf0] }
  0x2b   :  { %515 = vmatpush.bf16.msrb.mxu1 %v1041_v1  ;;  %v960_v61 = vld [vmem:[%s1716_s1 + $0x128] sm:$0xf]  ;;  %v965_v62 = vor.u32 %v1103_v54, %v962_v55  ;;  %v1105_v63 = vld [vmem:[%s1716_s1 + $0x134] sm:$0xf0]  ;;  %v1067_v0 = vld [vmem:[%s1716_s1 + $0xc] sm:$0xf]  ;;  %v833_v4 = vor.u32 %v1073_v60, %v832_v59 }
  0x2c   :  { %v818_v1 = vld [vmem:[%s1716_s1 + $0x18] sm:$0xf0]  ;;  %v961_v5 = vor.u32 %v1105_v63, %v960_v61  ;;  %v816_v7 = vld [vmem:[%s1716_s1 + $0x8] sm:$0xf]  ;;  %v1069_v8 = vld [vmem:[%s1716_s1 + $0x14] sm:$0xf0] }
  0x2d   :  { %535 = vmatpush.bf16.msrb.mxu2 %v901_v2  ;;  %v1099_v2 = vld [vmem:[%s1716_s1 + $0x10c] sm:$0xf]  ;;  %v946_v3 = vld [vmem:[%s1716_s1 + $0x118] sm:$0xf0]  ;;  %v944_v10 = vld [vmem:[%s1716_s1 + $0x108] sm:$0xf] }
  0x2e   :  { %554 = vmatpush.bf16.msrb.mxu3 %v1029_v6  ;;  %497 = vmatpush.bf16.msrb.mxu0 %v897_v12  ;;  %v821_v6 = vor.u32 %v1067_v0, %v818_v1  ;;  %v949_v9 = vor.u32 %v1099_v2, %v946_v3  ;;  %v1101_v11 = vld [vmem:[%s1716_s1 + $0x114] sm:$0xf0]  ;;  %v817_v12 = vor.u32 %v1069_v8, %v816_v7 }
  0x2f   :  { %516 = vmatpush.bf16.msrb.mxu1 %v1025_v14  ;;  %v945_v13 = vor.u32 %v1101_v11, %v944_v10  ;;  %v1141_v10 = vmov 512.0  }
  0x30   :  { %1131 = vrcp.f32 %v1141_v10 }
  0x31   :  { %536 = vmatpush.bf16.msrb.mxu2 %v885_v15 }
  0x32   :  { %555 = vmatpush.bf16.msrb.mxu3 %v1013_v19  ;;  %498 = vmatpush.bf16.msrb.mxu0 %v881_v26 }
  0x33   :  { %517 = vmatpush.bf16.msrb.mxu1 %v1009_v29  ;;  %432 = vmatmul.bf16.gmra.mxu0 %v1498_v34 }
  0x34   :  { %451 = vmatmul.bf16.gmra.mxu1 %v1509_v39  ;;  %470 = vmatmul.bf16.gmra.mxu2 %v1498_v34 }
  0x35   :  { %537 = vmatpush.bf16.msrb.mxu2 %v869_v30  ;;  %489 = vmatmul.bf16.gmra.mxu3 %v1509_v39 }
  0x36   :  { %556 = vmatpush.bf16.msrb.mxu3 %v997_v35  ;;  %499 = vmatpush.bf16.msrb.mxu0 %v865_v42  ;;  %v1132_v11 = vpop.eup %1131 }
  0x37   :  { %518 = vmatpush.bf16.msrb.mxu1 %v993_v43  ;;  %vm596_vm0 = vweird.f32 %v1132_v11 }
  0x39   :  { %538 = vmatpush.bf16.msrb.mxu2 %v853_v45 }
  0x3a   :  { %557 = vmatpush.bf16.msrb.mxu3 %v981_v50  ;;  %500 = vmatpush.bf16.msrb.mxu0 %v849_v56 }
  0x3b   :  { %519 = vmatpush.bf16.msrb.mxu1 %v977_v57 }
  0x3d   :  { %539 = vmatpush.bf16.msrb.mxu2 %v837_v58 }
  0x3e   :  { %558 = vmatpush.bf16.msrb.mxu3 %v965_v62  ;;  %501 = vmatpush.bf16.msrb.mxu0 %v833_v4 }
  0x3f   :  { %520 = vmatpush.bf16.msrb.mxu1 %v961_v5 }
  0x41   :  { %540 = vmatpush.bf16.msrb.mxu2 %v821_v6 }
  0x42   :  { %559 = vmatpush.bf16.msrb.mxu3 %v949_v9  ;;  %502 = vmatpush.bf16.msrb.mxu0 %v817_v12  ;;  %v592_v12 = vmul.f32 512.0, %v1132_v11 }
  0x43   :  { %521 = vmatpush.bf16.msrb.mxu1 %v945_v13 }
  0x44   :  { %541 = vmatmul.bf16.vlgmr.msrb.gmra.mxu2 %v1382_v44  ;;  %v593_v13 = vsub.f32 1.0, %v592_v12 }
  0x45   :  { %503 = vmatmul.bf16.vlgmr.msrb.gmra.mxu0 %v1382_v44  ;;  %560 = vmatmul.bf16.vlgmr.msrb.gmra.mxu3 %v1393_v49 }
  0x46   :  { %522 = vmatmul.bf16.vlgmr.msrb.gmra.mxu1 %v1393_v49 }
  0x54   :  { %546 = vmatmul.bf16.gmra.mxu2 %v1498_v34 }
  0x55   :  { %508 = vmatmul.bf16.gmra.mxu0 %v1498_v34  ;;  %565 = vmatmul.bf16.gmra.mxu3 %v1509_v39 }
  0x56   :  { %527 = vmatmul.bf16.gmra.mxu1 %v1509_v39 }
  0xa0   :  { %v428_v14 = vpop.f32.mrf.mxu0 }
  0xa1   :  { %v447_v15 = vpop.f32.mrf.mxu1 }
  0xa2   :  { %v448_v31 = vadd.f32 %v447_v15, %v428_v14  ;;  %v594_v14 = vmul.f32 %v1132_v11, %v593_v13 }
  0xa4   :  { %v595_v15 = vadd.f32 %v1132_v11, %v594_v14 }
  0xa7   :  { %v466_v16 = vpop.f32.mrf.mxu2 }
  0xa8   :  { %v485_v17 = vpop.f32.mrf.mxu3  ;;  %v430_v18 = vpop.f32.mrf.mxu0 }
  0xa9   :  { %v449_v19 = vpop.f32.mrf.mxu1  ;;  %v486_v30 = vadd.f32 %v485_v17, %v466_v16  ;;  %v1595_v16 = vsel %vm596_vm0, %v1132_v11, %v595_v15 }
  0xaa   :  { %v450_v42 = vadd.f32 %v449_v19, %v430_v18 }
  0xab   :  { %v571_v33 = vadd.f32 %v486_v30, %v448_v31 }
  0xaf   :  { %v468_v20 = vpop.f32.mrf.mxu2 }
  0xb0   :  { %v487_v44 = vpop.f32.mrf.mxu3  ;;  %v433_v21 = vpop.f32.mrf.mxu0 }
  0xb1   :  { %v452_v22 = vpop.f32.mrf.mxu1  ;;  %v488_v40 = vadd.f32 %v487_v44, %v468_v20 }
  0xb2   :  { %v453_v55 = vadd.f32 %v452_v22, %v433_v21 }
  0xb3   :  { %v576_v45 = vadd.f32 %v488_v40, %v450_v42 }
  0xb7   :  { %v471_v23 = vpop.f32.mrf.mxu2 }
  0xb8   :  { %v490_v49 = vpop.f32.mrf.mxu3  ;;  %v435_v24 = vpop.f32.mrf.mxu0 }
  0xb9   :  { %v454_v25 = vpop.f32.mrf.mxu1  ;;  %v491_v53 = vadd.f32 %v490_v49, %v471_v23 }
  0xba   :  { %v455_v2 = vadd.f32 %v454_v25, %v435_v24 }
  0xbb   :  { %v581_v57 = vadd.f32 %v491_v53, %v453_v55 }
  0xbf   :  { %v473_v26 = vpop.f32.mrf.mxu2 }
  0xc0   :  { %v492_v27 = vpop.f32.mrf.mxu3 }
  0xc1   :  { %v1589_v0 = vadd.f32 %v492_v27, %v473_v26 }
  0xc2   :  { %v504_v28 = vpop.f32.mrf.mxu0 }
  0xc3   :  { %v523_v29 = vpop.f32.mrf.mxu1  ;;  %v586_v4 = vadd.f32 %v1589_v0, %v455_v2 }
  0xc4   :  { %v524_v32 = vadd.f32 %v523_v29, %v504_v28 }
  0xc6   :  { %v572_v38 = vadd.f32 %v571_v33, %v524_v32 }
  0xc7   :  { %v542_v34 = vpop.f32.mrf.mxu2 }
  0xc8   :  { %v561_v35 = vpop.f32.mrf.mxu3 }
  0xc9   :  { %v562_v36 = vadd.f32 %v561_v35, %v542_v34 }
  0xca   :  { %v506_v37 = vpop.f32.mrf.mxu0 }
  0xcb   :  { %v525_v39 = vpop.f32.mrf.mxu1  ;;  %v573_v41 = vadd.f32 %v572_v38, %v562_v36 }
  0xcc   :  { %v526_v43 = vadd.f32 %v525_v39, %v506_v37 }
  0xcd   :  { %574 = vadd.xlane.f32.xlu0 %v573_v41 }
  0xce   :  { %v577_v48 = vadd.f32 %v576_v45, %v526_v43 }
  0xcf   :  { %v544_v46 = vpop.f32.mrf.mxu2 }
  0xd0   :  { %v563_v47 = vpop.f32.mrf.mxu3 }
  0xd1   :  { %v564_v50 = vadd.f32 %v563_v47, %v544_v46 }
  0xd2   :  { %v509_v51 = vpop.f32.mrf.mxu0 }
  0xd3   :  { %v528_v52 = vpop.f32.mrf.mxu1  ;;  %v578_v54 = vadd.f32 %v577_v48, %v564_v50 }
  0xd4   :  { %v529_v56 = vadd.f32 %v528_v52, %v509_v51 }
  0xd5   :  { %579 = vadd.xlane.f32.xlu0 %v578_v54 }
  0xd6   :  { %v582_v61 = vadd.f32 %v581_v57, %v529_v56 }
  0xd7   :  { %v547_v58 = vpop.f32.mrf.mxu2 }
  0xd8   :  { %v566_v59 = vpop.f32.mrf.mxu3 }
  0xd9   :  { %v567_v60 = vadd.f32 %v566_v59, %v547_v58 }
  0xda   :  { %v511_v62 = vpop.f32.mrf.mxu0 }
  0xdb   :  { %v530_v63 = vpop.f32.mrf.mxu1  ;;  %v583_v1 = vadd.f32 %v582_v61, %v567_v60 }
  0xdc   :  { %v1591_v3 = vadd.f32 %v530_v63, %v511_v62 }
  0xdd   :  { %584 = vadd.xlane.f32.xlu1 %v583_v1 }
  0xde   :  { %v587_v7 = vadd.f32 %v586_v4, %v1591_v3 }
  0xdf   :  { %v549_v5 = vpop.f32.mrf.mxu2 }
  0xe0   :  { %v568_v6 = vpop.f32.mrf.mxu3 }
  0xe1   :  { %v569_v8 = vadd.f32 %v568_v6, %v549_v5 }
  0xe3   :  { %v588_v9 = vadd.f32 %v587_v7, %v569_v8 }
  0xe5   :  { %589 = vadd.xlane.f32.xlu1 %v588_v9 }
 0x140   :  { %v575_v17 = vpop.xlane.xlu0 %574 }
 0x141   :  { %v598_v18 = vmul.f32 %v1595_v16, %v575_v17 }
 0x143   :  { %v1598_v19 = vsub.f32 %v448_v31, %v598_v18  ;;  %v1600_v20 = vsub.f32 %v486_v30, %v598_v18  ;;  %v1602_v44 = vsub.f32 %v524_v32, %v598_v18  ;;  %v1604_v21 = vsub.f32 %v562_v36, %v598_v18 }
 0x145   :  { %v618_v22 = vmul.f32 %v1598_v19, %v1598_v19  ;;  %v619_v23 = vmul.f32 %v1600_v20, %v1600_v20  ;;  %v620_v49 = vmul.f32 %v1602_v44, %v1602_v44  ;;  %v621_v27 = vmul.f32 %v1604_v21, %v1604_v21 }
 0x147   :  { %v634_v24 = vadd.f32 %v619_v23, %v618_v22 }
 0x148   :  { %v580_v25 = vpop.xlane.xlu0 %579 }
 0x149   :  { %v599_v26 = vmul.f32 %v1595_v16, %v580_v25  ;;  %v635_v28 = vadd.f32 %v634_v24, %v620_v49 }
 0x14b   :  { %v1615_v29 = vsub.f32 %v450_v42, %v599_v26  ;;  %v1617_v30 = vsub.f32 %v488_v40, %v599_v26  ;;  %v636_v31 = vadd.f32 %v635_v28, %v621_v27  ;;  %v1619_v32 = vsub.f32 %v526_v43, %v599_v26 }
 0x14c   :  { %v1621_v33 = vsub.f32 %v564_v50, %v599_v26 }
 0x14d   :  { %637 = vadd.xlane.f32.xlu2 %v636_v31  ;;  %v622_v34 = vmul.f32 %v1615_v29, %v1615_v29  ;;  %v623_v35 = vmul.f32 %v1617_v30, %v1617_v30  ;;  %v624_v36 = vmul.f32 %v1619_v32, %v1619_v32 }
 0x14e   :  { %v625_v40 = vmul.f32 %v1621_v33, %v1621_v33 }
 0x14f   :  { %v639_v37 = vadd.f32 %v623_v35, %v622_v34 }
 0x150   :  { %v585_v38 = vpop.xlane.xlu1 %584 }
 0x151   :  { %v600_v39 = vmul.f32 %v1595_v16, %v585_v38  ;;  %v640_v41 = vadd.f32 %v639_v37, %v624_v36 }
 0x153   :  { %v1632_v42 = vsub.f32 %v453_v55, %v600_v39  ;;  %v1634_v43 = vsub.f32 %v491_v53, %v600_v39  ;;  %v641_v45 = vadd.f32 %v640_v41, %v625_v40  ;;  %v1636_v46 = vsub.f32 %v529_v56, %v600_v39 }
 0x154   :  { %v1638_v47 = vsub.f32 %v567_v60, %v600_v39 }
 0x155   :  { %642 = vadd.xlane.f32.xlu2 %v641_v45  ;;  %v626_v48 = vmul.f32 %v1632_v42, %v1632_v42  ;;  %v627_v50 = vmul.f32 %v1634_v43, %v1634_v43  ;;  %v628_v51 = vmul.f32 %v1636_v46, %v1636_v46 }
 0x156   :  { %v629_v55 = vmul.f32 %v1638_v47, %v1638_v47 }
 0x157   :  { %v644_v52 = vadd.f32 %v627_v50, %v626_v48 }
 0x158   :  { %v590_v54 = vpop.xlane.xlu1 %589 }
 0x159   :  { %v601_v53 = vmul.f32 %v1595_v16, %v590_v54  ;;  %v645_v56 = vadd.f32 %v644_v52, %v628_v51 }
 0x15b   :  { %v1649_v57 = vsub.f32 %v455_v2, %v601_v53  ;;  %v1652_v58 = vsub.f32 %v1589_v0, %v601_v53  ;;  %v646_v59 = vadd.f32 %v645_v56, %v629_v55  ;;  %v1655_v60 = vsub.f32 %v1591_v3, %v601_v53 }
 0x15c   :  { %v1657_v61 = vsub.f32 %v569_v8, %v601_v53 }
 0x15d   :  { %647 = vadd.xlane.f32.xlu0 %v646_v59  ;;  %v630_v62 = vmul.f32 %v1649_v57, %v1649_v57  ;;  %v631_v63 = vmul.f32 %v1652_v58, %v1652_v58  ;;  %v632_v1 = vmul.f32 %v1655_v60, %v1655_v60 }
 0x15e   :  { %v633_v0 = vmul.f32 %v1657_v61, %v1657_v61 }
 0x15f   :  { %v649_v2 = vadd.f32 %v631_v63, %v630_v62 }
 0x161   :  { %v650_v4 = vadd.f32 %v649_v2, %v632_v1 }
 0x163   :  { %v651_v5 = vadd.f32 %v650_v4, %v633_v0 }
 0x165   :  { %652 = vadd.xlane.f32.xlu1 %v651_v5 }
 0x1c0   :  { %v638_v3 = vpop.xlane.xlu2 %637 }
 0x1c1   :  { %v654_v6 = vmul.f32 %v638_v3, %v1595_v16 }
 0x1c3   :  { %v658_v7 = vmax.f32 %v654_v6, 0.0 }
 0x1c5   :  { %v662_v8 = vadd.f32 1e-05, %v658_v7 }
 0x1c7   :  { %1133 = vrsqrt.f32 %v662_v8  ;;  %vm672_vm2 = vweird.f32 %v662_v8 }
 0x1c8   :  { %v643_v9 = vpop.xlane.xlu2 %642 }
 0x1c9   :  { %v655_v10 = vmul.f32 %v643_v9, %v1595_v16 }
 0x1cb   :  { %v659_v11 = vmax.f32 %v655_v10, 0.0 }
 0x1cd   :  { %v1134_v12 = vpop.eup %1133  ;;  %v663_v13 = vadd.f32 1e-05, %v659_v11 }
 0x1ce   :  { %v667_v14 = vmul.f32 %v1134_v12, %v662_v8  ;;  %vm673_vm1 = vweird.f32 %v1134_v12 }
 0x1cf   :  { %1135 = vrsqrt.f32 %v663_v13  ;;  %vm674_vm3 = vmor %vm672_vm2, %vm673_vm1  ;;  %vm682_vm9 = vweird.f32 %v663_v13 }
 0x1d0   :  { %v668_v15 = vmul.f32 %v1134_v12, %v667_v14  ;;  %v648_v17 = vpop.xlane.xlu0 %647 }
 0x1d1   :  { %v656_v18 = vmul.f32 %v648_v17, %v1595_v16 }
 0x1d2   :  { %v669_v22 = vmul.f32 0.5, %v668_v15 }
 0x1d3   :  { %v660_v23 = vmax.f32 %v656_v18, 0.0 }
 0x1d4   :  { %v670_v49 = vsub.f32 1.5, %v669_v22 }
 0x1d5   :  { %v1136_v24 = vpop.eup %1135  ;;  %v1670_v25 = vadd.f32 1e-05, %v660_v23 }
 0x1d6   :  { %v671_v26 = vmul.f32 %v1134_v12, %v670_v49  ;;  %v677_v27 = vmul.f32 %v1136_v24, %v663_v13  ;;  %vm683_vm8 = vweird.f32 %v1136_v24 }
 0x1d7   :  { %1137 = vrsqrt.f32 %v1670_v25  ;;  %vm684_vm10 = vmor %vm682_vm9, %vm683_vm8  ;;  %vm692_vm0 = vweird.f32 %v1670_v25 }
 0x1d8   :  { %v675_v28 = vsel %vm674_vm3, %v1134_v12, %v671_v26  ;;  %v678_v31 = vmul.f32 %v1136_v24, %v677_v27  ;;  %v653_v34 = vpop.xlane.xlu1 %652 }
 0x1d9   :  { %v706_v35 = vmul.f32 %v675_v28, %v1598_v19  ;;  %v707_v36 = vmul.f32 %v675_v28, %v1600_v20  ;;  %v708_v37 = vmul.f32 %v675_v28, %v1602_v44  ;;  %v709_v38 = vmul.f32 %v675_v28, %v1604_v21 }
 0x1da   :  { %v679_v39 = vmul.f32 0.5, %v678_v31  ;;  %v657_v40 = vmul.f32 %v653_v34, %v1595_v16 }
 0x1db   :  { %vm722_vm4 = vcmp.ge.f32.partialorder %v706_v35, 0.0  ;;  %vm723_vm5 = vcmp.ge.f32.partialorder %v707_v36, 0.0  ;;  %vm724_vm6 = vcmp.ge.f32.partialorder %v708_v37, 0.0  ;;  %vm725_vm7 = vcmp.ge.f32.partialorder %v709_v38, 0.0 }
 0x1dc   :  { %v738_v41 = vmul.f32 0.2, %v706_v35  ;;  %v739_v45 = vmul.f32 0.2, %v707_v36  ;;  %v740_v48 = vmul.f32 0.2, %v708_v37 }
 0x1dd   :  { %v1138_v50 = vpop.eup %1137  ;;  %v741_v51 = vmul.f32 0.2, %v709_v38  ;;  %v680_v52 = vsub.f32 1.5, %v679_v39  ;;  %v661_v19 = vmax.f32 %v657_v40, 0.0 }
 0x1de   :  { %v754_v20 = vsel %vm722_vm4, %v706_v35, %v738_v41  ;;  %v755_v54 = vsel %vm723_vm5, %v707_v36, %v739_v45  ;;  %v756_v44 = vsel %vm724_vm6, %v708_v37, %v740_v48  ;;  %v687_v21 = vmul.f32 %v1138_v50, %v1670_v25 }
 0x1df   :  { %v757_v53 = vsel %vm725_vm7, %v709_v38, %v741_v51  ;;  %v770_v55 = vpack.c.bf16 %v755_v54, %v754_v20  ;;  %v681_v16 = vmul.f32 %v1136_v24, %v680_v52  ;;  %v665_v62 = vadd.f32 1e-05, %v661_v19 }
 0x1e0   :  { %v771_v56 = vpack.c.bf16 %v757_v53, %v756_v44  ;;  %v688_v59 = vmul.f32 %v1138_v50, %v687_v21  ;;  %vm693_vm15 = vweird.f32 %v1138_v50 }
 0x1e1   :  { %778 = vst [vmem:[%s1718_s2] sm:$0xff] %v770_v55  ;;  %v685_v63 = vsel %vm684_vm10, %v1136_v24, %v681_v16  ;;  %1139 = vrsqrt.f32 %v665_v62  ;;  %vm694_vm1 = vmor %vm692_vm0, %vm693_vm15  ;;  %vm702_vm7 = vweird.f32 %v665_v62 }
 0x1e2   :  { %779 = vst [vmem:[%s1718_s2 + $0x8] sm:$0xff] %v771_v56  ;;  %v710_v1 = vmul.f32 %v685_v63, %v1615_v29  ;;  %v711_v2 = vmul.f32 %v685_v63, %v1617_v30  ;;  %v712_v0 = vmul.f32 %v685_v63, %v1619_v32  ;;  %v713_v4 = vmul.f32 %v685_v63, %v1621_v33 }
 0x1e3   :  { %v689_v5 = vmul.f32 0.5, %v688_v59 }
 0x1e4   :  { %vm726_vm11 = vcmp.ge.f32.partialorder %v710_v1, 0.0  ;;  %vm727_vm12 = vcmp.ge.f32.partialorder %v711_v2, 0.0  ;;  %vm728_vm13 = vcmp.ge.f32.partialorder %v712_v0, 0.0  ;;  %vm729_vm14 = vcmp.ge.f32.partialorder %v713_v4, 0.0 }
 0x1e5   :  { %v742_v3 = vmul.f32 0.2, %v710_v1  ;;  %v743_v6 = vmul.f32 0.2, %v711_v2  ;;  %v744_v7 = vmul.f32 0.2, %v712_v0 }
 0x1e6   :  { %v745_v8 = vmul.f32 0.2, %v713_v4  ;;  %v690_v9 = vsub.f32 1.5, %v689_v5 }
 0x1e7   :  { %v758_v10 = vsel %vm726_vm11, %v710_v1, %v742_v3  ;;  %v759_v29 = vsel %vm727_vm12, %v711_v2, %v743_v6  ;;  %v760_v11 = vsel %vm728_vm13, %v712_v0, %v744_v7  ;;  %v1140_v33 = vpop.eup %1139 }
 0x1e8   :  { %v761_v30 = vsel %vm729_vm14, %v713_v4, %v745_v8  ;;  %v772_v12 = vpack.c.bf16 %v759_v29, %v758_v10  ;;  %v691_v32 = vmul.f32 %v1138_v50, %v690_v9  ;;  %v697_v15 = vmul.f32 %v1140_v33, %v665_v62 }
 0x1e9   :  { %v773_v13 = vpack.c.bf16 %v761_v30, %v760_v11  ;;  %vm703_vm6 = vweird.f32 %v1140_v33 }
 0x1ea   :  { %780 = vst [vmem:[%s1718_s2 + $0x10] sm:$0xff] %v772_v12  ;;  %v695_v14 = vsel %vm694_vm1, %v1138_v50, %v691_v32  ;;  %v698_v49 = vmul.f32 %v1140_v33, %v697_v15  ;;  %vm704_vm8 = vmor %vm702_vm7, %vm703_vm6 }
 0x1eb   :  { %781 = vst [vmem:[%s1718_s2 + $0x18] sm:$0xff] %v773_v13  ;;  %v714_v17 = vmul.f32 %v695_v14, %v1632_v42  ;;  %v715_v18 = vmul.f32 %v695_v14, %v1634_v43  ;;  %v716_v22 = vmul.f32 %v695_v14, %v1636_v46  ;;  %v717_v23 = vmul.f32 %v695_v14, %v1638_v47 }
 0x1ec   :  { %v699_v28 = vmul.f32 0.5, %v698_v49 }
 0x1ed   :  { %vm730_vm2 = vcmp.ge.f32.partialorder %v714_v17, 0.0  ;;  %vm731_vm3 = vcmp.ge.f32.partialorder %v715_v18, 0.0  ;;  %vm732_vm4 = vcmp.ge.f32.partialorder %v716_v22, 0.0  ;;  %vm733_vm5 = vcmp.ge.f32.partialorder %v717_v23, 0.0 }
 0x1ee   :  { %v746_v24 = vmul.f32 0.2, %v714_v17  ;;  %v747_v25 = vmul.f32 0.2, %v715_v18  ;;  %v748_v26 = vmul.f32 0.2, %v716_v22 }
 0x1ef   :  { %v749_v27 = vmul.f32 0.2, %v717_v23  ;;  %v700_v43 = vsub.f32 1.5, %v699_v28 }
 0x1f0   :  { %v762_v31 = vsel %vm730_vm2, %v714_v17, %v746_v24  ;;  %v763_v34 = vsel %vm731_vm3, %v715_v18, %v747_v25  ;;  %v764_v35 = vsel %vm732_vm4, %v716_v22, %v748_v26 }
 0x1f1   :  { %v765_v42 = vsel %vm733_vm5, %v717_v23, %v749_v27  ;;  %v774_v36 = vpack.c.bf16 %v763_v34, %v762_v31  ;;  %v701_v47 = vmul.f32 %v1140_v33, %v700_v43 }
 0x1f2   :  { %v775_v46 = vpack.c.bf16 %v765_v42, %v764_v35 }
 0x1f3   :  { %782 = vst [vmem:[%s1718_s2 + $0x20] sm:$0xff] %v774_v36  ;;  %v705_v37 = vsel %vm704_vm8, %v1140_v33, %v701_v47 }
 0x1f4   :  { %783 = vst [vmem:[%s1718_s2 + $0x28] sm:$0xff] %v775_v46  ;;  %v718_v38 = vmul.f32 %v705_v37, %v1649_v57  ;;  %v719_v39 = vmul.f32 %v705_v37, %v1652_v58  ;;  %v720_v40 = vmul.f32 %v705_v37, %v1655_v60  ;;  %v721_v41 = vmul.f32 %v705_v37, %v1657_v61 }
 0x1f6   :  { %vm734_vm9 = vcmp.ge.f32.partialorder %v718_v38, 0.0  ;;  %vm735_vm10 = vcmp.ge.f32.partialorder %v719_v39, 0.0  ;;  %vm736_vm11 = vcmp.ge.f32.partialorder %v720_v40, 0.0  ;;  %vm737_vm12 = vcmp.ge.f32.partialorder %v721_v41, 0.0 }
 0x1f7   :  { %v750_v45 = vmul.f32 0.2, %v718_v38  ;;  %v751_v48 = vmul.f32 0.2, %v719_v39  ;;  %v752_v50 = vmul.f32 0.2, %v720_v40 }
 0x1f8   :  { %v753_v51 = vmul.f32 0.2, %v721_v41 }
 0x1f9   :  { %v766_v52 = vsel %vm734_vm9, %v718_v38, %v750_v45  ;;  %v767_v19 = vsel %vm735_vm10, %v719_v39, %v751_v48  ;;  %v768_v20 = vsel %vm736_vm11, %v720_v40, %v752_v50 }
 0x1fa   :  { %v769_v54 = vsel %vm737_vm12, %v721_v41, %v753_v51  ;;  %v776_v44 = vpack.c.bf16 %v767_v19, %v766_v52 }
 0x1fb   :  { %v777_v57 = vpack.c.bf16 %v769_v54, %v768_v20 }
 0x1fc   :  { %784 = vst [vmem:[%s1718_s2 + $0x30] sm:$0xff] %v776_v44 }
 0x1fd   :  { %785 = vst [vmem:[%s1718_s2 + $0x38] sm:$0xff] %v777_v57 }

// kernel: layered_forward.7
= control target key start
LH: loop header
LB: loop body
LE: loop exit
PB: predicated region body
PF: predicated region fallthrough
CT: control target
= control target key end

     0   :  { %s1266_s1 = inlined_call_operand.vmem [shape: bf16[512,128], index: 1, kind: input, shape index: {}]   ;;  %s1267_s0 = inlined_call_operand.vmem [shape: bf16[64,512], index: 0, kind: input, shape index: {}]   ;;  %s1268_s2 = inlined_call_operand.vmem [shape: bf16[64,128], index: 2, kind: output, shape index: {}]  }
   0x1   :  { %v913_v0 = vld [vmem:[%s1266_s1 + $0x38] sm:$0xff]  ;;  %v912_v4 = vld [vmem:[%s1266_s1 + $0x30] sm:$0xff]  ;;  %v911_v8 = vld [vmem:[%s1266_s1 + $0x28] sm:$0xff] }
   0x2   :  { %v921_v1 = vld [vmem:[%s1266_s1 + $0x78] sm:$0xff]  ;;  %363 = vmatpush.bf16.msra.mxu0 %v913_v0  ;;  %v920_v5 = vld [vmem:[%s1266_s1 + $0x70] sm:$0xff]  ;;  %v919_v9 = vld [vmem:[%s1266_s1 + $0x68] sm:$0xff] }
   0x3   :  { %v929_v2 = vld [vmem:[%s1266_s1 + $0xb8] sm:$0xff]  ;;  %392 = vmatpush.bf16.msra.mxu1 %v921_v1  ;;  %v928_v6 = vld [vmem:[%s1266_s1 + $0xb0] sm:$0xff]  ;;  %v927_v10 = vld [vmem:[%s1266_s1 + $0xa8] sm:$0xff] }
   0x4   :  { %v937_v3 = vld [vmem:[%s1266_s1 + $0xf8] sm:$0xff]  ;;  %421 = vmatpush.bf16.msra.mxu2 %v929_v2  ;;  %v936_v7 = vld [vmem:[%s1266_s1 + $0xf0] sm:$0xff]  ;;  %v935_v11 = vld [vmem:[%s1266_s1 + $0xe8] sm:$0xff] }
   0x5   :  { %450 = vmatpush.bf16.msra.mxu3 %v937_v3  ;;  %v910_v12 = vld [vmem:[%s1266_s1 + $0x20] sm:$0xff]  ;;  %v909_v16 = vld [vmem:[%s1266_s1 + $0x18] sm:$0xff]  ;;  %v908_v20 = vld [vmem:[%s1266_s1 + $0x10] sm:$0xff] }
   0x6   :  { %364 = vmatpush.bf16.msra.mxu0 %v912_v4  ;;  %v918_v13 = vld [vmem:[%s1266_s1 + $0x60] sm:$0xff]  ;;  %v917_v17 = vld [vmem:[%s1266_s1 + $0x58] sm:$0xff]  ;;  %v916_v21 = vld [vmem:[%s1266_s1 + $0x50] sm:$0xff] }
   0x7   :  { %393 = vmatpush.bf16.msra.mxu1 %v920_v5  ;;  %v926_v14 = vld [vmem:[%s1266_s1 + $0xa0] sm:$0xff]  ;;  %v925_v18 = vld [vmem:[%s1266_s1 + $0x98] sm:$0xff]  ;;  %v924_v22 = vld [vmem:[%s1266_s1 + $0x90] sm:$0xff] }
   0x8   :  { %422 = vmatpush.bf16.msra.mxu2 %v928_v6  ;;  %v934_v15 = vld [vmem:[%s1266_s1 + $0xe0] sm:$0xff]  ;;  %v933_v19 = vld [vmem:[%s1266_s1 + $0xd8] sm:$0xff]  ;;  %v932_v23 = vld [vmem:[%s1266_s1 + $0xd0] sm:$0xff] }
   0x9   :  { %451 = vmatpush.bf16.msra.mxu3 %v936_v7  ;;  %v907_v24 = vld [vmem:[%s1266_s1 + $0x8] sm:$0xff]  ;;  %v906_v28 = vld [vmem:[%s1266_s1] sm:$0xff]  ;;  %v892_v33 = vld [vmem:[%s1267_s0 + $0xc] sm:$0xf0] }
   0xa   :  { %365 = vmatpush.bf16.msra.mxu0 %v911_v8  ;;  %v915_v25 = vld [vmem:[%s1266_s1 + $0x48] sm:$0xff]  ;;  %v914_v29 = vld [vmem:[%s1266_s1 + $0x40] sm:$0xff]  ;;  %v702_v35 = vld [vmem:[%s1267_s0 + $0x10] sm:$0xf0] }
   0xb   :  { %394 = vmatpush.bf16.msra.mxu1 %v919_v9  ;;  %v923_v26 = vld [vmem:[%s1266_s1 + $0x88] sm:$0xff]  ;;  %v922_v30 = vld [vmem:[%s1266_s1 + $0x80] sm:$0xff]  ;;  %v893_v37 = vld [vmem:[%s1267_s0 + $0x14] sm:$0xf0] }
   0xc   :  { %423 = vmatpush.bf16.msra.mxu2 %v927_v10  ;;  %v931_v27 = vld [vmem:[%s1266_s1 + $0xc8] sm:$0xff]  ;;  %v930_v31 = vld [vmem:[%s1266_s1 + $0xc0] sm:$0xff]  ;;  %v710_v39 = vld [vmem:[%s1267_s0 + $0x18] sm:$0xf0] }
   0xd   :  { %452 = vmatpush.bf16.msra.mxu3 %v935_v11  ;;  %v700_v32 = vld [vmem:[%s1267_s0] sm:$0xf]  ;;  %v890_v34 = vld [vmem:[%s1267_s0 + $0x4] sm:$0xf]  ;;  %v708_v36 = vld [vmem:[%s1267_s0 + $0x8] sm:$0xf] }
   0xe   :  { %366 = vmatpush.bf16.msra.mxu0 %v910_v12  ;;  %v891_v38 = vld [vmem:[%s1267_s0 + $0xc] sm:$0xf]  ;;  %v701_v40 = vor.u32 %v892_v33, %v700_v32  ;;  %v705_v41 = vor.u32 %v890_v34, %v702_v35  ;;  %v709_v42 = vor.u32 %v893_v37, %v708_v36  ;;  %v716_v44 = vld [vmem:[%s1267_s0 + $0x20] sm:$0xf]  ;;  %v896_v45 = vld [vmem:[%s1267_s0 + $0x2c] sm:$0xf0] }
   0xf   :  { %395 = vmatpush.bf16.msra.mxu1 %v918_v13  ;;  %v713_v43 = vor.u32 %v891_v38, %v710_v39  ;;  %v894_v46 = vld [vmem:[%s1267_s0 + $0x24] sm:$0xf]  ;;  %v718_v47 = vld [vmem:[%s1267_s0 + $0x30] sm:$0xf0]  ;;  %v724_v48 = vld [vmem:[%s1267_s0 + $0x28] sm:$0xf]  ;;  %v717_v52 = vor.u32 %v896_v45, %v716_v44 }
  0x10   :  { %424 = vmatpush.bf16.msra.mxu2 %v926_v14  ;;  %v897_v49 = vld [vmem:[%s1267_s0 + $0x34] sm:$0xf0]  ;;  %v895_v50 = vld [vmem:[%s1267_s0 + $0x2c] sm:$0xf]  ;;  %v726_v51 = vld [vmem:[%s1267_s0 + $0x38] sm:$0xf0]  ;;  %v721_v53 = vor.u32 %v894_v46, %v718_v47 }
  0x11   :  { %453 = vmatpush.bf16.msra.mxu3 %v934_v15  ;;  %v725_v54 = vor.u32 %v897_v49, %v724_v48  ;;  %v729_v55 = vor.u32 %v895_v50, %v726_v51  ;;  %v732_v56 = vld [vmem:[%s1267_s0 + $0x40] sm:$0xf]  ;;  %v900_v57 = vld [vmem:[%s1267_s0 + $0x4c] sm:$0xf0]  ;;  %v898_v58 = vld [vmem:[%s1267_s0 + $0x44] sm:$0xf] }
  0x12   :  { %367 = vmatpush.bf16.msra.mxu0 %v909_v16  ;;  %v734_v59 = vld [vmem:[%s1267_s0 + $0x50] sm:$0xf0]  ;;  %v740_v60 = vld [vmem:[%s1267_s0 + $0x48] sm:$0xf]  ;;  %v901_v61 = vld [vmem:[%s1267_s0 + $0x54] sm:$0xf0]  ;;  %v733_v0 = vor.u32 %v900_v57, %v732_v56 }
  0x13   :  { %396 = vmatpush.bf16.msra.mxu1 %v917_v17  ;;  %v899_v62 = vld [vmem:[%s1267_s0 + $0x4c] sm:$0xf]  ;;  %v742_v63 = vld [vmem:[%s1267_s0 + $0x58] sm:$0xf0]  ;;  %v737_v1 = vor.u32 %v898_v58, %v734_v59  ;;  %v741_v2 = vor.u32 %v901_v61, %v740_v60  ;;  %v748_v4 = vld [vmem:[%s1267_s0 + $0x60] sm:$0xf] }
  0x14   :  { %425 = vmatpush.bf16.msra.mxu2 %v925_v18  ;;  %v745_v3 = vor.u32 %v899_v62, %v742_v63  ;;  %v904_v5 = vld [vmem:[%s1267_s0 + $0x6c] sm:$0xf0]  ;;  %v902_v6 = vld [vmem:[%s1267_s0 + $0x64] sm:$0xf]  ;;  %v750_v7 = vld [vmem:[%s1267_s0 + $0x70] sm:$0xf0] }
  0x15   :  { %454 = vmatpush.bf16.msra.mxu3 %v933_v19  ;;  %v756_v8 = vld [vmem:[%s1267_s0 + $0x68] sm:$0xf]  ;;  %v905_v9 = vld [vmem:[%s1267_s0 + $0x74] sm:$0xf0]  ;;  %v903_v10 = vld [vmem:[%s1267_s0 + $0x6c] sm:$0xf]  ;;  %v749_v12 = vor.u32 %v904_v5, %v748_v4  ;;  %v753_v13 = vor.u32 %v902_v6, %v750_v7 }
  0x16   :  { %368 = vmatpush.bf16.msra.mxu0 %v908_v20  ;;  %v758_v11 = vld [vmem:[%s1267_s0 + $0x78] sm:$0xf0]  ;;  %v757_v14 = vor.u32 %v905_v9, %v756_v8  ;;  %v980_v8 = vmov 128.0  }
  0x17   :  { %397 = vmatpush.bf16.msra.mxu1 %v916_v21  ;;  %v761_v15 = vor.u32 %v903_v10, %v758_v11  ;;  %962 = vrcp.f32 %v980_v8 }
  0x18   :  { %426 = vmatpush.bf16.msra.mxu2 %v924_v22 }
  0x19   :  { %455 = vmatpush.bf16.msra.mxu3 %v932_v23 }
  0x1a   :  { %369 = vmatpush.bf16.msra.mxu0 %v907_v24 }
  0x1b   :  { %398 = vmatpush.bf16.msra.mxu1 %v915_v25 }
  0x1c   :  { %427 = vmatpush.bf16.msra.mxu2 %v923_v26 }
  0x1d   :  { %456 = vmatpush.bf16.msra.mxu3 %v931_v27  ;;  %v963_v9 = vpop.eup %962 }
  0x1e   :  { %370 = vmatpush.bf16.msra.mxu0 %v906_v28  ;;  %v496_v10 = vmul.f32 128.0, %v963_v9  ;;  %vm500_vm0 = vweird.f32 %v963_v9 }
  0x1f   :  { %399 = vmatpush.bf16.msra.mxu1 %v914_v29 }
  0x20   :  { %428 = vmatpush.bf16.msra.mxu2 %v922_v30  ;;  %v497_v11 = vsub.f32 1.0, %v496_v10 }
  0x21   :  { %457 = vmatpush.bf16.msra.mxu3 %v930_v31  ;;  %371 = vmatmul.bf16.vlgmr.msra.gmra.mxu0 %v701_v40 }
  0x22   :  { %400 = vmatmul.bf16.vlgmr.msra.gmra.mxu1 %v705_v41 }
  0x23   :  { %429 = vmatmul.bf16.vlgmr.msra.gmra.mxu2 %v709_v42 }
  0x24   :  { %458 = vmatmul.bf16.vlgmr.msra.gmra.mxu3 %v713_v43 }
  0x31   :  { %376 = vmatmul.bf16.gmra.mxu0 %v717_v52 }
  0x32   :  { %405 = vmatmul.bf16.gmra.mxu1 %v721_v53 }
  0x33   :  { %434 = vmatmul.bf16.gmra.mxu2 %v725_v54 }
  0x34   :  { %463 = vmatmul.bf16.gmra.mxu3 %v729_v55 }
  0x41   :  { %381 = vmatmul.bf16.gmra.mxu0 %v733_v0 }
  0x42   :  { %410 = vmatmul.bf16.gmra.mxu1 %v737_v1 }
  0x43   :  { %439 = vmatmul.bf16.gmra.mxu2 %v741_v2 }
  0x44   :  { %468 = vmatmul.bf16.gmra.mxu3 %v745_v3 }
  0x51   :  { %386 = vmatmul.bf16.gmra.mxu0 %v749_v12  ;;  %v498_v12 = vmul.f32 %v963_v9, %v497_v11 }
  0x52   :  { %415 = vmatmul.bf16.gmra.mxu1 %v753_v13 }
  0x53   :  { %444 = vmatmul.bf16.gmra.mxu2 %v757_v14  ;;  %v499_v13 = vadd.f32 %v963_v9, %v498_v12 }
  0x54   :  { %473 = vmatmul.bf16.gmra.mxu3 %v761_v15 }
  0x55   :  { %v1194_v14 = vsel %vm500_vm0, %v963_v9, %v499_v13 }
  0x9e   :  { %v372_v16 = vpop.f32.mrf.mxu0 }
  0x9f   :  { %v401_v17 = vpop.f32.mrf.mxu1 }
  0xa0   :  { %v402_v18 = vadd.f32 %v401_v17, %v372_v16 }
  0xa6   :  { %v430_v19 = vpop.f32.mrf.mxu2  ;;  %v374_v22 = vpop.f32.mrf.mxu0 }
  0xa7   :  { %v459_v20 = vpop.f32.mrf.mxu3  ;;  %v431_v21 = vadd.f32 %v430_v19, %v402_v18  ;;  %v403_v23 = vpop.f32.mrf.mxu1 }
  0xa8   :  { %v404_v25 = vadd.f32 %v403_v23, %v374_v22 }
  0xa9   :  { %v1188_v24 = vadd.f32 %v459_v20, %v431_v21 }
  0xab   :  { %479 = vadd.xlane.f32.xlu0 %v1188_v24 }
  0xae   :  { %v432_v26 = vpop.f32.mrf.mxu2  ;;  %v377_v29 = vpop.f32.mrf.mxu0 }
  0xaf   :  { %v461_v27 = vpop.f32.mrf.mxu3  ;;  %v433_v28 = vadd.f32 %v432_v26, %v404_v25  ;;  %v406_v30 = vpop.f32.mrf.mxu1 }
  0xb0   :  { %v407_v32 = vadd.f32 %v406_v30, %v377_v29 }
  0xb1   :  { %v1191_v31 = vadd.f32 %v461_v27, %v433_v28 }
  0xb3   :  { %481 = vadd.xlane.f32.xlu0 %v1191_v31 }
  0xb6   :  { %v435_v33 = vpop.f32.mrf.mxu2  ;;  %v379_v36 = vpop.f32.mrf.mxu0 }
  0xb7   :  { %v464_v34 = vpop.f32.mrf.mxu3  ;;  %v436_v35 = vadd.f32 %v435_v33, %v407_v32  ;;  %v408_v37 = vpop.f32.mrf.mxu1 }
  0xb8   :  { %v409_v39 = vadd.f32 %v408_v37, %v379_v36 }
  0xb9   :  { %v465_v38 = vadd.f32 %v464_v34, %v436_v35 }
  0xbb   :  { %483 = vadd.xlane.f32.xlu1 %v465_v38 }
  0xbe   :  { %v437_v40 = vpop.f32.mrf.mxu2  ;;  %v382_v43 = vpop.f32.mrf.mxu0 }
  0xbf   :  { %v466_v41 = vpop.f32.mrf.mxu3  ;;  %v438_v42 = vadd.f32 %v437_v40, %v409_v39  ;;  %v411_v44 = vpop.f32.mrf.mxu1 }
  0xc0   :  { %v412_v46 = vadd.f32 %v411_v44, %v382_v43 }
  0xc1   :  { %v467_v45 = vadd.f32 %v466_v41, %v438_v42 }
  0xc3   :  { %485 = vadd.xlane.f32.xlu1 %v467_v45 }
  0xc6   :  { %v440_v47 = vpop.f32.mrf.mxu2  ;;  %v384_v50 = vpop.f32.mrf.mxu0 }
  0xc7   :  { %v469_v48 = vpop.f32.mrf.mxu3  ;;  %v441_v49 = vadd.f32 %v440_v47, %v412_v46  ;;  %v413_v51 = vpop.f32.mrf.mxu1 }
  0xc8   :  { %v414_v53 = vadd.f32 %v413_v51, %v384_v50 }
  0xc9   :  { %v470_v52 = vadd.f32 %v469_v48, %v441_v49 }
  0xcb   :  { %487 = vadd.xlane.f32.xlu2 %v470_v52 }
  0xce   :  { %v442_v54 = vpop.f32.mrf.mxu2  ;;  %v387_v57 = vpop.f32.mrf.mxu0 }
  0xcf   :  { %v471_v55 = vpop.f32.mrf.mxu3  ;;  %v443_v56 = vadd.f32 %v442_v54, %v414_v53  ;;  %v416_v58 = vpop.f32.mrf.mxu1 }
  0xd0   :  { %v417_v60 = vadd.f32 %v416_v58, %v387_v57 }
  0xd1   :  { %v472_v59 = vadd.f32 %v471_v55, %v443_v56 }
  0xd3   :  { %489 = vadd.xlane.f32.xlu2 %v472_v59 }
  0xd6   :  { %v445_v61 = vpop.f32.mrf.mxu2  ;;  %v389_v1 = vpop.f32.mrf.mxu0 }
  0xd7   :  { %v474_v62 = vpop.f32.mrf.mxu3  ;;  %v446_v63 = vadd.f32 %v445_v61, %v417_v60  ;;  %v418_v2 = vpop.f32.mrf.mxu1 }
  0xd8   :  { %v419_v3 = vadd.f32 %v418_v2, %v389_v1 }
  0xd9   :  { %v475_v0 = vadd.f32 %v474_v62, %v446_v63 }
  0xdb   :  { %491 = vadd.xlane.f32.xlu0 %v475_v0 }
  0xde   :  { %v447_v4 = vpop.f32.mrf.mxu2 }
  0xdf   :  { %v448_v5 = vadd.f32 %v447_v4, %v419_v3  ;;  %v476_v6 = vpop.f32.mrf.mxu3 }
  0xe1   :  { %v477_v7 = vadd.f32 %v476_v6, %v448_v5 }
  0xe3   :  { %493 = vadd.xlane.f32.xlu1 %v477_v7 }
 0x11e   :  { %v480_v15 = vpop.xlane.xlu0 %479 }
 0x11f   :  { %v502_v16 = vmul.f32 %v1194_v14, %v480_v15 }
 0x121   :  { %v1198_v17 = vsub.f32 %v1188_v24, %v502_v16 }
 0x123   :  { %v518_v18 = vmul.f32 %v1198_v17, %v1198_v17 }
 0x125   :  { %526 = vadd.xlane.f32.xlu2 %v518_v18 }
 0x126   :  { %v482_v19 = vpop.xlane.xlu0 %481 }
 0x127   :  { %v503_v20 = vmul.f32 %v1194_v14, %v482_v19 }
 0x129   :  { %v1204_v21 = vsub.f32 %v1191_v31, %v503_v20 }
 0x12b   :  { %v519_v22 = vmul.f32 %v1204_v21, %v1204_v21 }
 0x12d   :  { %528 = vadd.xlane.f32.xlu0 %v519_v22 }
 0x12e   :  { %v484_v23 = vpop.xlane.xlu1 %483 }
 0x12f   :  { %v504_v25 = vmul.f32 %v1194_v14, %v484_v23 }
 0x131   :  { %v1209_v26 = vsub.f32 %v465_v38, %v504_v25 }
 0x133   :  { %v520_v24 = vmul.f32 %v1209_v26, %v1209_v26 }
 0x135   :  { %530 = vadd.xlane.f32.xlu1 %v520_v24 }
 0x136   :  { %v486_v27 = vpop.xlane.xlu1 %485 }
 0x137   :  { %v505_v28 = vmul.f32 %v1194_v14, %v486_v27 }
 0x139   :  { %v1214_v29 = vsub.f32 %v467_v45, %v505_v28 }
 0x13b   :  { %v521_v30 = vmul.f32 %v1214_v29, %v1214_v29 }
 0x13d   :  { %532 = vadd.xlane.f32.xlu2 %v521_v30 }
 0x13e   :  { %v488_v31 = vpop.xlane.xlu2 %487 }
 0x13f   :  { %v506_v32 = vmul.f32 %v1194_v14, %v488_v31 }
 0x141   :  { %v1219_v33 = vsub.f32 %v470_v52, %v506_v32 }
 0x143   :  { %v522_v34 = vmul.f32 %v1219_v33, %v1219_v33 }
 0x145   :  { %534 = vadd.xlane.f32.xlu0 %v522_v34 }
 0x146   :  { %v490_v35 = vpop.xlane.xlu2 %489 }
 0x147   :  { %v507_v36 = vmul.f32 %v1194_v14, %v490_v35 }
 0x149   :  { %v1224_v37 = vsub.f32 %v472_v59, %v507_v36 }
 0x14b   :  { %v523_v38 = vmul.f32 %v1224_v37, %v1224_v37 }
 0x14d   :  { %536 = vadd.xlane.f32.xlu1 %v523_v38 }
 0x14e   :  { %v492_v39 = vpop.xlane.xlu0 %491 }
 0x14f   :  { %v508_v40 = vmul.f32 %v1194_v14, %v492_v39 }
 0x151   :  { %v1229_v41 = vsub.f32 %v475_v0, %v508_v40 }
 0x153   :  { %v524_v42 = vmul.f32 %v1229_v41, %v1229_v41 }
 0x155   :  { %538 = vadd.xlane.f32.xlu2 %v524_v42 }
 0x156   :  { %v494_v43 = vpop.xlane.xlu1 %493 }
 0x157   :  { %v509_v44 = vmul.f32 %v1194_v14, %v494_v43 }
 0x159   :  { %v1234_v45 = vsub.f32 %v477_v7, %v509_v44 }
 0x15b   :  { %v525_v46 = vmul.f32 %v1234_v45, %v1234_v45 }
 0x15d   :  { %540 = vadd.xlane.f32.xlu0 %v525_v46 }
 0x198   :  { %v527_v47 = vpop.xlane.xlu2 %526 }
 0x199   :  { %v542_v48 = vmul.f32 %v527_v47, %v1194_v14 }
 0x19b   :  { %v550_v49 = vmax.f32 %v542_v48, 0.0 }
 0x19d   :  { %v558_v50 = vadd.f32 1e-05, %v550_v49 }
 0x19f   :  { %964 = vrsqrt.f32 %v558_v50  ;;  %vm572_vm2 = vweird.f32 %v558_v50 }
 0x1a0   :  { %v529_v51 = vpop.xlane.xlu0 %528 }
 0x1a1   :  { %v543_v52 = vmul.f32 %v529_v51, %v1194_v14 }
 0x1a3   :  { %v551_v53 = vmax.f32 %v543_v52, 0.0 }
 0x1a5   :  { %v965_v54 = vpop.eup %964  ;;  %v559_v55 = vadd.f32 1e-05, %v551_v53 }
 0x1a6   :  { %v567_v56 = vmul.f32 %v965_v54, %v558_v50  ;;  %vm573_vm1 = vweird.f32 %v965_v54 }
 0x1a7   :  { %966 = vrsqrt.f32 %v559_v55  ;;  %vm574_vm3 = vmor %vm572_vm2, %vm573_vm1  ;;  %vm582_vm5 = vweird.f32 %v559_v55 }
 0x1a8   :  { %v568_v57 = vmul.f32 %v965_v54, %v567_v56  ;;  %v531_v58 = vpop.xlane.xlu1 %530 }
 0x1a9   :  { %v544_v59 = vmul.f32 %v531_v58, %v1194_v14 }
 0x1aa   :  { %v569_v60 = vmul.f32 0.5, %v568_v57 }
 0x1ab   :  { %v552_v61 = vmax.f32 %v544_v59, 0.0 }
 0x1ac   :  { %v570_v62 = vsub.f32 1.5, %v569_v60 }
 0x1ad   :  { %v967_v63 = vpop.eup %966  ;;  %v560_v0 = vadd.f32 1e-05, %v552_v61 }
 0x1ae   :  { %v571_v1 = vmul.f32 %v965_v54, %v570_v62  ;;  %v577_v2 = vmul.f32 %v967_v63, %v559_v55  ;;  %vm583_vm4 = vweird.f32 %v967_v63 }
 0x1af   :  { %968 = vrsqrt.f32 %v560_v0  ;;  %vm584_vm6 = vmor %vm582_vm5, %vm583_vm4  ;;  %vm592_vm10 = vweird.f32 %v560_v0 }
 0x1b0   :  { %v578_v3 = vmul.f32 %v967_v63, %v577_v2  ;;  %v533_v4 = vpop.xlane.xlu2 %532  ;;  %v575_v6 = vsel %vm574_vm3, %v965_v54, %v571_v1 }
 0x1b1   :  { %v545_v5 = vmul.f32 %v533_v4, %v1194_v14  ;;  %v646_v11 = vmul.f32 %v575_v6, %v1198_v17 }
 0x1b2   :  { %v579_v7 = vmul.f32 0.5, %v578_v3 }
 0x1b3   :  { %v553_v8 = vmax.f32 %v545_v5, 0.0  ;;  %v662_v20 = vmul.f32 0.2, %v646_v11  ;;  %vm654_vm7 = vcmp.ge.f32.partialorder %v646_v11, 0.0 }
 0x1b4   :  { %v580_v9 = vsub.f32 1.5, %v579_v7 }
 0x1b5   :  { %v969_v10 = vpop.eup %968  ;;  %v561_v12 = vadd.f32 1e-05, %v553_v8  ;;  %v670_v30 = vsel %vm654_vm7, %v646_v11, %v662_v20 }
 0x1b6   :  { %v581_v13 = vmul.f32 %v967_v63, %v580_v9  ;;  %v587_v15 = vmul.f32 %v969_v10, %v560_v0  ;;  %vm593_vm9 = vweird.f32 %v969_v10 }
 0x1b7   :  { %970 = vrsqrt.f32 %v561_v12  ;;  %vm594_vm11 = vmor %vm592_vm10, %vm593_vm9  ;;  %vm602_vm13 = vweird.f32 %v561_v12 }
 0x1b8   :  { %v585_v16 = vsel %vm584_vm6, %v967_v63, %v581_v13  ;;  %v588_v18 = vmul.f32 %v969_v10, %v587_v15  ;;  %v535_v19 = vpop.xlane.xlu0 %534 }
 0x1b9   :  { %v647_v22 = vmul.f32 %v585_v16, %v1204_v21  ;;  %v546_v23 = vmul.f32 %v535_v19, %v1194_v14 }
 0x1ba   :  { %v589_v25 = vmul.f32 0.5, %v588_v18 }
 0x1bb   :  { %vm655_vm8 = vcmp.ge.f32.partialorder %v647_v22, 0.0  ;;  %v663_v24 = vmul.f32 0.2, %v647_v22  ;;  %v554_v27 = vmax.f32 %v546_v23, 0.0 }
 0x1bc   :  { %v590_v17 = vsub.f32 1.5, %v589_v25 }
 0x1bd   :  { %v971_v28 = vpop.eup %970  ;;  %v671_v31 = vsel %vm655_vm8, %v647_v22, %v663_v24  ;;  %v562_v32 = vadd.f32 1e-05, %v554_v27 }
 0x1be   :  { %v941_v34 = vpack.c.bf16 %v671_v31, %v670_v30  ;;  %v591_v35 = vmul.f32 %v969_v10, %v590_v17  ;;  %v597_v36 = vmul.f32 %v971_v28, %v561_v12  ;;  %vm603_vm12 = vweird.f32 %v971_v28 }
 0x1bf   :  { %972 = vrsqrt.f32 %v562_v32  ;;  %vm604_vm14 = vmor %vm602_vm13, %vm603_vm12  ;;  %vm612_vm2 = vweird.f32 %v562_v32 }
 0x1c0   :  { %942 = vst [vmem:[%s1268_s2] sm:$0xff] %v941_v34   ;;  %v598_v21 = vmul.f32 %v971_v28, %v597_v36  ;;  %v537_v38 = vpop.xlane.xlu1 %536  ;;  %v595_v40 = vsel %vm594_vm11, %v969_v10, %v591_v35 }
 0x1c1   :  { %v547_v39 = vmul.f32 %v537_v38, %v1194_v14  ;;  %v648_v47 = vmul.f32 %v595_v40, %v1209_v26 }
 0x1c2   :  { %v599_v42 = vmul.f32 0.5, %v598_v21 }
 0x1c3   :  { %v555_v43 = vmax.f32 %v547_v39, 0.0  ;;  %v664_v54 = vmul.f32 0.2, %v648_v47  ;;  %vm656_vm15 = vcmp.ge.f32.partialorder %v648_v47, 0.0 }
 0x1c4   :  { %v600_v44 = vsub.f32 1.5, %v599_v42 }
 0x1c5   :  { %v973_v46 = vpop.eup %972  ;;  %v563_v48 = vadd.f32 1e-05, %v555_v43  ;;  %v672_v61 = vsel %vm656_vm15, %v648_v47, %v664_v54 }
 0x1c6   :  { %v601_v49 = vmul.f32 %v971_v28, %v600_v44  ;;  %v607_v50 = vmul.f32 %v973_v46, %v562_v32  ;;  %vm613_vm1 = vweird.f32 %v973_v46 }
 0x1c7   :  { %974 = vrsqrt.f32 %v563_v48  ;;  %vm614_vm3 = vmor %vm612_vm2, %vm613_vm1  ;;  %vm622_vm5 = vweird.f32 %v563_v48 }
 0x1c8   :  { %v605_v51 = vsel %vm604_vm14, %v971_v28, %v601_v49  ;;  %v608_v52 = vmul.f32 %v973_v46, %v607_v50  ;;  %v539_v53 = vpop.xlane.xlu2 %538 }
 0x1c9   :  { %v649_v55 = vmul.f32 %v605_v51, %v1214_v29  ;;  %v548_v56 = vmul.f32 %v539_v53, %v1194_v14 }
 0x1ca   :  { %v609_v57 = vmul.f32 0.5, %v608_v52 }
 0x1cb   :  { %vm657_vm0 = vcmp.ge.f32.partialorder %v649_v55, 0.0  ;;  %v665_v58 = vmul.f32 0.2, %v649_v55  ;;  %v556_v59 = vmax.f32 %v548_v56, 0.0 }
 0x1cc   :  { %v610_v26 = vsub.f32 1.5, %v609_v57 }
 0x1cd   :  { %v975_v60 = vpop.eup %974  ;;  %v673_v62 = vsel %vm657_vm0, %v649_v55, %v665_v58  ;;  %v564_v63 = vadd.f32 1e-05, %v556_v59 }
 0x1ce   :  { %v946_v0 = vpack.c.bf16 %v673_v62, %v672_v61  ;;  %v611_v1 = vmul.f32 %v973_v46, %v610_v26  ;;  %v617_v2 = vmul.f32 %v975_v60, %v563_v48  ;;  %vm623_vm4 = vweird.f32 %v975_v60 }
 0x1cf   :  { %976 = vrsqrt.f32 %v564_v63  ;;  %vm624_vm6 = vmor %vm622_vm5, %vm623_vm4  ;;  %vm632_vm10 = vweird.f32 %v564_v63 }
 0x1d0   :  { %958 = vst [vmem:[%s1268_s2 + $0x8] sm:$0xff] %v946_v0   ;;  %v618_v29 = vmul.f32 %v975_v60, %v617_v2  ;;  %v541_v3 = vpop.xlane.xlu0 %540  ;;  %v615_v5 = vsel %vm614_vm3, %v973_v46, %v611_v1 }
 0x1d1   :  { %v549_v4 = vmul.f32 %v541_v3, %v1194_v14  ;;  %v650_v10 = vmul.f32 %v615_v5, %v1219_v33 }
 0x1d2   :  { %v619_v6 = vmul.f32 0.5, %v618_v29 }
 0x1d3   :  { %v557_v7 = vmax.f32 %v549_v4, 0.0  ;;  %v666_v18 = vmul.f32 0.2, %v650_v10  ;;  %vm658_vm7 = vcmp.ge.f32.partialorder %v650_v10, 0.0 }
 0x1d4   :  { %v620_v8 = vsub.f32 1.5, %v619_v6 }
 0x1d5   :  { %v977_v9 = vpop.eup %976  ;;  %v565_v11 = vadd.f32 1e-05, %v557_v7  ;;  %v674_v25 = vsel %vm658_vm7, %v650_v10, %v666_v18 }
 0x1d6   :  { %v621_v12 = vmul.f32 %v975_v60, %v620_v8  ;;  %v627_v13 = vmul.f32 %v977_v9, %v564_v63  ;;  %vm633_vm9 = vweird.f32 %v977_v9 }
 0x1d7   :  { %978 = vrsqrt.f32 %v565_v11  ;;  %vm634_vm11 = vmor %vm632_vm10, %vm633_vm9  ;;  %vm642_vm13 = vweird.f32 %v565_v11 }
 0x1d8   :  { %v625_v15 = vsel %vm624_vm6, %v975_v60, %v621_v12  ;;  %v628_v16 = vmul.f32 %v977_v9, %v627_v13 }
 0x1d9   :  { %v651_v19 = vmul.f32 %v625_v15, %v1224_v37 }
 0x1da   :  { %v629_v14 = vmul.f32 0.5, %v628_v16 }
 0x1db   :  { %vm659_vm8 = vcmp.ge.f32.partialorder %v651_v19, 0.0  ;;  %v667_v20 = vmul.f32 0.2, %v651_v19 }
 0x1dc   :  { %v630_v22 = vsub.f32 1.5, %v629_v14 }
 0x1dd   :  { %v979_v23 = vpop.eup %978  ;;  %v675_v24 = vsel %vm659_vm8, %v651_v19, %v667_v20 }
 0x1de   :  { %v951_v33 = vpack.c.bf16 %v675_v24, %v674_v25  ;;  %v631_v27 = vmul.f32 %v977_v9, %v630_v22  ;;  %v637_v17 = vmul.f32 %v979_v23, %v565_v11  ;;  %vm643_vm12 = vweird.f32 %v979_v23 }
 0x1df   :  { %vm644_vm14 = vmor %vm642_vm13, %vm643_vm12 }
 0x1e0   :  { %959 = vst [vmem:[%s1268_s2 + $0x10] sm:$0xff] %v951_v33   ;;  %v638_v28 = vmul.f32 %v979_v23, %v637_v17  ;;  %v635_v37 = vsel %vm634_vm11, %v977_v9, %v631_v27 }
 0x1e1   :  { %v652_v32 = vmul.f32 %v635_v37, %v1229_v41 }
 0x1e2   :  { %v639_v30 = vmul.f32 0.5, %v638_v28 }
 0x1e3   :  { %v668_v36 = vmul.f32 0.2, %v652_v32  ;;  %vm660_vm15 = vcmp.ge.f32.partialorder %v652_v32, 0.0 }
 0x1e4   :  { %v640_v31 = vsub.f32 1.5, %v639_v30 }
 0x1e5   :  { %v676_v39 = vsel %vm660_vm15, %v652_v32, %v668_v36 }
 0x1e6   :  { %v641_v34 = vmul.f32 %v979_v23, %v640_v31 }
 0x1e8   :  { %v645_v35 = vsel %vm644_vm14, %v979_v23, %v641_v34 }
 0x1e9   :  { %v653_v21 = vmul.f32 %v645_v35, %v1234_v45 }
 0x1eb   :  { %vm661_vm0 = vcmp.ge.f32.partialorder %v653_v21, 0.0  ;;  %v669_v38 = vmul.f32 0.2, %v653_v21 }
 0x1ed   :  { %v677_v40 = vsel %vm661_vm0, %v653_v21, %v669_v38 }
 0x1ee   :  { %v956_v42 = vpack.c.bf16 %v677_v40, %v676_v39 }
 0x1f0   :  { %960 = vst [vmem:[%s1268_s2 + $0x18] sm:$0xff] %v956_v42  }

// kernel: layered_forward.8
= control target key start
LH: loop header
LB: loop body
LE: loop exit
PB: predicated region body
PF: predicated region fallthrough
CT: control target
= control target key end

     0   :  { %vm1299_vm0 = vcmask 261120   ;;  %vm1739_vm7 = vcmask 257024   ;;  %s3349_s1 = inlined_call_operand.vmem [shape: bf16[1024,32], index: 1, kind: input, shape index: {}]   ;;  %s3350_s0 = inlined_call_operand.vmem [shape: bf16[128,1024], index: 0, kind: input, shape index: {}]   ;;  %s3351_s2 = inlined_call_operand.vmem [shape: bf16[128,32], index: 2, kind: output, shape index: {}]  }
   0x1   :  { %v2343_v0 = vld [vmem:[%s3349_s1 + $0x38] sm:$0xff]  ;;  %v2342_v4 = vld [vmem:[%s3349_s1 + $0x30] sm:$0xff]  ;;  %v2341_v8 = vld [vmem:[%s3349_s1 + $0x28] sm:$0xff] }
   0x2   :  { %v2351_v1 = vld [vmem:[%s3349_s1 + $0x78] sm:$0xff]  ;;  %907 = vmatpush.bf16.msra.mxu0 %v2343_v0  ;;  %v2350_v5 = vld [vmem:[%s3349_s1 + $0x70] sm:$0xff]  ;;  %v2349_v9 = vld [vmem:[%s3349_s1 + $0x68] sm:$0xff] }
   0x3   :  { %v2359_v2 = vld [vmem:[%s3349_s1 + $0xb8] sm:$0xff]  ;;  %956 = vmatpush.bf16.msra.mxu1 %v2351_v1  ;;  %v2358_v6 = vld [vmem:[%s3349_s1 + $0xb0] sm:$0xff]  ;;  %v2357_v10 = vld [vmem:[%s3349_s1 + $0xa8] sm:$0xff] }
   0x4   :  { %v2367_v3 = vld [vmem:[%s3349_s1 + $0xf8] sm:$0xff]  ;;  %1005 = vmatpush.bf16.msra.mxu2 %v2359_v2  ;;  %v2366_v7 = vld [vmem:[%s3349_s1 + $0xf0] sm:$0xff]  ;;  %v2365_v11 = vld [vmem:[%s3349_s1 + $0xe8] sm:$0xff] }
   0x5   :  { %1054 = vmatpush.bf16.msra.mxu3 %v2367_v3  ;;  %v2340_v12 = vld [vmem:[%s3349_s1 + $0x20] sm:$0xff]  ;;  %v2339_v16 = vld [vmem:[%s3349_s1 + $0x18] sm:$0xff]  ;;  %v2338_v20 = vld [vmem:[%s3349_s1 + $0x10] sm:$0xff] }
   0x6   :  { %908 = vmatpush.bf16.msra.mxu0 %v2342_v4  ;;  %v2348_v13 = vld [vmem:[%s3349_s1 + $0x60] sm:$0xff]  ;;  %v2347_v17 = vld [vmem:[%s3349_s1 + $0x58] sm:$0xff]  ;;  %v2346_v21 = vld [vmem:[%s3349_s1 + $0x50] sm:$0xff] }
   0x7   :  { %957 = vmatpush.bf16.msra.mxu1 %v2350_v5  ;;  %v2356_v14 = vld [vmem:[%s3349_s1 + $0xa0] sm:$0xff]  ;;  %v2355_v18 = vld [vmem:[%s3349_s1 + $0x98] sm:$0xff]  ;;  %v2354_v22 = vld [vmem:[%s3349_s1 + $0x90] sm:$0xff] }
   0x8   :  { %1006 = vmatpush.bf16.msra.mxu2 %v2358_v6  ;;  %v2364_v15 = vld [vmem:[%s3349_s1 + $0xe0] sm:$0xff]  ;;  %v2363_v19 = vld [vmem:[%s3349_s1 + $0xd8] sm:$0xff]  ;;  %v2362_v23 = vld [vmem:[%s3349_s1 + $0xd0] sm:$0xff] }
   0x9   :  { %1055 = vmatpush.bf16.msra.mxu3 %v2366_v7  ;;  %v2337_v24 = vld [vmem:[%s3349_s1 + $0x8] sm:$0xff]  ;;  %v2336_v28 = vld [vmem:[%s3349_s1] sm:$0xff]  ;;  %v2391_v40 = vld [vmem:[%s3349_s1 + $0x1b8] sm:$0xff] }
   0xa   :  { %909 = vmatpush.bf16.msra.mxu0 %v2341_v8  ;;  %v2345_v25 = vld [vmem:[%s3349_s1 + $0x48] sm:$0xff]  ;;  %v2344_v29 = vld [vmem:[%s3349_s1 + $0x40] sm:$0xff]  ;;  %v2375_v41 = vld [vmem:[%s3349_s1 + $0x138] sm:$0xff] }
   0xb   :  { %958 = vmatpush.bf16.msra.mxu1 %v2349_v9  ;;  %v2353_v26 = vld [vmem:[%s3349_s1 + $0x88] sm:$0xff]  ;;  %v2352_v30 = vld [vmem:[%s3349_s1 + $0x80] sm:$0xff]  ;;  %v2399_v46 = vld [vmem:[%s3349_s1 + $0x1f8] sm:$0xff] }
   0xc   :  { %1007 = vmatpush.bf16.msra.mxu2 %v2357_v10  ;;  %v2361_v27 = vld [vmem:[%s3349_s1 + $0xc8] sm:$0xff]  ;;  %v2360_v31 = vld [vmem:[%s3349_s1 + $0xc0] sm:$0xff]  ;;  %v2383_v47 = vld [vmem:[%s3349_s1 + $0x178] sm:$0xff] }
   0xd   :  { %1056 = vmatpush.bf16.msra.mxu3 %v2365_v11  ;;  %v1762_v32 = vld [vmem:[%s3350_s0] sm:$0xf]  ;;  %v2272_v34 = vld [vmem:[%s3350_s0 + $0x4] sm:$0xf]  ;;  %v1770_v36 = vld [vmem:[%s3350_s0 + $0x8] sm:$0xf] }
   0xe   :  { %910 = vmatpush.bf16.msra.mxu0 %v2340_v12  ;;  %v2276_v33 = vld [vmem:[%s3350_s0 + $0x1c] sm:$0xf0]  ;;  %v1764_v35 = vld [vmem:[%s3350_s0 + $0x20] sm:$0xf0]  ;;  %v2277_v37 = vld [vmem:[%s3350_s0 + $0x24] sm:$0xf0] }
   0xf   :  { %959 = vmatpush.bf16.msra.mxu1 %v2348_v13  ;;  %v2273_v38 = vld [vmem:[%s3350_s0 + $0xc] sm:$0xf]  ;;  %v1763_v42 = vor.u32 %v2276_v33, %v1762_v32  ;;  %v1767_v43 = vor.u32 %v2272_v34, %v1764_v35  ;;  %v1771_v44 = vor.u32 %v2277_v37, %v1770_v36  ;;  %v2390_v48 = vld [vmem:[%s3349_s1 + $0x1b0] sm:$0xff]  ;;  %v1794_v56 = vld [vmem:[%s3350_s0 + $0x40] sm:$0xf] }
  0x10   :  { %1008 = vmatpush.bf16.msra.mxu2 %v2356_v14  ;;  %v1772_v39 = vld [vmem:[%s3350_s0 + $0x28] sm:$0xf0]  ;;  %v2374_v49 = vld [vmem:[%s3349_s1 + $0x130] sm:$0xff]  ;;  %v2284_v57 = vld [vmem:[%s3350_s0 + $0x5c] sm:$0xf0] }
  0x11   :  { %1057 = vmatpush.bf16.msra.mxu3 %v2364_v15  ;;  %v1775_v45 = vor.u32 %v2273_v38, %v1772_v39  ;;  %v2398_v50 = vld [vmem:[%s3349_s1 + $0x1f0] sm:$0xff]  ;;  %v2389_v52 = vld [vmem:[%s3349_s1 + $0x1a8] sm:$0xff]  ;;  %v2280_v58 = vld [vmem:[%s3350_s0 + $0x44] sm:$0xf]  ;;  %v1795_v0 = vor.u32 %v2284_v57, %v1794_v56 }
  0x12   :  { %911 = vmatpush.bf16.msra.mxu0 %v2339_v16  ;;  %v2382_v51 = vld [vmem:[%s3349_s1 + $0x170] sm:$0xff]  ;;  %v2373_v53 = vld [vmem:[%s3349_s1 + $0x128] sm:$0xff]  ;;  %v1796_v59 = vld [vmem:[%s3350_s0 + $0x60] sm:$0xf0] }
  0x13   :  { %960 = vmatpush.bf16.msra.mxu1 %v2347_v17  ;;  %v2397_v54 = vld [vmem:[%s3349_s1 + $0x1e8] sm:$0xff]  ;;  %v1799_v1 = vor.u32 %v2280_v58, %v1796_v59  ;;  %v2388_v4 = vld [vmem:[%s3349_s1 + $0x1a0] sm:$0xff]  ;;  %v2386_v36 = vld [vmem:[%s3349_s1 + $0x190] sm:$0xff] }
  0x14   :  { %1009 = vmatpush.bf16.msra.mxu2 %v2355_v18  ;;  %v2381_v55 = vld [vmem:[%s3349_s1 + $0x168] sm:$0xff]  ;;  %v2372_v5 = vld [vmem:[%s3349_s1 + $0x120] sm:$0xff]  ;;  %v2370_v37 = vld [vmem:[%s3349_s1 + $0x110] sm:$0xff] }
  0x15   :  { %1058 = vmatpush.bf16.msra.mxu3 %v2363_v19  ;;  %v1802_v60 = vld [vmem:[%s3350_s0 + $0x48] sm:$0xf]  ;;  %v2281_v62 = vld [vmem:[%s3350_s0 + $0x4c] sm:$0xf]  ;;  %v2396_v6 = vld [vmem:[%s3349_s1 + $0x1e0] sm:$0xff] }
  0x16   :  { %912 = vmatpush.bf16.msra.mxu0 %v2338_v20  ;;  %v2285_v61 = vld [vmem:[%s3350_s0 + $0x64] sm:$0xf0]  ;;  %v1804_v63 = vld [vmem:[%s3350_s0 + $0x68] sm:$0xf0]  ;;  %v2380_v7 = vld [vmem:[%s3349_s1 + $0x160] sm:$0xff] }
  0x17   :  { %961 = vmatpush.bf16.msra.mxu1 %v2346_v21  ;;  %v1803_v2 = vor.u32 %v2285_v61, %v1802_v60  ;;  %v1807_v3 = vor.u32 %v2281_v62, %v1804_v63  ;;  %v1826_v8 = vld [vmem:[%s3350_s0 + $0x80] sm:$0xf]  ;;  %v2288_v10 = vld [vmem:[%s3350_s0 + $0x84] sm:$0xf]  ;;  %v1834_v12 = vld [vmem:[%s3350_s0 + $0x88] sm:$0xf] }
  0x18   :  { %1010 = vmatpush.bf16.msra.mxu2 %v2354_v22  ;;  %v2292_v9 = vld [vmem:[%s3350_s0 + $0x9c] sm:$0xf0]  ;;  %v1828_v11 = vld [vmem:[%s3350_s0 + $0xa0] sm:$0xf0]  ;;  %v2293_v13 = vld [vmem:[%s3350_s0 + $0xa4] sm:$0xf0] }
  0x19   :  { %1059 = vmatpush.bf16.msra.mxu3 %v2362_v23  ;;  %v2289_v14 = vld [vmem:[%s3350_s0 + $0x8c] sm:$0xf]  ;;  %v1827_v16 = vor.u32 %v2292_v9, %v1826_v8  ;;  %v1831_v17 = vor.u32 %v2288_v10, %v1828_v11  ;;  %v1835_v18 = vor.u32 %v2293_v13, %v1834_v12  ;;  %v2387_v20 = vld [vmem:[%s3349_s1 + $0x198] sm:$0xff]  ;;  %v2394_v38 = vld [vmem:[%s3349_s1 + $0x1d0] sm:$0xff] }
  0x1a   :  { %913 = vmatpush.bf16.msra.mxu0 %v2337_v24  ;;  %v1836_v15 = vld [vmem:[%s3350_s0 + $0xa8] sm:$0xf0]  ;;  %v2371_v21 = vld [vmem:[%s3349_s1 + $0x118] sm:$0xff]  ;;  %v1858_v24 = vld [vmem:[%s3350_s0 + $0xc0] sm:$0xf] }
  0x1b   :  { %962 = vmatpush.bf16.msra.mxu1 %v2345_v25  ;;  %v1839_v19 = vor.u32 %v2289_v14, %v1836_v15  ;;  %v2395_v22 = vld [vmem:[%s3349_s1 + $0x1d8] sm:$0xff]  ;;  %v2300_v25 = vld [vmem:[%s3350_s0 + $0xdc] sm:$0xf0]  ;;  %v2378_v39 = vld [vmem:[%s3349_s1 + $0x150] sm:$0xff] }
  0x1c   :  { %1011 = vmatpush.bf16.msra.mxu2 %v2353_v26  ;;  %v2379_v23 = vld [vmem:[%s3349_s1 + $0x158] sm:$0xff]  ;;  %v2296_v26 = vld [vmem:[%s3350_s0 + $0xc4] sm:$0xf]  ;;  %v1859_v32 = vor.u32 %v2300_v25, %v1858_v24  ;;  %v1922_v56 = vld [vmem:[%s3350_s0 + $0x140] sm:$0xf] }
  0x1d   :  { %1060 = vmatpush.bf16.msra.mxu3 %v2361_v27  ;;  %v1860_v27 = vld [vmem:[%s3350_s0 + $0xe0] sm:$0xf0]  ;;  %v2316_v57 = vld [vmem:[%s3350_s0 + $0x15c] sm:$0xf0]  ;;  %v1930_v60 = vld [vmem:[%s3350_s0 + $0x148] sm:$0xf] }
  0x1e   :  { %914 = vmatpush.bf16.msra.mxu0 %v2336_v28  ;;  %v1866_v28 = vld [vmem:[%s3350_s0 + $0xc8] sm:$0xf]  ;;  %v1863_v33 = vor.u32 %v2296_v26, %v1860_v27  ;;  %v2312_v58 = vld [vmem:[%s3350_s0 + $0x144] sm:$0xf]  ;;  %v2313_v62 = vld [vmem:[%s3350_s0 + $0x14c] sm:$0xf] }
  0x1f   :  { %963 = vmatpush.bf16.msra.mxu1 %v2344_v29  ;;  %v2301_v29 = vld [vmem:[%s3350_s0 + $0xe4] sm:$0xf0]  ;;  %v1924_v59 = vld [vmem:[%s3350_s0 + $0x160] sm:$0xf0]  ;;  %v1932_v63 = vld [vmem:[%s3350_s0 + $0x168] sm:$0xf0] }
  0x20   :  { %1012 = vmatpush.bf16.msra.mxu2 %v2352_v30  ;;  %v2297_v30 = vld [vmem:[%s3350_s0 + $0xcc] sm:$0xf]  ;;  %v1867_v34 = vor.u32 %v2301_v29, %v1866_v28  ;;  %v2317_v61 = vld [vmem:[%s3350_s0 + $0x164] sm:$0xf0]  ;;  %v1954_v8 = vld [vmem:[%s3350_s0 + $0x180] sm:$0xf] }
  0x21   :  { %1061 = vmatpush.bf16.msra.mxu3 %v2360_v31  ;;  %915 = vmatmul.bf16.vlgmr.msra.gmra.mxu0 %v1763_v42  ;;  %v1868_v31 = vld [vmem:[%s3350_s0 + $0xe8] sm:$0xf0]  ;;  %v2304_v42 = vld [vmem:[%s3350_s0 + $0x104] sm:$0xf]  ;;  %v2324_v9 = vld [vmem:[%s3350_s0 + $0x19c] sm:$0xf0] }
  0x22   :  { %1103 = vmatpush.bf16.msrb.mxu0 %v2375_v41  ;;  %964 = vmatmul.bf16.vlgmr.msra.gmra.mxu1 %v1767_v43  ;;  %v1871_v35 = vor.u32 %v2297_v30, %v1868_v31  ;;  %v2308_v41 = vld [vmem:[%s3350_s0 + $0x11c] sm:$0xf0]  ;;  %v1892_v43 = vld [vmem:[%s3350_s0 + $0x120] sm:$0xf0]  ;;  %v1962_v12 = vld [vmem:[%s3350_s0 + $0x188] sm:$0xf] }
  0x23   :  { %1013 = vmatmul.bf16.vlgmr.msra.gmra.mxu2 %v1771_v44  ;;  %1152 = vmatpush.bf16.msrb.mxu1 %v2383_v47  ;;  %v1898_v44 = vld [vmem:[%s3350_s0 + $0x108] sm:$0xf]  ;;  %v1900_v47 = vld [vmem:[%s3350_s0 + $0x128] sm:$0xf0]  ;;  %v2320_v10 = vld [vmem:[%s3350_s0 + $0x184] sm:$0xf] }
  0x24   :  { %1201 = vmatpush.bf16.msrb.mxu2 %v2391_v40  ;;  %1062 = vmatmul.bf16.vlgmr.msra.gmra.mxu3 %v1775_v45  ;;  %v1890_v40 = vld [vmem:[%s3350_s0 + $0x100] sm:$0xf]  ;;  %v2309_v45 = vld [vmem:[%s3350_s0 + $0x124] sm:$0xf0]  ;;  %v1956_v11 = vld [vmem:[%s3350_s0 + $0x1a0] sm:$0xf0] }
  0x25   :  { %1250 = vmatpush.bf16.msrb.mxu3 %v2399_v46  ;;  %v2305_v46 = vld [vmem:[%s3350_s0 + $0x10c] sm:$0xf]  ;;  %v2325_v13 = vld [vmem:[%s3350_s0 + $0x1a4] sm:$0xf0] }
  0x26   :  { %1104 = vmatpush.bf16.msrb.mxu0 %v2374_v49  ;;  %v1895_v49 = vor.u32 %v2304_v42, %v1892_v43  ;;  %v2321_v14 = vld [vmem:[%s3350_s0 + $0x18c] sm:$0xf]  ;;  %v1994_v24 = vld [vmem:[%s3350_s0 + $0x1c8] sm:$0xf] }
  0x27   :  { %1153 = vmatpush.bf16.msrb.mxu1 %v2382_v51  ;;  %v1903_v51 = vor.u32 %v2305_v46, %v1900_v47  ;;  %v1964_v15 = vld [vmem:[%s3350_s0 + $0x1a8] sm:$0xf0]  ;;  %v2333_v25 = vld [vmem:[%s3350_s0 + $0x1e4] sm:$0xf0] }
  0x28   :  { %1202 = vmatpush.bf16.msrb.mxu2 %v2390_v48  ;;  %v1891_v48 = vor.u32 %v2308_v41, %v1890_v40  ;;  %v2329_v26 = vld [vmem:[%s3350_s0 + $0x1cc] sm:$0xf]  ;;  %v1995_v30 = vor.u32 %v2333_v25, %v1994_v24 }
  0x29   :  { %1251 = vmatpush.bf16.msrb.mxu3 %v2398_v50  ;;  %v1899_v50 = vor.u32 %v2309_v45, %v1898_v44  ;;  %v1996_v27 = vld [vmem:[%s3350_s0 + $0x1e8] sm:$0xf0] }
  0x2a   :  { %1105 = vmatpush.bf16.msrb.mxu0 %v2373_v53  ;;  %v2369_v53 = vld [vmem:[%s3349_s1 + $0x108] sm:$0xff]  ;;  %v1999_v31 = vor.u32 %v2329_v26, %v1996_v27 }
  0x2b   :  { %1154 = vmatpush.bf16.msrb.mxu1 %v2381_v55  ;;  %v2377_v55 = vld [vmem:[%s3349_s1 + $0x148] sm:$0xff] }
  0x2c   :  { %1203 = vmatpush.bf16.msrb.mxu2 %v2389_v52  ;;  %v2385_v52 = vld [vmem:[%s3349_s1 + $0x188] sm:$0xff] }
  0x2d   :  { %1252 = vmatpush.bf16.msrb.mxu3 %v2397_v54  ;;  %v2393_v54 = vld [vmem:[%s3349_s1 + $0x1c8] sm:$0xff] }
  0x2e   :  { %1106 = vmatpush.bf16.msrb.mxu0 %v2372_v5  ;;  %v2368_v5 = vld [vmem:[%s3349_s1 + $0x100] sm:$0xff] }
  0x2f   :  { %1155 = vmatpush.bf16.msrb.mxu1 %v2380_v7  ;;  %v2376_v7 = vld [vmem:[%s3349_s1 + $0x140] sm:$0xff] }
  0x30   :  { %1204 = vmatpush.bf16.msrb.mxu2 %v2388_v4  ;;  %v2384_v4 = vld [vmem:[%s3349_s1 + $0x180] sm:$0xff] }
  0x31   :  { %920 = vmatmul.bf16.gmra.mxu0 %v1795_v0  ;;  %1253 = vmatpush.bf16.msrb.mxu3 %v2396_v6  ;;  %v1923_v0 = vor.u32 %v2316_v57, %v1922_v56  ;;  %v2392_v6 = vld [vmem:[%s3349_s1 + $0x1c0] sm:$0xff]  ;;  %v2282_v56 = vld [vmem:[%s3350_s0 + $0x54] sm:$0xf] }
  0x32   :  { %969 = vmatmul.bf16.gmra.mxu1 %v1799_v1  ;;  %1107 = vmatpush.bf16.msrb.mxu0 %v2371_v21  ;;  %v1927_v1 = vor.u32 %v2312_v58, %v1924_v59  ;;  %v2332_v21 = vld [vmem:[%s3350_s0 + $0x1dc] sm:$0xf0]  ;;  %v1812_v57 = vld [vmem:[%s3350_s0 + $0x70] sm:$0xf0]  ;;  %v1818_v58 = vld [vmem:[%s3350_s0 + $0x58] sm:$0xf] }
  0x33   :  { %1018 = vmatmul.bf16.gmra.mxu2 %v1803_v2  ;;  %1156 = vmatpush.bf16.msrb.mxu1 %v2379_v23  ;;  %v1931_v2 = vor.u32 %v2317_v61, %v1930_v60  ;;  %v1988_v23 = vld [vmem:[%s3350_s0 + $0x1e0] sm:$0xf0]  ;;  %v2287_v59 = vld [vmem:[%s3350_s0 + $0x74] sm:$0xf0]  ;;  %v2283_v60 = vld [vmem:[%s3350_s0 + $0x5c] sm:$0xf] }
  0x34   :  { %1067 = vmatmul.bf16.gmra.mxu3 %v1807_v3  ;;  %1205 = vmatpush.bf16.msrb.mxu2 %v2387_v20  ;;  %v1935_v3 = vor.u32 %v2313_v62, %v1932_v63  ;;  %v1986_v20 = vld [vmem:[%s3350_s0 + $0x1c0] sm:$0xf]  ;;  %v1820_v61 = vld [vmem:[%s3350_s0 + $0x78] sm:$0xf0] }
  0x35   :  { %1254 = vmatpush.bf16.msrb.mxu3 %v2395_v22  ;;  %v2328_v22 = vld [vmem:[%s3350_s0 + $0x1c4] sm:$0xf]  ;;  %v1987_v28 = vor.u32 %v2332_v21, %v1986_v20  ;;  %v1850_v20 = vld [vmem:[%s3350_s0 + $0x98] sm:$0xf] }
  0x36   :  { %1108 = vmatpush.bf16.msrb.mxu0 %v2370_v37  ;;  %v1991_v29 = vor.u32 %v2328_v22, %v1988_v23  ;;  %v2279_v37 = vld [vmem:[%s3350_s0 + $0x34] sm:$0xf0]  ;;  %v2291_v22 = vld [vmem:[%s3350_s0 + $0x9c] sm:$0xf] }
  0x37   :  { %1157 = vmatpush.bf16.msrb.mxu1 %v2378_v39  ;;  %v1788_v39 = vld [vmem:[%s3350_s0 + $0x38] sm:$0xf0]  ;;  %v2295_v21 = vld [vmem:[%s3350_s0 + $0xb4] sm:$0xf0] }
  0x38   :  { %1206 = vmatpush.bf16.msrb.mxu2 %v2386_v36  ;;  %v1786_v36 = vld [vmem:[%s3350_s0 + $0x18] sm:$0xf]  ;;  %v1852_v23 = vld [vmem:[%s3350_s0 + $0xb8] sm:$0xf0] }
  0x39   :  { %1255 = vmatpush.bf16.msrb.mxu3 %v2394_v38  ;;  %v2275_v38 = vld [vmem:[%s3350_s0 + $0x1c] sm:$0xf]  ;;  %v1787_v44 = vor.u32 %v2279_v37, %v1786_v36 }
  0x3a   :  { %1109 = vmatpush.bf16.msrb.mxu0 %v2369_v53  ;;  %v1791_v45 = vor.u32 %v2275_v38, %v1788_v39 }
  0x3b   :  { %1158 = vmatpush.bf16.msrb.mxu1 %v2377_v55  ;;  %v2286_v55 = vld [vmem:[%s3350_s0 + $0x6c] sm:$0xf0] }
  0x3c   :  { %1207 = vmatpush.bf16.msrb.mxu2 %v2385_v52 }
  0x3d   :  { %1256 = vmatpush.bf16.msrb.mxu3 %v2393_v54  ;;  %v1810_v54 = vld [vmem:[%s3350_s0 + $0x50] sm:$0xf] }
  0x3e   :  { %1110 = vmatpush.bf16.msrb.mxu0 %v2368_v5  ;;  %v1819_v5 = vor.u32 %v2287_v59, %v1818_v58 }
  0x3f   :  { %1159 = vmatpush.bf16.msrb.mxu1 %v2376_v7 }
  0x40   :  { %1208 = vmatpush.bf16.msrb.mxu2 %v2384_v4 }
  0x41   :  { %925 = vmatmul.bf16.gmra.mxu0 %v1827_v16  ;;  %1257 = vmatpush.bf16.msrb.mxu3 %v2392_v6  ;;  %v1955_v16 = vor.u32 %v2324_v9, %v1954_v8  ;;  %v1823_v6 = vor.u32 %v2283_v60, %v1820_v61 }
  0x42   :  { %974 = vmatmul.bf16.gmra.mxu1 %v1831_v17  ;;  %v1959_v17 = vor.u32 %v2320_v10, %v1956_v11 }
  0x43   :  { %1023 = vmatmul.bf16.gmra.mxu2 %v1835_v18  ;;  %v1963_v18 = vor.u32 %v2325_v13, %v1962_v12 }
  0x44   :  { %1072 = vmatmul.bf16.gmra.mxu3 %v1839_v19  ;;  %v1967_v19 = vor.u32 %v2321_v14, %v1964_v15 }
  0x51   :  { %930 = vmatmul.bf16.gmra.mxu0 %v1859_v32  ;;  %v1778_v32 = vld [vmem:[%s3350_s0 + $0x10] sm:$0xf] }
  0x52   :  { %979 = vmatmul.bf16.gmra.mxu1 %v1863_v33  ;;  %v2278_v33 = vld [vmem:[%s3350_s0 + $0x2c] sm:$0xf0] }
  0x53   :  { %1028 = vmatmul.bf16.gmra.mxu2 %v1867_v34  ;;  %v2274_v34 = vld [vmem:[%s3350_s0 + $0x14] sm:$0xf]  ;;  %v1779_v40 = vor.u32 %v2278_v33, %v1778_v32  ;;  %v1855_v32 = vor.u32 %v2291_v22, %v1852_v23 }
  0x54   :  { %1077 = vmatmul.bf16.gmra.mxu3 %v1871_v35  ;;  %v1780_v35 = vld [vmem:[%s3350_s0 + $0x30] sm:$0xf0] }
  0x55   :  { %v1783_v41 = vor.u32 %v2274_v34, %v1780_v35 }
  0x61   :  { %935 = vmatmul.bf16.gmra.mxu0 %v1891_v48 }
  0x62   :  { %984 = vmatmul.bf16.gmra.mxu1 %v1895_v49 }
  0x63   :  { %1033 = vmatmul.bf16.gmra.mxu2 %v1899_v50 }
  0x64   :  { %1082 = vmatmul.bf16.gmra.mxu3 %v1903_v51 }
  0x71   :  { %940 = vmatmul.bf16.gmra.mxu0 %v1923_v0  ;;  %v1811_v0 = vor.u32 %v2286_v55, %v1810_v54 }
  0x72   :  { %989 = vmatmul.bf16.gmra.mxu1 %v1927_v1  ;;  %v1815_v1 = vor.u32 %v2282_v56, %v1812_v57 }
  0x73   :  { %1038 = vmatmul.bf16.gmra.mxu2 %v1931_v2 }
  0x74   :  { %1087 = vmatmul.bf16.gmra.mxu3 %v1935_v3 }
  0x81   :  { %945 = vmatmul.bf16.gmra.mxu0 %v1955_v16  ;;  %v1842_v16 = vld [vmem:[%s3350_s0 + $0x90] sm:$0xf] }
  0x82   :  { %994 = vmatmul.bf16.gmra.mxu1 %v1959_v17  ;;  %v2294_v17 = vld [vmem:[%s3350_s0 + $0xac] sm:$0xf0] }
  0x83   :  { %1043 = vmatmul.bf16.gmra.mxu2 %v1963_v18  ;;  %v2290_v18 = vld [vmem:[%s3350_s0 + $0x94] sm:$0xf]  ;;  %v1843_v26 = vor.u32 %v2294_v17, %v1842_v16 }
  0x84   :  { %1092 = vmatmul.bf16.gmra.mxu3 %v1967_v19  ;;  %v1844_v19 = vld [vmem:[%s3350_s0 + $0xb0] sm:$0xf0] }
  0x85   :  { %v1847_v27 = vor.u32 %v2290_v18, %v1844_v19 }
  0x91   :  { %950 = vmatmul.bf16.gmra.mxu0 %v1987_v28 }
  0x92   :  { %999 = vmatmul.bf16.gmra.mxu1 %v1991_v29 }
  0x93   :  { %1048 = vmatmul.bf16.gmra.mxu2 %v1995_v30 }
  0x94   :  { %1097 = vmatmul.bf16.gmra.mxu3 %v1999_v31  ;;  %v1851_v31 = vor.u32 %v2295_v21, %v1850_v20 }
  0x9e   :  { %v916_v42 = vpop.f32.mrf.mxu0 }
  0x9f   :  { %v965_v43 = vpop.f32.mrf.mxu1 }
  0xa0   :  { %v966_v46 = vadd.f32 %v965_v43, %v916_v42  ;;  %v1874_v42 = vld [vmem:[%s3350_s0 + $0xd0] sm:$0xf] }
  0xa1   :  { %1111 = vmatmul.bf16.vlgmr.msrb.gmra.mxu0 %v1779_v40  ;;  %v2302_v43 = vld [vmem:[%s3350_s0 + $0xec] sm:$0xf0] }
  0xa2   :  { %1160 = vmatmul.bf16.vlgmr.msrb.gmra.mxu1 %v1783_v41 }
  0xa3   :  { %1209 = vmatmul.bf16.vlgmr.msrb.gmra.mxu2 %v1787_v44  ;;  %v2298_v44 = vld [vmem:[%s3350_s0 + $0xd4] sm:$0xf] }
  0xa4   :  { %1258 = vmatmul.bf16.vlgmr.msrb.gmra.mxu3 %v1791_v45  ;;  %v1876_v45 = vld [vmem:[%s3350_s0 + $0xf0] sm:$0xf0] }
  0xa5   :  { %v1879_v54 = vor.u32 %v2298_v44, %v1876_v45 }
  0xa6   :  { %v1014_v47 = vpop.f32.mrf.mxu2  ;;  %v918_v50 = vpop.f32.mrf.mxu0 }
  0xa7   :  { %v1063_v48 = vpop.f32.mrf.mxu3  ;;  %v1015_v49 = vadd.f32 %v1014_v47, %v966_v46  ;;  %v967_v51 = vpop.f32.mrf.mxu1  ;;  %v1882_v46 = vld [vmem:[%s3350_s0 + $0xd8] sm:$0xf] }
  0xa8   :  { %v968_v52 = vadd.f32 %v967_v51, %v918_v50  ;;  %v2303_v47 = vld [vmem:[%s3350_s0 + $0xf4] sm:$0xf0] }
  0xa9   :  { %v2859_v53 = vadd.f32 %v1063_v48, %v1015_v49  ;;  %v2299_v48 = vld [vmem:[%s3350_s0 + $0xdc] sm:$0xf]  ;;  %v1883_v58 = vor.u32 %v2303_v47, %v1882_v46 }
  0xaa   :  { %v1884_v49 = vld [vmem:[%s3350_s0 + $0xf8] sm:$0xf0] }
  0xab   :  { %v1887_v59 = vor.u32 %v2299_v48, %v1884_v49 }
  0xae   :  { %v1016_v62 = vpop.f32.mrf.mxu2  ;;  %v921_v3 = vpop.f32.mrf.mxu0 }
  0xaf   :  { %v1065_v63 = vpop.f32.mrf.mxu3  ;;  %v1017_v2 = vadd.f32 %v1016_v62, %v968_v52  ;;  %v970_v4 = vpop.f32.mrf.mxu1  ;;  %v1875_v52 = vor.u32 %v2302_v43, %v1874_v42  ;;  %v1948_v42 = vld [vmem:[%s3350_s0 + $0x178] sm:$0xf0] }
  0xb0   :  { %v971_v7 = vadd.f32 %v970_v4, %v921_v3 }
  0xb1   :  { %v2885_v8 = vadd.f32 %v1065_v63, %v1017_v2  ;;  %1116 = vmatmul.bf16.gmra.mxu0 %v1811_v0 }
  0xb2   :  { %1165 = vmatmul.bf16.gmra.mxu1 %v1815_v1 }
  0xb3   :  { %1214 = vmatmul.bf16.gmra.mxu2 %v1819_v5  ;;  %v1906_v5 = vld [vmem:[%s3350_s0 + $0x110] sm:$0xf] }
  0xb4   :  { %1263 = vmatmul.bf16.gmra.mxu3 %v1823_v6  ;;  %v2310_v6 = vld [vmem:[%s3350_s0 + $0x12c] sm:$0xf0] }
  0xb5   :  { %v1907_v17 = vor.u32 %v2310_v6, %v1906_v5  ;;  %v2327_v5 = vld [vmem:[%s3350_s0 + $0x1b4] sm:$0xf0]  ;;  %v2323_v6 = vld [vmem:[%s3350_s0 + $0x19c] sm:$0xf] }
  0xb6   :  { %v1019_v9 = vpop.f32.mrf.mxu2  ;;  %v923_v12 = vpop.f32.mrf.mxu0 }
  0xb7   :  { %v1068_v10 = vpop.f32.mrf.mxu3  ;;  %v1020_v11 = vadd.f32 %v1019_v9, %v971_v7  ;;  %v972_v13 = vpop.f32.mrf.mxu1  ;;  %v2306_v7 = vld [vmem:[%s3350_s0 + $0x114] sm:$0xf] }
  0xb8   :  { %v973_v14 = vadd.f32 %v972_v13, %v923_v12  ;;  %v1908_v9 = vld [vmem:[%s3350_s0 + $0x130] sm:$0xf0]  ;;  %v2307_v12 = vld [vmem:[%s3350_s0 + $0x11c] sm:$0xf] }
  0xb9   :  { %v2887_v15 = vadd.f32 %v1068_v10, %v1020_v11  ;;  %v1914_v10 = vld [vmem:[%s3350_s0 + $0x118] sm:$0xf]  ;;  %v1916_v13 = vld [vmem:[%s3350_s0 + $0x138] sm:$0xf0]  ;;  %v1911_v18 = vor.u32 %v2306_v7, %v1908_v9 }
  0xba   :  { %v2311_v11 = vld [vmem:[%s3350_s0 + $0x134] sm:$0xf0]  ;;  %v1919_v23 = vor.u32 %v2307_v12, %v1916_v13  ;;  %v1980_v7 = vld [vmem:[%s3350_s0 + $0x1b8] sm:$0xf0] }
  0xbb   :  { %v1915_v22 = vor.u32 %v2311_v11, %v1914_v10 }
  0xbe   :  { %v1021_v24 = vpop.f32.mrf.mxu2  ;;  %v926_v29 = vpop.f32.mrf.mxu0 }
  0xbf   :  { %v1070_v25 = vpop.f32.mrf.mxu3  ;;  %v1022_v28 = vadd.f32 %v1021_v24, %v973_v14  ;;  %v975_v30 = vpop.f32.mrf.mxu1 }
  0xc0   :  { %v976_v33 = vadd.f32 %v975_v30, %v926_v29 }
  0xc1   :  { %v2913_v34 = vadd.f32 %v1070_v25, %v1022_v28  ;;  %1121 = vmatmul.bf16.gmra.mxu0 %v1843_v26 }
  0xc2   :  { %1170 = vmatmul.bf16.gmra.mxu1 %v1847_v27 }
  0xc3   :  { %1219 = vmatmul.bf16.gmra.mxu2 %v1851_v31 }
  0xc4   :  { %1268 = vmatmul.bf16.gmra.mxu3 %v1855_v32 }
  0xc6   :  { %v1024_v35 = vpop.f32.mrf.mxu2  ;;  %v928_v38 = vpop.f32.mrf.mxu0 }
  0xc7   :  { %v1073_v36 = vpop.f32.mrf.mxu3  ;;  %v1025_v37 = vadd.f32 %v1024_v35, %v976_v33  ;;  %v977_v39 = vpop.f32.mrf.mxu1  ;;  %v1938_v33 = vld [vmem:[%s3350_s0 + $0x150] sm:$0xf] }
  0xc8   :  { %v978_v40 = vadd.f32 %v977_v39, %v928_v38  ;;  %v2318_v35 = vld [vmem:[%s3350_s0 + $0x16c] sm:$0xf0]  ;;  %v1946_v38 = vld [vmem:[%s3350_s0 + $0x158] sm:$0xf] }
  0xc9   :  { %v2915_v41 = vadd.f32 %v1073_v36, %v1025_v37  ;;  %v2314_v36 = vld [vmem:[%s3350_s0 + $0x154] sm:$0xf]  ;;  %v2319_v39 = vld [vmem:[%s3350_s0 + $0x174] sm:$0xf0]  ;;  %v1939_v45 = vor.u32 %v2318_v35, %v1938_v33 }
  0xca   :  { %v1940_v37 = vld [vmem:[%s3350_s0 + $0x170] sm:$0xf0]  ;;  %v2010_v35 = vld [vmem:[%s3350_s0 + $0x1d8] sm:$0xf] }
  0xcb   :  { %v1943_v46 = vor.u32 %v2314_v36, %v1940_v37  ;;  %v2004_v33 = vld [vmem:[%s3350_s0 + $0x1f0] sm:$0xf0]  ;;  %v2335_v36 = vld [vmem:[%s3350_s0 + $0x1f4] sm:$0xf0]  ;;  %v2331_v37 = vld [vmem:[%s3350_s0 + $0x1dc] sm:$0xf] }
  0xce   :  { %v1026_v50 = vpop.f32.mrf.mxu2  ;;  %v931_v56 = vpop.f32.mrf.mxu0 }
  0xcf   :  { %v1075_v51 = vpop.f32.mrf.mxu3  ;;  %v1027_v55 = vadd.f32 %v1026_v50, %v978_v40  ;;  %v980_v57 = vpop.f32.mrf.mxu1  ;;  %v2315_v40 = vld [vmem:[%s3350_s0 + $0x15c] sm:$0xf]  ;;  %v1947_v50 = vor.u32 %v2319_v39, %v1946_v38 }
  0xd0   :  { %v981_v60 = vadd.f32 %v980_v57, %v931_v56  ;;  %v2012_v38 = vld [vmem:[%s3350_s0 + $0x1f8] sm:$0xf0] }
  0xd1   :  { %v2941_v61 = vadd.f32 %v1075_v51, %v1027_v55  ;;  %1126 = vmatmul.bf16.gmra.mxu0 %v1875_v52  ;;  %v1951_v51 = vor.u32 %v2315_v40, %v1948_v42 }
  0xd2   :  { %1175 = vmatmul.bf16.gmra.mxu1 %v1879_v54 }
  0xd3   :  { %1224 = vmatmul.bf16.gmra.mxu2 %v1883_v58 }
  0xd4   :  { %1273 = vmatmul.bf16.gmra.mxu3 %v1887_v59 }
  0xd6   :  { %v1029_v62 = vpop.f32.mrf.mxu2  ;;  %v933_v1 = vpop.f32.mrf.mxu0 }
  0xd7   :  { %v1078_v63 = vpop.f32.mrf.mxu3  ;;  %v1030_v0 = vadd.f32 %v1029_v62, %v981_v60  ;;  %v982_v2 = vpop.f32.mrf.mxu1 }
  0xd8   :  { %v983_v3 = vadd.f32 %v982_v2, %v933_v1  ;;  %v2322_v1 = vld [vmem:[%s3350_s0 + $0x194] sm:$0xf] }
  0xd9   :  { %v2943_v4 = vadd.f32 %v1078_v63, %v1030_v0  ;;  %v1970_v63 = vld [vmem:[%s3350_s0 + $0x190] sm:$0xf]  ;;  %v1972_v2 = vld [vmem:[%s3350_s0 + $0x1b0] sm:$0xf0] }
  0xda   :  { %v2326_v0 = vld [vmem:[%s3350_s0 + $0x1ac] sm:$0xf0]  ;;  %v1975_v12 = vor.u32 %v2322_v1, %v1972_v2 }
  0xdb   :  { %v1971_v11 = vor.u32 %v2326_v0, %v1970_v63 }
  0xde   :  { %v1031_v14 = vpop.f32.mrf.mxu2  ;;  %v936_v20 = vpop.f32.mrf.mxu0 }
  0xdf   :  { %v1080_v16 = vpop.f32.mrf.mxu3  ;;  %v1032_v19 = vadd.f32 %v1031_v14, %v983_v3  ;;  %v985_v21 = vpop.f32.mrf.mxu1  ;;  %v1978_v3 = vld [vmem:[%s3350_s0 + $0x198] sm:$0xf] }
  0xe0   :  { %v986_v24 = vadd.f32 %v985_v21, %v936_v20 }
  0xe1   :  { %v2969_v25 = vadd.f32 %v1080_v16, %v1032_v19  ;;  %1131 = vmatmul.bf16.gmra.mxu0 %v1907_v17  ;;  %v1979_v17 = vor.u32 %v2327_v5, %v1978_v3 }
  0xe2   :  { %1180 = vmatmul.bf16.gmra.mxu1 %v1911_v18  ;;  %v1983_v18 = vor.u32 %v2323_v6, %v1980_v7 }
  0xe3   :  { %1229 = vmatmul.bf16.gmra.mxu2 %v1915_v22 }
  0xe4   :  { %1278 = vmatmul.bf16.gmra.mxu3 %v1919_v23 }
  0xe6   :  { %v1034_v26 = vpop.f32.mrf.mxu2  ;;  %v938_v29 = vpop.f32.mrf.mxu0 }
  0xe7   :  { %v1083_v27 = vpop.f32.mrf.mxu3  ;;  %v1035_v28 = vadd.f32 %v1034_v26, %v986_v24  ;;  %v987_v30 = vpop.f32.mrf.mxu1 }
  0xe8   :  { %v988_v31 = vadd.f32 %v987_v30, %v938_v29  ;;  %v2002_v29 = vld [vmem:[%s3350_s0 + $0x1d0] sm:$0xf] }
  0xe9   :  { %v2971_v32 = vadd.f32 %v1083_v27, %v1035_v28  ;;  %v2334_v30 = vld [vmem:[%s3350_s0 + $0x1ec] sm:$0xf0] }
  0xea   :  { %v2003_v42 = vor.u32 %v2334_v30, %v2002_v29 }
  0xee   :  { %v1036_v43 = vpop.f32.mrf.mxu2  ;;  %v941_v48 = vpop.f32.mrf.mxu0 }
  0xef   :  { %v1085_v44 = vpop.f32.mrf.mxu3  ;;  %v1037_v47 = vadd.f32 %v1036_v43, %v988_v31  ;;  %v990_v49 = vpop.f32.mrf.mxu1  ;;  %v2330_v31 = vld [vmem:[%s3350_s0 + $0x1d4] sm:$0xf] }
  0xf0   :  { %v991_v52 = vadd.f32 %v990_v49, %v941_v48  ;;  %v2007_v43 = vor.u32 %v2330_v31, %v2004_v33  ;;  %v2015_v48 = vor.u32 %v2331_v37, %v2012_v38 }
  0xf1   :  { %v2997_v54 = vadd.f32 %v1085_v44, %v1037_v47  ;;  %1136 = vmatmul.bf16.gmra.mxu0 %v1939_v45  ;;  %v2011_v47 = vor.u32 %v2335_v36, %v2010_v35 }
  0xf2   :  { %1185 = vmatmul.bf16.gmra.mxu1 %v1943_v46 }
  0xf3   :  { %1234 = vmatmul.bf16.gmra.mxu2 %v1947_v50 }
  0xf4   :  { %1283 = vmatmul.bf16.gmra.mxu3 %v1951_v51 }
  0xf6   :  { %v1039_v55 = vpop.f32.mrf.mxu2  ;;  %v943_v58 = vpop.f32.mrf.mxu0 }
  0xf7   :  { %v1088_v56 = vpop.f32.mrf.mxu3  ;;  %v1040_v57 = vadd.f32 %v1039_v55, %v991_v52  ;;  %v992_v59 = vpop.f32.mrf.mxu1 }
  0xf8   :  { %v993_v60 = vadd.f32 %v992_v59, %v943_v58 }
  0xf9   :  { %v2999_v62 = vadd.f32 %v1088_v56, %v1040_v57 }
  0xfe   :  { %v1041_v9 = vpop.f32.mrf.mxu2  ;;  %v946_v14 = vpop.f32.mrf.mxu0 }
  0xff   :  { %v1090_v10 = vpop.f32.mrf.mxu3  ;;  %v1042_v13 = vadd.f32 %v1041_v9, %v993_v60  ;;  %v995_v16 = vpop.f32.mrf.mxu1 }
 0x100   :  { %v996_v19 = vadd.f32 %v995_v16, %v946_v14 }
 0x101   :  { %v3025_v20 = vadd.f32 %v1090_v10, %v1042_v13  ;;  %1141 = vmatmul.bf16.gmra.mxu0 %v1971_v11 }
 0x102   :  { %1190 = vmatmul.bf16.gmra.mxu1 %v1975_v12 }
 0x103   :  { %1239 = vmatmul.bf16.gmra.mxu2 %v1979_v17 }
 0x104   :  { %1288 = vmatmul.bf16.gmra.mxu3 %v1983_v18 }
 0x106   :  { %v1044_v21 = vpop.f32.mrf.mxu2  ;;  %v948_v24 = vpop.f32.mrf.mxu0 }
 0x107   :  { %v1093_v22 = vpop.f32.mrf.mxu3  ;;  %v1045_v23 = vadd.f32 %v1044_v21, %v996_v19  ;;  %v997_v26 = vpop.f32.mrf.mxu1 }
 0x108   :  { %v998_v27 = vadd.f32 %v997_v26, %v948_v24 }
 0x109   :  { %v3027_v28 = vadd.f32 %v1093_v22, %v1045_v23 }
 0x10e   :  { %v1046_v39 = vpop.f32.mrf.mxu2  ;;  %v951_v45 = vpop.f32.mrf.mxu0 }
 0x10f   :  { %v1095_v40 = vpop.f32.mrf.mxu3  ;;  %v1047_v44 = vadd.f32 %v1046_v39, %v998_v27  ;;  %v1000_v46 = vpop.f32.mrf.mxu1 }
 0x110   :  { %v1001_v49 = vadd.f32 %v1000_v46, %v951_v45 }
 0x111   :  { %v3053_v50 = vadd.f32 %v1095_v40, %v1047_v44  ;;  %1146 = vmatmul.bf16.gmra.mxu0 %v2003_v42 }
 0x112   :  { %1195 = vmatmul.bf16.gmra.mxu1 %v2007_v43 }
 0x113   :  { %1244 = vmatmul.bf16.gmra.mxu2 %v2011_v47 }
 0x114   :  { %1293 = vmatmul.bf16.gmra.mxu3 %v2015_v48 }
 0x116   :  { %v1049_v51 = vpop.f32.mrf.mxu2  ;;  %v953_v56 = vpop.f32.mrf.mxu0 }
 0x117   :  { %v1098_v52 = vpop.f32.mrf.mxu3  ;;  %v1050_v55 = vadd.f32 %v1049_v51, %v1001_v49  ;;  %v1002_v57 = vpop.f32.mrf.mxu1 }
 0x118   :  { %v1003_v58 = vadd.f32 %v1002_v57, %v953_v56 }
 0x119   :  { %v3055_v59 = vadd.f32 %v1098_v52, %v1050_v55 }
 0x11e   :  { %v1051_v60 = vpop.f32.mrf.mxu2  ;;  %v1112_v1 = vpop.f32.mrf.mxu0 }
 0x11f   :  { %v1100_v63 = vpop.f32.mrf.mxu3  ;;  %v1052_v0 = vadd.f32 %v1051_v60, %v1003_v58  ;;  %v1161_v2 = vpop.f32.mrf.mxu1  ;;  %v1113_v5 = vadd.f32 %v1112_v1, %v2859_v53 }
 0x121   :  { %v3057_v3 = vadd.f32 %v1100_v63, %v1052_v0  ;;  %v1162_v6 = vadd.f32 %v1161_v2, %v1113_v5 }
 0x126   :  { %v1210_v7 = vpop.f32.mrf.mxu2  ;;  %v1114_v11 = vpop.f32.mrf.mxu0 }
 0x127   :  { %v1259_v9 = vpop.f32.mrf.mxu3  ;;  %v1211_v10 = vadd.f32 %v1210_v7, %v1162_v6  ;;  %v1163_v12 = vpop.f32.mrf.mxu1  ;;  %v1115_v14 = vadd.f32 %v1114_v11, %v2885_v8 }
 0x129   :  { %v3060_v13 = vadd.f32 %v1259_v9, %v1211_v10  ;;  %v1164_v17 = vadd.f32 %v1163_v12, %v1115_v14 }
 0x12b   :  { %v1300_v16 = vsel %vm1299_vm0, %v3060_v13, 0.0 }
 0x12c   :  { %1301 = vadd.xlane.f32.xlu0 %v1300_v16 }
 0x12e   :  { %v1212_v18 = vpop.f32.mrf.mxu2  ;;  %v1117_v53 = vpop.f32.mrf.mxu0 }
 0x12f   :  { %v1261_v19 = vpop.f32.mrf.mxu3  ;;  %v1213_v21 = vadd.f32 %v1212_v18, %v1164_v17  ;;  %v1166_v22 = vpop.f32.mrf.mxu1  ;;  %v1118_v24 = vadd.f32 %v1117_v53, %v2887_v15 }
 0x131   :  { %v3065_v23 = vadd.f32 %v1261_v19, %v1213_v21  ;;  %v1167_v27 = vadd.f32 %v1166_v22, %v1118_v24 }
 0x133   :  { %v1303_v26 = vsel %vm1299_vm0, %v3065_v23, 0.0 }
 0x134   :  { %1304 = vadd.xlane.f32.xlu0 %v1303_v26 }
 0x136   :  { %v1215_v8 = vpop.f32.mrf.mxu2  ;;  %v1119_v31 = vpop.f32.mrf.mxu0 }
 0x137   :  { %v1264_v29 = vpop.f32.mrf.mxu3  ;;  %v1216_v30 = vadd.f32 %v1215_v8, %v1167_v27  ;;  %v1168_v33 = vpop.f32.mrf.mxu1  ;;  %v1120_v36 = vadd.f32 %v1119_v31, %v2913_v34 }
 0x139   :  { %v3070_v35 = vadd.f32 %v1264_v29, %v1216_v30  ;;  %v1169_v38 = vadd.f32 %v1168_v33, %v1120_v36 }
 0x13b   :  { %v1306_v37 = vsel %vm1299_vm0, %v3070_v35, 0.0 }
 0x13c   :  { %1307 = vadd.xlane.f32.xlu1 %v1306_v37 }
 0x13e   :  { %v1217_v15 = vpop.f32.mrf.mxu2  ;;  %v1122_v42 = vpop.f32.mrf.mxu0 }
 0x13f   :  { %v1266_v39 = vpop.f32.mrf.mxu3  ;;  %v1218_v40 = vadd.f32 %v1217_v15, %v1169_v38  ;;  %v1171_v43 = vpop.f32.mrf.mxu1  ;;  %v1123_v45 = vadd.f32 %v1122_v42, %v2915_v41 }
 0x141   :  { %v3075_v44 = vadd.f32 %v1266_v39, %v1218_v40  ;;  %v1172_v47 = vadd.f32 %v1171_v43, %v1123_v45 }
 0x143   :  { %v1309_v46 = vsel %vm1299_vm0, %v3075_v44, 0.0 }
 0x144   :  { %1310 = vadd.xlane.f32.xlu1 %v1309_v46 }
 0x146   :  { %v1220_v34 = vpop.f32.mrf.mxu2  ;;  %v1124_v51 = vpop.f32.mrf.mxu0 }
 0x147   :  { %v1269_v48 = vpop.f32.mrf.mxu3  ;;  %v1221_v49 = vadd.f32 %v1220_v34, %v1172_v47  ;;  %v1173_v52 = vpop.f32.mrf.mxu1  ;;  %v1125_v56 = vadd.f32 %v1124_v51, %v2941_v61 }
 0x149   :  { %v3080_v55 = vadd.f32 %v1269_v48, %v1221_v49  ;;  %v1174_v58 = vadd.f32 %v1173_v52, %v1125_v56 }
 0x14b   :  { %v1312_v57 = vsel %vm1299_vm0, %v3080_v55, 0.0 }
 0x14c   :  { %1313 = vadd.xlane.f32.xlu2 %v1312_v57 }
 0x14e   :  { %v1222_v41 = vpop.f32.mrf.mxu2  ;;  %v1127_v0 = vpop.f32.mrf.mxu0 }
 0x14f   :  { %v1271_v60 = vpop.f32.mrf.mxu3  ;;  %v1223_v63 = vadd.f32 %v1222_v41, %v1174_v58  ;;  %v1176_v1 = vpop.f32.mrf.mxu1  ;;  %v1128_v5 = vadd.f32 %v1127_v0, %v2943_v4 }
 0x151   :  { %v3085_v2 = vadd.f32 %v1271_v60, %v1223_v63  ;;  %v1177_v7 = vadd.f32 %v1176_v1, %v1128_v5 }
 0x153   :  { %v1315_v6 = vsel %vm1299_vm0, %v3085_v2, 0.0 }
 0x154   :  { %1316 = vadd.xlane.f32.xlu2 %v1315_v6 }
 0x156   :  { %v1225_v61 = vpop.f32.mrf.mxu2  ;;  %v1129_v11 = vpop.f32.mrf.mxu0 }
 0x157   :  { %v1274_v9 = vpop.f32.mrf.mxu3  ;;  %v1226_v10 = vadd.f32 %v1225_v61, %v1177_v7  ;;  %v1178_v12 = vpop.f32.mrf.mxu1  ;;  %v1130_v16 = vadd.f32 %v1129_v11, %v2969_v25  ;;  %v2435_v61 = vmov 32.0  }
 0x158   :  { %2401 = vrcp.f32 %v2435_v61 }
 0x159   :  { %v3090_v14 = vadd.f32 %v1274_v9, %v1226_v10  ;;  %v1179_v18 = vadd.f32 %v1178_v12, %v1130_v16 }
 0x15b   :  { %v1318_v17 = vsel %vm1299_vm0, %v3090_v14, 0.0 }
 0x15c   :  { %1319 = vadd.xlane.f32.xlu0 %v1318_v17 }
 0x15e   :  { %v1227_v4 = vpop.f32.mrf.mxu2  ;;  %v1132_v53 = vpop.f32.mrf.mxu0 }
 0x15f   :  { %v1276_v19 = vpop.f32.mrf.mxu3  ;;  %v1228_v21 = vadd.f32 %v1227_v4, %v1179_v18  ;;  %v1181_v22 = vpop.f32.mrf.mxu1  ;;  %v1133_v26 = vadd.f32 %v1132_v53, %v2971_v32 }
 0x160   :  { %v2402_v4 = vpop.eup %2401 }
 0x161   :  { %v3095_v24 = vadd.f32 %v1276_v19, %v1228_v21  ;;  %v1182_v8 = vadd.f32 %v1181_v22, %v1133_v26  ;;  %v1349_v21 = vmul.f32 32.0, %v2402_v4  ;;  %vm1353_vm1 = vweird.f32 %v2402_v4 }
 0x163   :  { %v1321_v27 = vsel %vm1299_vm0, %v3095_v24, 0.0 }
 0x164   :  { %1322 = vadd.xlane.f32.xlu1 %v1321_v27 }
 0x166   :  { %v1230_v25 = vpop.f32.mrf.mxu2  ;;  %v1134_v31 = vpop.f32.mrf.mxu0 }
 0x167   :  { %v1279_v29 = vpop.f32.mrf.mxu3  ;;  %v1231_v30 = vadd.f32 %v1230_v25, %v1182_v8  ;;  %v1183_v33 = vpop.f32.mrf.mxu1  ;;  %v1135_v37 = vadd.f32 %v1134_v31, %v2997_v54 }
 0x169   :  { %v3100_v36 = vadd.f32 %v1279_v29, %v1231_v30  ;;  %v1184_v15 = vadd.f32 %v1183_v33, %v1135_v37  ;;  %v1350_v29 = vsub.f32 1.0, %v1349_v21 }
 0x16b   :  { %v1324_v38 = vsel %vm1299_vm0, %v3100_v36, 0.0  ;;  %v1351_v33 = vmul.f32 %v2402_v4, %v1350_v29 }
 0x16c   :  { %1325 = vadd.xlane.f32.xlu2 %v1324_v38 }
 0x16e   :  { %v1232_v32 = vpop.f32.mrf.mxu2  ;;  %v1137_v42 = vpop.f32.mrf.mxu0 }
 0x16f   :  { %v1281_v39 = vpop.f32.mrf.mxu3  ;;  %v1233_v40 = vadd.f32 %v1232_v32, %v1184_v15  ;;  %v1186_v43 = vpop.f32.mrf.mxu1  ;;  %v1138_v46 = vadd.f32 %v1137_v42, %v2999_v62  ;;  %v1352_v42 = vadd.f32 %v2402_v4, %v1351_v33 }
 0x171   :  { %v3105_v45 = vadd.f32 %v1281_v39, %v1233_v40  ;;  %v1187_v34 = vadd.f32 %v1186_v43, %v1138_v46 }
 0x173   :  { %v1327_v47 = vsel %vm1299_vm0, %v3105_v45, 0.0 }
 0x174   :  { %1328 = vadd.xlane.f32.xlu0 %v1327_v47  ;;  %v3135_v47 = vsel %vm1353_vm1, %v2402_v4, %v1352_v42 }
 0x176   :  { %v1235_v54 = vpop.f32.mrf.mxu2  ;;  %v1139_v51 = vpop.f32.mrf.mxu0 }
 0x177   :  { %v1284_v48 = vpop.f32.mrf.mxu3  ;;  %v1236_v49 = vadd.f32 %v1235_v54, %v1187_v34  ;;  %v1188_v52 = vpop.f32.mrf.mxu1  ;;  %v1140_v57 = vadd.f32 %v1139_v51, %v3025_v20 }
 0x179   :  { %v3110_v56 = vadd.f32 %v1284_v48, %v1236_v49  ;;  %v1189_v41 = vadd.f32 %v1188_v52, %v1140_v57 }
 0x17b   :  { %v1330_v58 = vsel %vm1299_vm0, %v3110_v56, 0.0 }
 0x17c   :  { %1331 = vadd.xlane.f32.xlu1 %v1330_v58 }
 0x17e   :  { %v1237_v62 = vpop.f32.mrf.mxu2  ;;  %v1142_v0 = vpop.f32.mrf.mxu0 }
 0x17f   :  { %v1286_v60 = vpop.f32.mrf.mxu3  ;;  %v1238_v63 = vadd.f32 %v1237_v62, %v1189_v41  ;;  %v1191_v1 = vpop.f32.mrf.mxu1  ;;  %v1143_v6 = vadd.f32 %v1142_v0, %v3027_v28 }
 0x181   :  { %v3115_v5 = vadd.f32 %v1286_v60, %v1238_v63  ;;  %v1192_v20 = vadd.f32 %v1191_v1, %v1143_v6 }
 0x183   :  { %v1333_v7 = vsel %vm1299_vm0, %v3115_v5, 0.0 }
 0x184   :  { %1334 = vadd.xlane.f32.xlu2 %v1333_v7 }
 0x186   :  { %v1240_v9 = vpop.f32.mrf.mxu2  ;;  %v1144_v12 = vpop.f32.mrf.mxu0 }
 0x187   :  { %v1289_v10 = vpop.f32.mrf.mxu3  ;;  %v1241_v11 = vadd.f32 %v1240_v9, %v1192_v20  ;;  %v1193_v16 = vpop.f32.mrf.mxu1  ;;  %v1145_v18 = vadd.f32 %v1144_v12, %v3053_v50 }
 0x189   :  { %v3120_v17 = vadd.f32 %v1289_v10, %v1241_v11  ;;  %v1194_v19 = vadd.f32 %v1193_v16, %v1145_v18 }
 0x18b   :  { %v1336_v28 = vsel %vm1299_vm0, %v3120_v17, 0.0 }
 0x18c   :  { %1337 = vadd.xlane.f32.xlu0 %v1336_v28 }
 0x18e   :  { %v1242_v53 = vpop.f32.mrf.mxu2  ;;  %v1147_v27 = vpop.f32.mrf.mxu0 }
 0x18f   :  { %v1291_v22 = vpop.f32.mrf.mxu3  ;;  %v1243_v26 = vadd.f32 %v1242_v53, %v1194_v19  ;;  %v1148_v25 = vadd.f32 %v1147_v27, %v3055_v59  ;;  %v1196_v30 = vpop.f32.mrf.mxu1 }
 0x191   :  { %v3125_v8 = vadd.f32 %v1291_v22, %v1243_v26  ;;  %v1197_v31 = vadd.f32 %v1196_v30, %v1148_v25 }
 0x193   :  { %v1339_v50 = vsel %vm1299_vm0, %v3125_v8, 0.0 }
 0x194   :  { %1340 = vadd.xlane.f32.xlu1 %v1339_v50 }
 0x196   :  { %v1245_v37 = vpop.f32.mrf.mxu2  ;;  %v1149_v32 = vpop.f32.mrf.mxu0 }
 0x197   :  { %v1294_v38 = vpop.f32.mrf.mxu3  ;;  %v1246_v15 = vadd.f32 %v1245_v37, %v1197_v31  ;;  %v1150_v40 = vadd.f32 %v1149_v32, %v3057_v3  ;;  %v1198_v43 = vpop.f32.mrf.mxu1 }
 0x199   :  { %v3130_v39 = vadd.f32 %v1294_v38, %v1246_v15  ;;  %v1199_v46 = vadd.f32 %v1198_v43, %v1150_v40 }
 0x19b   :  { %v1342_v59 = vsel %vm1299_vm0, %v3130_v39, 0.0 }
 0x19c   :  { %1343 = vadd.xlane.f32.xlu2 %v1342_v59 }
 0x19e   :  { %v1247_v34 = vpop.f32.mrf.mxu2 }
 0x19f   :  { %v1248_v54 = vadd.f32 %v1247_v34, %v1199_v46  ;;  %v1302_v48 = vpop.xlane.xlu0 %1301  ;;  %v1296_v49 = vpop.f32.mrf.mxu3 }
 0x1a0   :  { %v1355_v51 = vmul.f32 %v3135_v47, %v1302_v48 }
 0x1a1   :  { %v3138_v52 = vadd.f32 %v1296_v49, %v1248_v54 }
 0x1a2   :  { %v3141_v3 = vsub.f32 %v3060_v13, %v1355_v51 }
 0x1a3   :  { %v1345_v57 = vsel %vm1299_vm0, %v3138_v52, 0.0 }
 0x1a4   :  { %1346 = vadd.xlane.f32.xlu0 %v1345_v57  ;;  %v1387_v58 = vmul.f32 %v3141_v3, %v3141_v3 }
 0x1a6   :  { %v1403_v41 = vsel %vm1299_vm0, %v1387_v58, 0.0 }
 0x1a7   :  { %1404 = vadd.xlane.f32.xlu1 %v1403_v41  ;;  %v1305_v62 = vpop.xlane.xlu0 %1304 }
 0x1a8   :  { %v1356_v60 = vmul.f32 %v3135_v47, %v1305_v62 }
 0x1aa   :  { %v3150_v63 = vsub.f32 %v3065_v23, %v1356_v60 }
 0x1ac   :  { %v1388_v13 = vmul.f32 %v3150_v63, %v3150_v63 }
 0x1ae   :  { %v1406_v0 = vsel %vm1299_vm0, %v1388_v13, 0.0 }
 0x1af   :  { %v1308_v1 = vpop.xlane.xlu1 %1307  ;;  %1407 = vadd.xlane.f32.xlu2 %v1406_v0 }
 0x1b0   :  { %v1357_v6 = vmul.f32 %v3135_v47, %v1308_v1 }
 0x1b2   :  { %v3157_v7 = vsub.f32 %v3070_v35, %v1357_v6 }
 0x1b4   :  { %v1389_v61 = vmul.f32 %v3157_v7, %v3157_v7 }
 0x1b6   :  { %v1409_v20 = vsel %vm1299_vm0, %v1389_v61, 0.0 }
 0x1b7   :  { %v1311_v9 = vpop.xlane.xlu1 %1310  ;;  %1410 = vadd.xlane.f32.xlu0 %v1409_v20 }
 0x1b8   :  { %v1358_v23 = vmul.f32 %v3135_v47, %v1311_v9 }
 0x1ba   :  { %v3164_v10 = vsub.f32 %v3075_v44, %v1358_v23 }
 0x1bc   :  { %v1390_v11 = vmul.f32 %v3164_v10, %v3164_v10 }
 0x1be   :  { %v1412_v12 = vsel %vm1299_vm0, %v1390_v11, 0.0 }
 0x1bf   :  { %v1314_v16 = vpop.xlane.xlu2 %1313  ;;  %1413 = vadd.xlane.f32.xlu1 %v1412_v12 }
 0x1c0   :  { %v1359_v35 = vmul.f32 %v3135_v47, %v1314_v16 }
 0x1c2   :  { %v3171_v18 = vsub.f32 %v3080_v55, %v1359_v35 }
 0x1c4   :  { %v1391_v4 = vmul.f32 %v3171_v18, %v3171_v18 }
 0x1c6   :  { %v1415_v28 = vsel %vm1299_vm0, %v1391_v4, 0.0 }
 0x1c7   :  { %v1317_v19 = vpop.xlane.xlu2 %1316  ;;  %1416 = vadd.xlane.f32.xlu2 %v1415_v28 }
 0x1c8   :  { %v1360_v44 = vmul.f32 %v3135_v47, %v1317_v19 }
 0x1ca   :  { %v3178_v21 = vsub.f32 %v3085_v2, %v1360_v44 }
 0x1cc   :  { %v1392_v53 = vmul.f32 %v3178_v21, %v3178_v21 }
 0x1ce   :  { %v1418_v22 = vsel %vm1299_vm0, %v1392_v53, 0.0 }
 0x1cf   :  { %1419 = vadd.xlane.f32.xlu0 %v1418_v22  ;;  %v1320_v55 = vpop.xlane.xlu0 %1319 }
 0x1d0   :  { %v1361_v26 = vmul.f32 %v3135_v47, %v1320_v55 }
 0x1d2   :  { %v3185_v27 = vsub.f32 %v3090_v14, %v1361_v26 }
 0x1d4   :  { %v1393_v25 = vmul.f32 %v3185_v27, %v3185_v27 }
 0x1d6   :  { %v1421_v29 = vsel %vm1299_vm0, %v1393_v25, 0.0 }
 0x1d7   :  { %v1323_v30 = vpop.xlane.xlu1 %1322  ;;  %1422 = vadd.xlane.f32.xlu1 %v1421_v29 }
 0x1d8   :  { %v1362_v2 = vmul.f32 %v3135_v47, %v1323_v30 }
 0x1da   :  { %v3192_v50 = vsub.f32 %v3095_v24, %v1362_v2 }
 0x1dc   :  { %v1394_v31 = vmul.f32 %v3192_v50, %v3192_v50 }
 0x1de   :  { %v1424_v33 = vsel %vm1299_vm0, %v1394_v31, 0.0 }
 0x1df   :  { %v1326_v37 = vpop.xlane.xlu2 %1325  ;;  %1425 = vadd.xlane.f32.xlu2 %v1424_v33 }
 0x1e0   :  { %v1363_v14 = vmul.f32 %v3135_v47, %v1326_v37 }
 0x1e2   :  { %v3199_v38 = vsub.f32 %v3100_v36, %v1363_v14 }
 0x1e4   :  { %v1395_v15 = vmul.f32 %v3199_v38, %v3199_v38 }
 0x1e6   :  { %v1427_v32 = vsel %vm1299_vm0, %v1395_v15, 0.0 }
 0x1e7   :  { %1428 = vadd.xlane.f32.xlu0 %v1427_v32  ;;  %v1329_v24 = vpop.xlane.xlu0 %1328 }
 0x1e8   :  { %v1364_v40 = vmul.f32 %v3135_v47, %v1329_v24 }
 0x1ea   :  { %v3206_v42 = vsub.f32 %v3105_v45, %v1364_v40 }
 0x1ec   :  { %v1396_v59 = vmul.f32 %v3206_v42, %v3206_v42 }
 0x1ee   :  { %v1430_v43 = vsel %vm1299_vm0, %v1396_v59, 0.0 }
 0x1ef   :  { %v1332_v46 = vpop.xlane.xlu1 %1331  ;;  %1431 = vadd.xlane.f32.xlu1 %v1430_v43 }
 0x1f0   :  { %v1365_v36 = vmul.f32 %v3135_v47, %v1332_v46 }
 0x1f2   :  { %v3213_v34 = vsub.f32 %v3110_v56, %v1365_v36 }
 0x1f4   :  { %v1397_v54 = vmul.f32 %v3213_v34, %v3213_v34 }
 0x1f6   :  { %v1433_v48 = vsel %vm1299_vm0, %v1397_v54, 0.0 }
 0x1f7   :  { %v1335_v49 = vpop.xlane.xlu2 %1334  ;;  %1434 = vadd.xlane.f32.xlu2 %v1433_v48 }
 0x1f8   :  { %v1366_v45 = vmul.f32 %v3135_v47, %v1335_v49 }
 0x1fa   :  { %v3220_v51 = vsub.f32 %v3115_v5, %v1366_v45 }
 0x1fc   :  { %v1398_v57 = vmul.f32 %v3220_v51, %v3220_v51 }
 0x1fe   :  { %v1436_v58 = vsel %vm1299_vm0, %v1398_v57, 0.0 }
 0x1ff   :  { %1437 = vadd.xlane.f32.xlu0 %v1436_v58  ;;  %v1338_v56 = vpop.xlane.xlu0 %1337 }
 0x200   :  { %v1367_v41 = vmul.f32 %v3135_v47, %v1338_v56 }
 0x202   :  { %v3227_v62 = vsub.f32 %v3120_v17, %v1367_v41 }
 0x204   :  { %v1399_v60 = vmul.f32 %v3227_v62, %v3227_v62 }
 0x206   :  { %v1439_v13 = vsel %vm1299_vm0, %v1399_v60, 0.0 }
 0x207   :  { %v1341_v0 = vpop.xlane.xlu1 %1340  ;;  %1440 = vadd.xlane.f32.xlu1 %v1439_v13 }
 0x208   :  { %v1368_v5 = vmul.f32 %v3135_v47, %v1341_v0 }
 0x20a   :  { %v3234_v1 = vsub.f32 %v3125_v8, %v1368_v5 }
 0x20c   :  { %v1400_v6 = vmul.f32 %v3234_v1, %v3234_v1 }
 0x20e   :  { %v1442_v61 = vsel %vm1299_vm0, %v1400_v6, 0.0 }
 0x20f   :  { %v1344_v20 = vpop.xlane.xlu2 %1343  ;;  %1443 = vadd.xlane.f32.xlu2 %v1442_v61 }
 0x210   :  { %v1369_v17 = vmul.f32 %v3135_v47, %v1344_v20 }
 0x212   :  { %v3241_v9 = vsub.f32 %v3130_v39, %v1369_v17 }
 0x214   :  { %v1401_v23 = vmul.f32 %v3241_v9, %v3241_v9 }
 0x216   :  { %v1445_v11 = vsel %vm1299_vm0, %v1401_v23, 0.0 }
 0x217   :  { %1446 = vadd.xlane.f32.xlu0 %v1445_v11  ;;  %v1347_v8 = vpop.xlane.xlu0 %1346 }
 0x218   :  { %v1370_v12 = vmul.f32 %v3135_v47, %v1347_v8 }
 0x21a   :  { %v3248_v16 = vsub.f32 %v3138_v52, %v1370_v12  ;;  %v1405_v35 = vpop.xlane.xlu1 %1404 }
 0x21b   :  { %v1451_v4 = vmul.f32 %v1405_v35, %v3135_v47 }
 0x21c   :  { %v1402_v28 = vmul.f32 %v3248_v16, %v3248_v16 }
 0x21d   :  { %v1467_v39 = vmax.f32 %v1451_v4, 0.0 }
 0x21e   :  { %v1448_v19 = vsel %vm1299_vm0, %v1402_v28, 0.0 }
 0x21f   :  { %v1483_v44 = vadd.f32 1e-05, %v1467_v39  ;;  %1449 = vadd.xlane.f32.xlu1 %v1448_v19 }
 0x221   :  { %2403 = vrsqrt.f32 %v1483_v44  ;;  %vm1505_vm3 = vweird.f32 %v1483_v44 }
 0x222   :  { %v1408_v53 = vpop.xlane.xlu2 %1407 }
 0x223   :  { %v1452_v22 = vmul.f32 %v1408_v53, %v3135_v47 }
 0x225   :  { %v1468_v55 = vmax.f32 %v1452_v22, 0.0 }
 0x227   :  { %v2404_v26 = vpop.eup %2403  ;;  %v1484_v25 = vadd.f32 1e-05, %v1468_v55 }
 0x228   :  { %v1500_v52 = vmul.f32 %v2404_v26, %v1483_v44  ;;  %vm1506_vm2 = vweird.f32 %v2404_v26 }
 0x229   :  { %2405 = vrsqrt.f32 %v1484_v25  ;;  %vm1507_vm4 = vmor %vm1505_vm3, %vm1506_vm2  ;;  %vm1515_vm8 = vweird.f32 %v1484_v25 }
 0x22a   :  { %v1501_v29 = vmul.f32 %v2404_v26, %v1500_v52  ;;  %v1411_v30 = vpop.xlane.xlu0 %1410 }
 0x22b   :  { %v1453_v2 = vmul.f32 %v1411_v30, %v3135_v47 }
 0x22c   :  { %v1502_v31 = vmul.f32 0.5, %v1501_v29 }
 0x22d   :  { %v1469_v33 = vmax.f32 %v1453_v2, 0.0 }
 0x22e   :  { %v1503_v37 = vsub.f32 1.5, %v1502_v31 }
 0x22f   :  { %v2406_v14 = vpop.eup %2405  ;;  %v1485_v15 = vadd.f32 1e-05, %v1469_v33 }
 0x230   :  { %v1504_v32 = vmul.f32 %v2404_v26, %v1503_v37  ;;  %v1510_v24 = vmul.f32 %v2406_v14, %v1484_v25  ;;  %vm1516_vm6 = vweird.f32 %v2406_v14 }
 0x231   :  { %2407 = vrsqrt.f32 %v1485_v15  ;;  %vm1517_vm9 = vmor %vm1515_vm8, %vm1516_vm6  ;;  %vm1525_vm12 = vweird.f32 %v1485_v15 }
 0x232   :  { %v1508_v40 = vsel %vm1507_vm4, %v2404_v26, %v1504_v32  ;;  %v1511_v59 = vmul.f32 %v2406_v14, %v1510_v24  ;;  %v1414_v43 = vpop.xlane.xlu1 %1413 }
 0x233   :  { %v1659_v46 = vmul.f32 %v1508_v40, %v3141_v3  ;;  %v1454_v36 = vmul.f32 %v1414_v43, %v3135_v47 }
 0x234   :  { %v1512_v54 = vmul.f32 0.5, %v1511_v59 }
 0x235   :  { %vm1675_vm5 = vcmp.ge.f32.partialorder %v1659_v46, 0.0  ;;  %v1691_v48 = vmul.f32 0.2, %v1659_v46  ;;  %v1470_v49 = vmax.f32 %v1454_v36, 0.0 }
 0x236   :  { %v1513_v45 = vsub.f32 1.5, %v1512_v54 }
 0x237   :  { %v2408_v57 = vpop.eup %2407  ;;  %v1707_v58 = vsel %vm1675_vm5, %v1659_v46, %v1691_v48  ;;  %v1486_v56 = vadd.f32 1e-05, %v1470_v49 }
 0x238   :  { %v1723_v41 = vpack.c.bf16 %v1707_v58, %v1707_v58  ;;  %v1514_v60 = vmul.f32 %v2406_v14, %v1513_v45  ;;  %v1520_v13 = vmul.f32 %v2408_v57, %v1485_v15  ;;  %vm1526_vm11 = vweird.f32 %v2408_v57 }
 0x239   :  { %2409 = vrsqrt.f32 %v1486_v56  ;;  %vm1527_vm13 = vmor %vm1525_vm12, %vm1526_vm11  ;;  %vm1535_vm0 = vweird.f32 %v1486_v56 }
 0x23a   :  { %1740 = vst.msk [vmem:[%s3351_s2] sm:$0xf] %vm1739_vm7, %v1723_v41  ;;  %v1518_v3 = vsel %vm1517_vm9, %v2406_v14, %v1514_v60  ;;  %v1521_v0 = vmul.f32 %v2408_v57, %v1520_v13  ;;  %v1417_v5 = vpop.xlane.xlu2 %1416 }
 0x23b   :  { %v1660_v6 = vmul.f32 %v1518_v3, %v3150_v63  ;;  %v1455_v61 = vmul.f32 %v1417_v5, %v3135_v47 }
 0x23c   :  { %v1522_v20 = vmul.f32 0.5, %v1521_v0 }
 0x23d   :  { %vm1676_vm10 = vcmp.ge.f32.partialorder %v1660_v6, 0.0  ;;  %v1692_v17 = vmul.f32 0.2, %v1660_v6  ;;  %v1471_v23 = vmax.f32 %v1455_v61, 0.0 }
 0x23e   :  { %v1523_v11 = vsub.f32 1.5, %v1522_v20 }
 0x23f   :  { %v2410_v8 = vpop.eup %2409  ;;  %v1708_v12 = vsel %vm1676_vm10, %v1660_v6, %v1692_v17  ;;  %v1487_v35 = vadd.f32 1e-05, %v1471_v23 }
 0x240   :  { %v1724_v4 = vpack.c.bf16 %v1708_v12, %v1708_v12  ;;  %v1524_v28 = vmul.f32 %v2408_v57, %v1523_v11  ;;  %v1530_v39 = vmul.f32 %v2410_v8, %v1486_v56  ;;  %vm1536_vm15 = vweird.f32 %v2410_v8 }
 0x241   :  { %2411 = vrsqrt.f32 %v1487_v35  ;;  %vm1537_vm1 = vmor %vm1535_vm0, %vm1536_vm15  ;;  %vm1545_vm4 = vweird.f32 %v1487_v35 }
 0x242   :  { %1741 = vst.msk [vmem:[%s3351_s2 + $0x4] sm:$0xf] %vm1739_vm7, %v1724_v4  ;;  %v1528_v63 = vsel %vm1527_vm13, %v2408_v57, %v1524_v28  ;;  %v1531_v19 = vmul.f32 %v2410_v8, %v1530_v39  ;;  %v1420_v44 = vpop.xlane.xlu0 %1419 }
 0x243   :  { %v1661_v53 = vmul.f32 %v1528_v63, %v3157_v7  ;;  %v1456_v22 = vmul.f32 %v1420_v44, %v3135_v47 }
 0x244   :  { %v1532_v55 = vmul.f32 0.5, %v1531_v19 }
 0x245   :  { %vm1677_vm14 = vcmp.ge.f32.partialorder %v1661_v53, 0.0  ;;  %v1693_v26 = vmul.f32 0.2, %v1661_v53  ;;  %v1472_v25 = vmax.f32 %v1456_v22, 0.0 }
 0x246   :  { %v1533_v52 = vsub.f32 1.5, %v1532_v55 }
 0x247   :  { %v2412_v29 = vpop.eup %2411  ;;  %v1709_v30 = vsel %vm1677_vm14, %v1661_v53, %v1693_v26  ;;  %v1488_v2 = vadd.f32 1e-05, %v1472_v25 }
 0x248   :  { %v1725_v31 = vpack.c.bf16 %v1709_v30, %v1709_v30  ;;  %v1534_v33 = vmul.f32 %v2410_v8, %v1533_v52  ;;  %v1540_v37 = vmul.f32 %v2412_v29, %v1487_v35  ;;  %vm1546_vm3 = vweird.f32 %v2412_v29 }
 0x249   :  { %2413 = vrsqrt.f32 %v1488_v2  ;;  %vm1547_vm5 = vmor %vm1545_vm4, %vm1546_vm3  ;;  %vm1555_vm9 = vweird.f32 %v1488_v2 }
 0x24a   :  { %1742 = vst.msk [vmem:[%s3351_s2 + $0x8] sm:$0xf] %vm1739_vm7, %v1725_v31  ;;  %v1538_v7 = vsel %vm1537_vm1, %v2410_v8, %v1534_v33  ;;  %v1541_v14 = vmul.f32 %v2412_v29, %v1540_v37  ;;  %v1423_v15 = vpop.xlane.xlu1 %1422 }
 0x24b   :  { %v1662_v32 = vmul.f32 %v1538_v7, %v3164_v10  ;;  %v1457_v24 = vmul.f32 %v1423_v15, %v3135_v47 }
 0x24c   :  { %v1542_v40 = vmul.f32 0.5, %v1541_v14 }
 0x24d   :  { %vm1678_vm2 = vcmp.ge.f32.partialorder %v1662_v32, 0.0  ;;  %v1694_v59 = vmul.f32 0.2, %v1662_v32  ;;  %v1473_v43 = vmax.f32 %v1457_v24, 0.0 }
 0x24e   :  { %v1543_v46 = vsub.f32 1.5, %v1542_v40 }
 0x24f   :  { %v2414_v36 = vpop.eup %2413  ;;  %v1710_v54 = vsel %vm1678_vm2, %v1662_v32, %v1694_v59  ;;  %v1489_v48 = vadd.f32 1e-05, %v1473_v43 }
 0x250   :  { %v1726_v49 = vpack.c.bf16 %v1710_v54, %v1710_v54  ;;  %v1544_v45 = vmul.f32 %v2412_v29, %v1543_v46  ;;  %v1550_v57 = vmul.f32 %v2414_v36, %v1488_v2  ;;  %vm1556_vm8 = vweird.f32 %v2414_v36 }
 0x251   :  { %2415 = vrsqrt.f32 %v1489_v48  ;;  %vm1557_vm10 = vmor %vm1555_vm9, %vm1556_vm8  ;;  %vm1565_vm13 = vweird.f32 %v1489_v48 }
 0x252   :  { %1743 = vst.msk [vmem:[%s3351_s2 + $0xc] sm:$0xf] %vm1739_vm7, %v1726_v49  ;;  %v1548_v10 = vsel %vm1547_vm5, %v2412_v29, %v1544_v45  ;;  %v1551_v58 = vmul.f32 %v2414_v36, %v1550_v57  ;;  %v1426_v56 = vpop.xlane.xlu2 %1425 }
 0x253   :  { %v1663_v41 = vmul.f32 %v1548_v10, %v3171_v18  ;;  %v1458_v60 = vmul.f32 %v1426_v56, %v3135_v47 }
 0x254   :  { %v1552_v13 = vmul.f32 0.5, %v1551_v58 }
 0x255   :  { %vm1679_vm6 = vcmp.ge.f32.partialorder %v1663_v41, 0.0  ;;  %v1695_v3 = vmul.f32 0.2, %v1663_v41  ;;  %v1474_v0 = vmax.f32 %v1458_v60, 0.0 }
 0x256   :  { %v1553_v5 = vsub.f32 1.5, %v1552_v13 }
 0x257   :  { %v2416_v6 = vpop.eup %2415  ;;  %v1711_v61 = vsel %vm1679_vm6, %v1663_v41, %v1695_v3  ;;  %v1490_v20 = vadd.f32 1e-05, %v1474_v0 }
 0x258   :  { %v1727_v17 = vpack.c.bf16 %v1711_v61, %v1711_v61  ;;  %v1554_v23 = vmul.f32 %v2414_v36, %v1553_v5  ;;  %v1560_v11 = vmul.f32 %v2416_v6, %v1489_v48  ;;  %vm1566_vm12 = vweird.f32 %v2416_v6 }
 0x259   :  { %2417 = vrsqrt.f32 %v1490_v20  ;;  %vm1567_vm14 = vmor %vm1565_vm13, %vm1566_vm12  ;;  %vm1575_vm1 = vweird.f32 %v1490_v20 }
 0x25a   :  { %1744 = vst.msk [vmem:[%s3351_s2 + $0x10] sm:$0xf] %vm1739_vm7, %v1727_v17  ;;  %v1558_v18 = vsel %vm1557_vm10, %v2414_v36, %v1554_v23  ;;  %v1561_v8 = vmul.f32 %v2416_v6, %v1560_v11  ;;  %v1429_v12 = vpop.xlane.xlu0 %1428 }
 0x25b   :  { %v1664_v35 = vmul.f32 %v1558_v18, %v3178_v21  ;;  %v1459_v4 = vmul.f32 %v1429_v12, %v3135_v47 }
 0x25c   :  { %v1562_v28 = vmul.f32 0.5, %v1561_v8 }
 0x25d   :  { %vm1680_vm11 = vcmp.ge.f32.partialorder %v1664_v35, 0.0  ;;  %v1696_v39 = vmul.f32 0.2, %v1664_v35  ;;  %v1475_v63 = vmax.f32 %v1459_v4, 0.0 }
 0x25e   :  { %v1563_v19 = vsub.f32 1.5, %v1562_v28 }
 0x25f   :  { %v2418_v44 = vpop.eup %2417  ;;  %v1712_v53 = vsel %vm1680_vm11, %v1664_v35, %v1696_v39  ;;  %v1491_v22 = vadd.f32 1e-05, %v1475_v63 }
 0x260   :  { %v1728_v55 = vpack.c.bf16 %v1712_v53, %v1712_v53  ;;  %v1564_v26 = vmul.f32 %v2416_v6, %v1563_v19  ;;  %v1570_v25 = vmul.f32 %v2418_v44, %v1490_v20  ;;  %vm1576_vm0 = vweird.f32 %v2418_v44 }
 0x261   :  { %2419 = vrsqrt.f32 %v1491_v22  ;;  %vm1577_vm2 = vmor %vm1575_vm1, %vm1576_vm0  ;;  %vm1585_vm5 = vweird.f32 %v1491_v22 }
 0x262   :  { %1745 = vst.msk [vmem:[%s3351_s2 + $0x14] sm:$0xf] %vm1739_vm7, %v1728_v55  ;;  %v1568_v21 = vsel %vm1567_vm14, %v2416_v6, %v1564_v26  ;;  %v1571_v52 = vmul.f32 %v2418_v44, %v1570_v25  ;;  %v1432_v29 = vpop.xlane.xlu1 %1431 }
 0x263   :  { %v1665_v30 = vmul.f32 %v1568_v21, %v3185_v27  ;;  %v1460_v2 = vmul.f32 %v1432_v29, %v3135_v47 }
 0x264   :  { %v1572_v31 = vmul.f32 0.5, %v1571_v52 }
 0x265   :  { %vm1681_vm15 = vcmp.ge.f32.partialorder %v1665_v30, 0.0  ;;  %v1697_v33 = vmul.f32 0.2, %v1665_v30  ;;  %v1476_v37 = vmax.f32 %v1460_v2, 0.0 }
 0x266   :  { %v1573_v7 = vsub.f32 1.5, %v1572_v31 }
 0x267   :  { %v2420_v14 = vpop.eup %2419  ;;  %v1713_v15 = vsel %vm1681_vm15, %v1665_v30, %v1697_v33  ;;  %v1492_v32 = vadd.f32 1e-05, %v1476_v37 }
 0x268   :  { %v1729_v24 = vpack.c.bf16 %v1713_v15, %v1713_v15  ;;  %v1574_v40 = vmul.f32 %v2418_v44, %v1573_v7  ;;  %v1580_v59 = vmul.f32 %v2420_v14, %v1491_v22  ;;  %vm1586_vm4 = vweird.f32 %v2420_v14 }
 0x269   :  { %2421 = vrsqrt.f32 %v1492_v32  ;;  %vm1587_vm6 = vmor %vm1585_vm5, %vm1586_vm4  ;;  %vm1595_vm10 = vweird.f32 %v1492_v32 }
 0x26a   :  { %1746 = vst.msk [vmem:[%s3351_s2 + $0x18] sm:$0xf] %vm1739_vm7, %v1729_v24  ;;  %v1578_v27 = vsel %vm1577_vm2, %v2418_v44, %v1574_v40  ;;  %v1581_v43 = vmul.f32 %v2420_v14, %v1580_v59  ;;  %v1435_v46 = vpop.xlane.xlu2 %1434 }
 0x26b   :  { %v1666_v36 = vmul.f32 %v1578_v27, %v3192_v50  ;;  %v1461_v54 = vmul.f32 %v1435_v46, %v3135_v47 }
 0x26c   :  { %v1582_v48 = vmul.f32 0.5, %v1581_v43 }
 0x26d   :  { %vm1682_vm3 = vcmp.ge.f32.partialorder %v1666_v36, 0.0  ;;  %v1698_v49 = vmul.f32 0.2, %v1666_v36  ;;  %v1477_v45 = vmax.f32 %v1461_v54, 0.0 }
 0x26e   :  { %v1583_v57 = vsub.f32 1.5, %v1582_v48 }
 0x26f   :  { %v2422_v10 = vpop.eup %2421  ;;  %v1714_v58 = vsel %vm1682_vm3, %v1666_v36, %v1698_v49  ;;  %v1493_v56 = vadd.f32 1e-05, %v1477_v45 }
 0x270   :  { %v1730_v41 = vpack.c.bf16 %v1714_v58, %v1714_v58  ;;  %v1584_v60 = vmul.f32 %v2420_v14, %v1583_v57  ;;  %v1590_v13 = vmul.f32 %v2422_v10, %v1492_v32  ;;  %vm1596_vm9 = vweird.f32 %v2422_v10 }
 0x271   :  { %2423 = vrsqrt.f32 %v1493_v56  ;;  %vm1597_vm11 = vmor %vm1595_vm10, %vm1596_vm9  ;;  %vm1605_vm14 = vweird.f32 %v1493_v56 }
 0x272   :  { %1747 = vst.msk [vmem:[%s3351_s2 + $0x1c] sm:$0xf] %vm1739_vm7, %v1730_v41  ;;  %v1588_v50 = vsel %vm1587_vm6, %v2420_v14, %v1584_v60  ;;  %v1591_v3 = vmul.f32 %v2422_v10, %v1590_v13  ;;  %v1438_v0 = vpop.xlane.xlu0 %1437 }
 0x273   :  { %v1667_v5 = vmul.f32 %v1588_v50, %v3199_v38  ;;  %v1462_v6 = vmul.f32 %v1438_v0, %v3135_v47 }
 0x274   :  { %v1592_v61 = vmul.f32 0.5, %v1591_v3 }
 0x275   :  { %vm1683_vm8 = vcmp.ge.f32.partialorder %v1667_v5, 0.0  ;;  %v1699_v20 = vmul.f32 0.2, %v1667_v5  ;;  %v1478_v17 = vmax.f32 %v1462_v6, 0.0 }
 0x276   :  { %v1593_v23 = vsub.f32 1.5, %v1592_v61 }
 0x277   :  { %v2424_v11 = vpop.eup %2423  ;;  %v1715_v18 = vsel %vm1683_vm8, %v1667_v5, %v1699_v20  ;;  %v1494_v8 = vadd.f32 1e-05, %v1478_v17 }
 0x278   :  { %v1731_v12 = vpack.c.bf16 %v1715_v18, %v1715_v18  ;;  %v1594_v35 = vmul.f32 %v2422_v10, %v1593_v23  ;;  %v1600_v4 = vmul.f32 %v2424_v11, %v1493_v56  ;;  %vm1606_vm13 = vweird.f32 %v2424_v11 }
 0x279   :  { %2425 = vrsqrt.f32 %v1494_v8  ;;  %vm1607_vm15 = vmor %vm1605_vm14, %vm1606_vm13  ;;  %vm1615_vm2 = vweird.f32 %v1494_v8 }
 0x27a   :  { %1748 = vst.msk [vmem:[%s3351_s2 + $0x20] sm:$0xf] %vm1739_vm7, %v1731_v12  ;;  %v1598_v38 = vsel %vm1597_vm11, %v2422_v10, %v1594_v35  ;;  %v1601_v28 = vmul.f32 %v2424_v11, %v1600_v4  ;;  %v1441_v39 = vpop.xlane.xlu1 %1440 }
 0x27b   :  { %v1668_v63 = vmul.f32 %v1598_v38, %v3206_v42  ;;  %v1463_v19 = vmul.f32 %v1441_v39, %v3135_v47 }
 0x27c   :  { %v1602_v44 = vmul.f32 0.5, %v1601_v28 }
 0x27d   :  { %vm1684_vm12 = vcmp.ge.f32.partialorder %v1668_v63, 0.0  ;;  %v1700_v53 = vmul.f32 0.2, %v1668_v63  ;;  %v1479_v22 = vmax.f32 %v1463_v19, 0.0 }
 0x27e   :  { %v1603_v55 = vsub.f32 1.5, %v1602_v44 }
 0x27f   :  { %v2426_v26 = vpop.eup %2425  ;;  %v1716_v25 = vsel %vm1684_vm12, %v1668_v63, %v1700_v53  ;;  %v1495_v21 = vadd.f32 1e-05, %v1479_v22 }
 0x280   :  { %v1732_v52 = vpack.c.bf16 %v1716_v25, %v1716_v25  ;;  %v1604_v29 = vmul.f32 %v2424_v11, %v1603_v55  ;;  %v1610_v30 = vmul.f32 %v2426_v26, %v1494_v8  ;;  %vm1616_vm1 = vweird.f32 %v2426_v26 }
 0x281   :  { %2427 = vrsqrt.f32 %v1495_v21  ;;  %vm1617_vm3 = vmor %vm1615_vm2, %vm1616_vm1  ;;  %vm1625_vm6 = vweird.f32 %v1495_v21 }
 0x282   :  { %1749 = vst.msk [vmem:[%s3351_s2 + $0x24] sm:$0xf] %vm1739_vm7, %v1732_v52  ;;  %v1608_v42 = vsel %vm1607_vm15, %v2424_v11, %v1604_v29  ;;  %v1611_v2 = vmul.f32 %v2426_v26, %v1610_v30  ;;  %v1444_v31 = vpop.xlane.xlu2 %1443 }
 0x283   :  { %v1669_v33 = vmul.f32 %v1608_v42, %v3213_v34  ;;  %v1464_v37 = vmul.f32 %v1444_v31, %v3135_v47 }
 0x284   :  { %v1612_v7 = vmul.f32 0.5, %v1611_v2 }
 0x285   :  { %vm1685_vm0 = vcmp.ge.f32.partialorder %v1669_v33, 0.0  ;;  %v1701_v14 = vmul.f32 0.2, %v1669_v33  ;;  %v1480_v15 = vmax.f32 %v1464_v37, 0.0 }
 0x286   :  { %v1613_v32 = vsub.f32 1.5, %v1612_v7 }
 0x287   :  { %v2428_v24 = vpop.eup %2427  ;;  %v1717_v40 = vsel %vm1685_vm0, %v1669_v33, %v1701_v14  ;;  %v1496_v59 = vadd.f32 1e-05, %v1480_v15 }
 0x288   :  { %v1733_v27 = vpack.c.bf16 %v1717_v40, %v1717_v40  ;;  %v1614_v43 = vmul.f32 %v2426_v26, %v1613_v32  ;;  %v1620_v46 = vmul.f32 %v2428_v24, %v1495_v21  ;;  %vm1626_vm5 = vweird.f32 %v2428_v24 }
 0x289   :  { %2429 = vrsqrt.f32 %v1496_v59  ;;  %vm1627_vm8 = vmor %vm1625_vm6, %vm1626_vm5  ;;  %vm1635_vm11 = vweird.f32 %v1496_v59 }
 0x28a   :  { %1750 = vst.msk [vmem:[%s3351_s2 + $0x28] sm:$0xf] %vm1739_vm7, %v1733_v27  ;;  %v1618_v34 = vsel %vm1617_vm3, %v2426_v26, %v1614_v43  ;;  %v1621_v36 = vmul.f32 %v2428_v24, %v1620_v46  ;;  %v1447_v54 = vpop.xlane.xlu0 %1446 }
 0x28b   :  { %v1670_v48 = vmul.f32 %v1618_v34, %v3220_v51  ;;  %v1465_v49 = vmul.f32 %v1447_v54, %v3135_v47 }
 0x28c   :  { %v1622_v45 = vmul.f32 0.5, %v1621_v36 }
 0x28d   :  { %vm1686_vm4 = vcmp.ge.f32.partialorder %v1670_v48, 0.0  ;;  %v1702_v57 = vmul.f32 0.2, %v1670_v48  ;;  %v1481_v10 = vmax.f32 %v1465_v49, 0.0 }
 0x28e   :  { %v1623_v58 = vsub.f32 1.5, %v1622_v45 }
 0x28f   :  { %v2430_v56 = vpop.eup %2429  ;;  %v1718_v41 = vsel %vm1686_vm4, %v1670_v48, %v1702_v57  ;;  %v1497_v60 = vadd.f32 1e-05, %v1481_v10 }
 0x290   :  { %v1734_v13 = vpack.c.bf16 %v1718_v41, %v1718_v41  ;;  %v1624_v50 = vmul.f32 %v2428_v24, %v1623_v58  ;;  %v1630_v3 = vmul.f32 %v2430_v56, %v1496_v59  ;;  %vm1636_vm10 = vweird.f32 %v2430_v56 }
 0x291   :  { %2431 = vrsqrt.f32 %v1497_v60  ;;  %vm1637_vm12 = vmor %vm1635_vm11, %vm1636_vm10  ;;  %vm1645_vm15 = vweird.f32 %v1497_v60 }
 0x292   :  { %1751 = vst.msk [vmem:[%s3351_s2 + $0x2c] sm:$0xf] %vm1739_vm7, %v1734_v13  ;;  %v1628_v51 = vsel %vm1627_vm8, %v2428_v24, %v1624_v50  ;;  %v1631_v0 = vmul.f32 %v2430_v56, %v1630_v3  ;;  %v1450_v5 = vpop.xlane.xlu1 %1449 }
 0x293   :  { %v1671_v6 = vmul.f32 %v1628_v51, %v3227_v62  ;;  %v1466_v61 = vmul.f32 %v1450_v5, %v3135_v47 }
 0x294   :  { %v1632_v20 = vmul.f32 0.5, %v1631_v0 }
 0x295   :  { %vm1687_vm9 = vcmp.ge.f32.partialorder %v1671_v6, 0.0  ;;  %v1703_v17 = vmul.f32 0.2, %v1671_v6  ;;  %v1482_v23 = vmax.f32 %v1466_v61, 0.0 }
 0x296   :  { %v1633_v11 = vsub.f32 1.5, %v1632_v20 }
 0x297   :  { %v2432_v18 = vpop.eup %2431  ;;  %v1719_v8 = vsel %vm1687_vm9, %v1671_v6, %v1703_v17  ;;  %v1498_v12 = vadd.f32 1e-05, %v1482_v23 }
 0x298   :  { %v1735_v35 = vpack.c.bf16 %v1719_v8, %v1719_v8  ;;  %v1634_v4 = vmul.f32 %v2430_v56, %v1633_v11  ;;  %v1640_v38 = vmul.f32 %v2432_v18, %v1497_v60  ;;  %vm1646_vm14 = vweird.f32 %v2432_v18 }
 0x299   :  { %2433 = vrsqrt.f32 %v1498_v12  ;;  %vm1647_vm0 = vmor %vm1645_vm15, %vm1646_vm14  ;;  %vm1655_vm3 = vweird.f32 %v1498_v12 }
 0x29a   :  { %1752 = vst.msk [vmem:[%s3351_s2 + $0x30] sm:$0xf] %vm1739_vm7, %v1735_v35  ;;  %v1638_v47 = vsel %vm1637_vm12, %v2430_v56, %v1634_v4  ;;  %v1641_v62 = vmul.f32 %v2432_v18, %v1640_v38 }
 0x29b   :  { %v1672_v28 = vmul.f32 %v1638_v47, %v3234_v1 }
 0x29c   :  { %v1642_v39 = vmul.f32 0.5, %v1641_v62 }
 0x29d   :  { %vm1688_vm13 = vcmp.ge.f32.partialorder %v1672_v28, 0.0  ;;  %v1704_v63 = vmul.f32 0.2, %v1672_v28 }
 0x29e   :  { %v1643_v19 = vsub.f32 1.5, %v1642_v39 }
 0x29f   :  { %v2434_v44 = vpop.eup %2433  ;;  %v1720_v53 = vsel %vm1688_vm13, %v1672_v28, %v1704_v63 }
 0x2a0   :  { %v1736_v22 = vpack.c.bf16 %v1720_v53, %v1720_v53  ;;  %v1644_v55 = vmul.f32 %v2432_v18, %v1643_v19  ;;  %v1650_v26 = vmul.f32 %v2434_v44, %v1498_v12  ;;  %vm1656_vm2 = vweird.f32 %v2434_v44 }
 0x2a1   :  { %vm1657_vm4 = vmor %vm1655_vm3, %vm1656_vm2 }
 0x2a2   :  { %1753 = vst.msk [vmem:[%s3351_s2 + $0x34] sm:$0xf] %vm1739_vm7, %v1736_v22  ;;  %v1648_v25 = vsel %vm1647_vm0, %v2432_v18, %v1644_v55  ;;  %v1651_v21 = vmul.f32 %v2434_v44, %v1650_v26 }
 0x2a3   :  { %v1673_v1 = vmul.f32 %v1648_v25, %v3241_v9 }
 0x2a4   :  { %v1652_v52 = vmul.f32 0.5, %v1651_v21 }
 0x2a5   :  { %vm1689_vm1 = vcmp.ge.f32.partialorder %v1673_v1, 0.0  ;;  %v1705_v29 = vmul.f32 0.2, %v1673_v1 }
 0x2a6   :  { %v1653_v30 = vsub.f32 1.5, %v1652_v52 }
 0x2a7   :  { %v1721_v42 = vsel %vm1689_vm1, %v1673_v1, %v1705_v29 }
 0x2a8   :  { %v1737_v2 = vpack.c.bf16 %v1721_v42, %v1721_v42  ;;  %v1654_v31 = vmul.f32 %v2434_v44, %v1653_v30 }
 0x2aa   :  { %1754 = vst.msk [vmem:[%s3351_s2 + $0x38] sm:$0xf] %vm1739_vm7, %v1737_v2  ;;  %v1658_v33 = vsel %vm1657_vm4, %v2434_v44, %v1654_v31 }
 0x2ab   :  { %v1674_v37 = vmul.f32 %v1658_v33, %v3248_v16 }
 0x2ad   :  { %vm1690_vm5 = vcmp.ge.f32.partialorder %v1674_v37, 0.0  ;;  %v1706_v9 = vmul.f32 0.2, %v1674_v37 }
 0x2af   :  { %v1722_v7 = vsel %vm1690_vm5, %v1674_v37, %v1706_v9 }
 0x2b0   :  { %v1738_v14 = vpack.c.bf16 %v1722_v7, %v1722_v7 }
 0x2b2   :  { %1755 = vst.msk [vmem:[%s3351_s2 + $0x3c] sm:$0xf] %vm1739_vm7, %v1738_v14 }

// kernel: layered_forward.9
= control target key start
LH: loop header
LB: loop body
LE: loop exit
PB: predicated region body
PF: predicated region fallthrough
CT: control target
= control target key end

     0   :  { %s2399_s0 = inlined_call_operand.vmem [shape: bf16[1,2048], index: 0, kind: input, shape index: {}]   ;;  %s2400_s1 = inlined_call_operand.vmem [shape: bf16[2048,2], index: 1, kind: input, shape index: {}]   ;;  %s2401_s2 = inlined_call_operand.hbm [shape: f32[1,2], index: 2, kind: output, shape index: {}]  }
   0x1   :  { %v1838_v0 = vld [vmem:[%s2400_s1 + $0x38] sm:$0xff]  ;;  %v1837_v4 = vld [vmem:[%s2400_s1 + $0x30] sm:$0xff]  ;;  %v1836_v8 = vld [vmem:[%s2400_s1 + $0x28] sm:$0xff] }
   0x2   :  { %v1846_v1 = vld [vmem:[%s2400_s1 + $0x78] sm:$0xff]  ;;  %1074 = vmatpush.bf16.msra.mxu0 %v1838_v0  ;;  %v1845_v5 = vld [vmem:[%s2400_s1 + $0x70] sm:$0xff]  ;;  %v1844_v9 = vld [vmem:[%s2400_s1 + $0x68] sm:$0xff] }
   0x3   :  { %v1854_v2 = vld [vmem:[%s2400_s1 + $0xb8] sm:$0xff]  ;;  %1087 = vmatpush.bf16.msra.mxu1 %v1846_v1  ;;  %v1853_v6 = vld [vmem:[%s2400_s1 + $0xb0] sm:$0xff]  ;;  %v1852_v10 = vld [vmem:[%s2400_s1 + $0xa8] sm:$0xff] }
   0x4   :  { %v1862_v3 = vld [vmem:[%s2400_s1 + $0xf8] sm:$0xff]  ;;  %1100 = vmatpush.bf16.msra.mxu2 %v1854_v2  ;;  %v1861_v7 = vld [vmem:[%s2400_s1 + $0xf0] sm:$0xff]  ;;  %v1860_v11 = vld [vmem:[%s2400_s1 + $0xe8] sm:$0xff] }
   0x5   :  { %1113 = vmatpush.bf16.msra.mxu3 %v1862_v3  ;;  %v1835_v12 = vld [vmem:[%s2400_s1 + $0x20] sm:$0xff]  ;;  %v1834_v16 = vld [vmem:[%s2400_s1 + $0x18] sm:$0xff]  ;;  %v1833_v21 = vld [vmem:[%s2400_s1 + $0x10] sm:$0xff] }
   0x6   :  { %1075 = vmatpush.bf16.msra.mxu0 %v1837_v4  ;;  %v1843_v13 = vld [vmem:[%s2400_s1 + $0x60] sm:$0xff]  ;;  %v1842_v17 = vld [vmem:[%s2400_s1 + $0x58] sm:$0xff]  ;;  %v1841_v22 = vld [vmem:[%s2400_s1 + $0x50] sm:$0xff] }
   0x7   :  { %1088 = vmatpush.bf16.msra.mxu1 %v1845_v5  ;;  %v1851_v14 = vld [vmem:[%s2400_s1 + $0xa0] sm:$0xff]  ;;  %v1850_v18 = vld [vmem:[%s2400_s1 + $0x98] sm:$0xff] }
   0x8   :  { %1101 = vmatpush.bf16.msra.mxu2 %v1853_v6  ;;  %v1859_v15 = vld [vmem:[%s2400_s1 + $0xe0] sm:$0xff]  ;;  %v1858_v19 = vld [vmem:[%s2400_s1 + $0xd8] sm:$0xff] }
   0x9   :  { %1114 = vmatpush.bf16.msra.mxu3 %v1861_v7  ;;  %v12_v20 = vld [vmem:[%s2399_s0] sm:$0xff] }
   0xa   :  { %1076 = vmatpush.bf16.msra.mxu0 %v1836_v8  ;;  %271 = vst [vmem:[#allocation1] ss:$9 sm:$0xff] %v12_v20 }
   0xb   :  { %1089 = vmatpush.bf16.msra.mxu1 %v1844_v9 }
   0xc   :  { %1102 = vmatpush.bf16.msra.mxu2 %v1852_v10 }
   0xd   :  { %1115 = vmatpush.bf16.msra.mxu3 %v1860_v11 }
   0xe   :  { %1077 = vmatpush.bf16.msra.mxu0 %v1835_v12 }
   0xf   :  { %1090 = vmatpush.bf16.msra.mxu1 %v1843_v13 }
  0x10   :  { %1103 = vmatpush.bf16.msra.mxu2 %v1851_v14 }
  0x11   :  { %1116 = vmatpush.bf16.msra.mxu3 %v1859_v15 }
  0x12   :  { %1078 = vmatpush.bf16.msra.mxu0 %v1834_v16 }
  0x13   :  { %1091 = vmatpush.bf16.msra.mxu1 %v1842_v17 }
  0x14   :  { %7 = vsyncpa [#allocation3], 0  ;;  %1104 = vmatpush.bf16.msra.mxu2 %v1850_v18  ;;  %v1849_v23 = vld [vmem:[%s2400_s1 + $0x90] sm:$0xff]  ;;  %v1832_v25 = vld [vmem:[%s2400_s1 + $0x8] sm:$0xff]  ;;  %s1310_s14 = sshll.u32 %s2401_s2, 4  ;;  %vm1301_vm3 = vcmask 8192   ;;  %s1311_s14 = int_to_ptr.hbm [resolvable:$true] %s1310_s14 }
  0x15   :  { %1117 = vmatpush.bf16.msra.mxu3 %v1858_v19  ;;  %v1857_v24 = vld [vmem:[%s2400_s1 + $0xd0] sm:$0xff]  ;;  %v1840_v26 = vld [vmem:[%s2400_s1 + $0x48] sm:$0xff]  ;;  %v1831_v29 = vld [vmem:[%s2400_s1] sm:$0xff] }
  0x16   :  { %1079 = vmatpush.bf16.msra.mxu0 %v1833_v21  ;;  %v1848_v27 = vld [vmem:[%s2400_s1 + $0x88] sm:$0xff]  ;;  %v1839_v30 = vld [vmem:[%s2400_s1 + $0x40] sm:$0xff]  ;;  %v1870_v33 = vld [vmem:[%s2400_s1 + $0x138] sm:$0xff] }
  0x17   :  { %1092 = vmatpush.bf16.msra.mxu1 %v1841_v22  ;;  %v1856_v28 = vld [vmem:[%s2400_s1 + $0xc8] sm:$0xff]  ;;  %v1847_v31 = vld [vmem:[%s2400_s1 + $0x80] sm:$0xff]  ;;  %v1878_v34 = vld [vmem:[%s2400_s1 + $0x178] sm:$0xff] }
  0x18   :  { %1105 = vmatpush.bf16.msra.mxu2 %v1849_v23  ;;  %v1855_v32 = vld [vmem:[%s2400_s1 + $0xc0] sm:$0xff]  ;;  %v1886_v35 = vld [vmem:[%s2400_s1 + $0x1b8] sm:$0xff]  ;;  %v1869_v37 = vld [vmem:[%s2400_s1 + $0x130] sm:$0xff] }
  0x19   :  { %1118 = vmatpush.bf16.msra.mxu3 %v1857_v24  ;;  %v1894_v36 = vld [vmem:[%s2400_s1 + $0x1f8] sm:$0xff]  ;;  %v272_v39 = vld [vmem:[#allocation1] sm:$0xff]  ;;  %v1877_v40 = vld [vmem:[%s2400_s1 + $0x170] sm:$0xff] }
  0x1a   :  { %1080 = vmatpush.bf16.msra.mxu0 %v1832_v25  ;;  %v274_v38 = vld [vmem:[#allocation1 + $0x12] sm:$0xff]  ;;  %v275_v41 = vld [vmem:[#allocation1 + $0x1b] sm:$0xff]  ;;  %v273_v42 = vld [vmem:[#allocation1 + $0x9] sm:$0xff] }
  0x1b   :  { %1093 = vmatpush.bf16.msra.mxu1 %v1840_v26  ;;  %v1885_v43 = vld [vmem:[%s2400_s1 + $0x1b0] sm:$0xff]  ;;  %v1868_v45 = vld [vmem:[%s2400_s1 + $0x128] sm:$0xff]  ;;  %v279_v51 = vld [vmem:[#allocation1 + $0x3f] sm:$0xff] }
  0x1c   :  { %1106 = vmatpush.bf16.msra.mxu2 %v1848_v27  ;;  %v1893_v44 = vld [vmem:[%s2400_s1 + $0x1f0] sm:$0xff]  ;;  %v1876_v46 = vld [vmem:[%s2400_s1 + $0x168] sm:$0xff]  ;;  %v1867_v54 = vld [vmem:[%s2400_s1 + $0x120] sm:$0xff] }
  0x1d   :  { %1119 = vmatpush.bf16.msra.mxu3 %v1856_v28  ;;  %v1884_v47 = vld [vmem:[%s2400_s1 + $0x1a8] sm:$0xff]  ;;  %v278_v49 = vld [vmem:[#allocation1 + $0x36] sm:$0xff]  ;;  %v1875_v55 = vld [vmem:[%s2400_s1 + $0x160] sm:$0xff] }
  0x1e   :  { %1081 = vmatpush.bf16.msra.mxu0 %v1831_v29  ;;  %v1892_v48 = vld [vmem:[%s2400_s1 + $0x1e8] sm:$0xff]  ;;  %v1883_v56 = vld [vmem:[%s2400_s1 + $0x1a0] sm:$0xff]  ;;  %v1866_v58 = vld [vmem:[%s2400_s1 + $0x118] sm:$0xff] }
  0x1f   :  { %1094 = vmatpush.bf16.msra.mxu1 %v1839_v30  ;;  %v276_v50 = vld [vmem:[#allocation1 + $0x24] sm:$0xff]  ;;  %v277_v53 = vld [vmem:[#allocation1 + $0x2d] sm:$0xff]  ;;  %v1874_v59 = vld [vmem:[%s2400_s1 + $0x158] sm:$0xff] }
  0x20   :  { %1107 = vmatpush.bf16.msra.mxu2 %v1847_v31  ;;  %v13_v52 = vld [vmem:[%s2399_s0 + $0x8] sm:$0xff]  ;;  %v1891_v57 = vld [vmem:[%s2400_s1 + $0x1e0] sm:$0xff]  ;;  %v1882_v60 = vld [vmem:[%s2400_s1 + $0x198] sm:$0xff] }
  0x21   :  { %1120 = vmatpush.bf16.msra.mxu3 %v1855_v32  ;;  %1082 = vmatmul.bf16.vlgmr.msra.gmra.mxu0 %v272_v39  ;;  %281 = vst [vmem:[#allocation1] ss:$9 sm:$0xff] %v13_v52  ;;  %v1890_v61 = vld [vmem:[%s2400_s1 + $0x1d8] sm:$0xff]  ;;  %v1865_v62 = vld [vmem:[%s2400_s1 + $0x110] sm:$0xff]  ;;  %v1864_v2 = vld [vmem:[%s2400_s1 + $0x108] sm:$0xff] }
  0x22   :  { %1126 = vmatpush.bf16.msrb.mxu0 %v1870_v33  ;;  %1095 = vmatmul.bf16.vlgmr.msra.gmra.mxu1 %v273_v42  ;;  %v1873_v63 = vld [vmem:[%s2400_s1 + $0x150] sm:$0xff]  ;;  %v1872_v3 = vld [vmem:[%s2400_s1 + $0x148] sm:$0xff]  ;;  %v1863_v6 = vld [vmem:[%s2400_s1 + $0x100] sm:$0xff] }
  0x23   :  { %1139 = vmatpush.bf16.msrb.mxu1 %v1878_v34  ;;  %1108 = vmatmul.bf16.vlgmr.msra.gmra.mxu2 %v274_v38  ;;  %v1881_v0 = vld [vmem:[%s2400_s1 + $0x190] sm:$0xff]  ;;  %v1880_v4 = vld [vmem:[%s2400_s1 + $0x188] sm:$0xff]  ;;  %v1871_v7 = vld [vmem:[%s2400_s1 + $0x140] sm:$0xff] }
  0x24   :  { %1152 = vmatpush.bf16.msrb.mxu2 %v1886_v35  ;;  %1121 = vmatmul.bf16.vlgmr.msra.gmra.mxu3 %v275_v41  ;;  %v1889_v1 = vld [vmem:[%s2400_s1 + $0x1d0] sm:$0xff]  ;;  %v1888_v5 = vld [vmem:[%s2400_s1 + $0x1c8] sm:$0xff]  ;;  %v1879_v8 = vld [vmem:[%s2400_s1 + $0x180] sm:$0xff] }
  0x25   :  { %1165 = vmatpush.bf16.msrb.mxu3 %v1894_v36  ;;  %v1887_v9 = vld [vmem:[%s2400_s1 + $0x1c0] sm:$0xff]  ;;  %v1902_v10 = vld [vmem:[%s2400_s1 + $0x238] sm:$0xff]  ;;  %v1901_v14 = vld [vmem:[%s2400_s1 + $0x230] sm:$0xff] }
  0x26   :  { %1127 = vmatpush.bf16.msrb.mxu0 %v1869_v37  ;;  %v1910_v11 = vld [vmem:[%s2400_s1 + $0x278] sm:$0xff]  ;;  %v1909_v15 = vld [vmem:[%s2400_s1 + $0x270] sm:$0xff]  ;;  %v1900_v18 = vld [vmem:[%s2400_s1 + $0x228] sm:$0xff] }
  0x27   :  { %1140 = vmatpush.bf16.msrb.mxu1 %v1877_v40  ;;  %v1918_v12 = vld [vmem:[%s2400_s1 + $0x2b8] sm:$0xff]  ;;  %v1917_v16 = vld [vmem:[%s2400_s1 + $0x2b0] sm:$0xff]  ;;  %v1908_v19 = vld [vmem:[%s2400_s1 + $0x268] sm:$0xff] }
  0x28   :  { %1153 = vmatpush.bf16.msrb.mxu2 %v1885_v43  ;;  %v1926_v13 = vld [vmem:[%s2400_s1 + $0x2f8] sm:$0xff]  ;;  %v1925_v17 = vld [vmem:[%s2400_s1 + $0x2f0] sm:$0xff]  ;;  %v1916_v20 = vld [vmem:[%s2400_s1 + $0x2a8] sm:$0xff] }
  0x29   :  { %1166 = vmatpush.bf16.msrb.mxu3 %v1893_v44  ;;  %v1924_v21 = vld [vmem:[%s2400_s1 + $0x2e8] sm:$0xff]  ;;  %v1899_v22 = vld [vmem:[%s2400_s1 + $0x220] sm:$0xff]  ;;  %v1898_v26 = vld [vmem:[%s2400_s1 + $0x218] sm:$0xff] }
  0x2a   :  { %1128 = vmatpush.bf16.msrb.mxu0 %v1868_v45  ;;  %v1907_v23 = vld [vmem:[%s2400_s1 + $0x260] sm:$0xff]  ;;  %v1906_v27 = vld [vmem:[%s2400_s1 + $0x258] sm:$0xff]  ;;  %v1897_v30 = vld [vmem:[%s2400_s1 + $0x210] sm:$0xff] }
  0x2b   :  { %1141 = vmatpush.bf16.msrb.mxu1 %v1876_v46  ;;  %v1915_v24 = vld [vmem:[%s2400_s1 + $0x2a0] sm:$0xff]  ;;  %v1914_v28 = vld [vmem:[%s2400_s1 + $0x298] sm:$0xff]  ;;  %v1905_v31 = vld [vmem:[%s2400_s1 + $0x250] sm:$0xff] }
  0x2c   :  { %1154 = vmatpush.bf16.msrb.mxu2 %v1884_v47  ;;  %v1923_v25 = vld [vmem:[%s2400_s1 + $0x2e0] sm:$0xff]  ;;  %v1922_v29 = vld [vmem:[%s2400_s1 + $0x2d8] sm:$0xff]  ;;  %v1913_v32 = vld [vmem:[%s2400_s1 + $0x290] sm:$0xff] }
  0x2d   :  { %1167 = vmatpush.bf16.msrb.mxu3 %v1892_v48  ;;  %v1921_v33 = vld [vmem:[%s2400_s1 + $0x2d0] sm:$0xff]  ;;  %v1896_v34 = vld [vmem:[%s2400_s1 + $0x208] sm:$0xff]  ;;  %v1895_v38 = vld [vmem:[%s2400_s1 + $0x200] sm:$0xff] }
  0x2e   :  { %1129 = vmatpush.bf16.msrb.mxu0 %v1867_v54  ;;  %v1904_v35 = vld [vmem:[%s2400_s1 + $0x248] sm:$0xff]  ;;  %v1903_v39 = vld [vmem:[%s2400_s1 + $0x240] sm:$0xff]  ;;  %v1934_v42 = vld [vmem:[%s2400_s1 + $0x338] sm:$0xff] }
  0x2f   :  { %1142 = vmatpush.bf16.msrb.mxu1 %v1875_v55  ;;  %v1912_v36 = vld [vmem:[%s2400_s1 + $0x288] sm:$0xff]  ;;  %v1911_v40 = vld [vmem:[%s2400_s1 + $0x280] sm:$0xff]  ;;  %v1942_v43 = vld [vmem:[%s2400_s1 + $0x378] sm:$0xff] }
  0x30   :  { %1155 = vmatpush.bf16.msrb.mxu2 %v1883_v56  ;;  %v1920_v37 = vld [vmem:[%s2400_s1 + $0x2c8] sm:$0xff]  ;;  %v1919_v41 = vld [vmem:[%s2400_s1 + $0x2c0] sm:$0xff]  ;;  %v1950_v44 = vld [vmem:[%s2400_s1 + $0x3b8] sm:$0xff] }
  0x31   :  { %1168 = vmatpush.bf16.msrb.mxu3 %v1891_v57  ;;  %v1958_v45 = vld [vmem:[%s2400_s1 + $0x3f8] sm:$0xff]  ;;  %v282_v46 = vld [vmem:[#allocation1] sm:$0xff]  ;;  %v283_v48 = vld [vmem:[#allocation1 + $0x9] sm:$0xff] }
  0x32   :  { %1130 = vmatpush.bf16.msrb.mxu0 %v1866_v58  ;;  %v284_v47 = vld [vmem:[#allocation1 + $0x12] sm:$0xff]  ;;  %v1932_v54 = vld [vmem:[%s2400_s1 + $0x328] sm:$0xff]  ;;  %v1931_v58 = vld [vmem:[%s2400_s1 + $0x320] sm:$0xff] }
  0x33   :  { %1143 = vmatpush.bf16.msrb.mxu1 %v1874_v59  ;;  %v1949_v52 = vld [vmem:[%s2400_s1 + $0x3b0] sm:$0xff]  ;;  %v1940_v55 = vld [vmem:[%s2400_s1 + $0x368] sm:$0xff]  ;;  %v1939_v59 = vld [vmem:[%s2400_s1 + $0x360] sm:$0xff] }
  0x34   :  { %1156 = vmatpush.bf16.msrb.mxu2 %v1882_v60  ;;  %v1948_v56 = vld [vmem:[%s2400_s1 + $0x3a8] sm:$0xff]  ;;  %v1947_v60 = vld [vmem:[%s2400_s1 + $0x3a0] sm:$0xff] }
  0x35   :  { %1169 = vmatpush.bf16.msrb.mxu3 %v1890_v61  ;;  %v1956_v57 = vld [vmem:[%s2400_s1 + $0x3e8] sm:$0xff]  ;;  %v1955_v61 = vld [vmem:[%s2400_s1 + $0x3e0] sm:$0xff] }
  0x36   :  { %1131 = vmatpush.bf16.msrb.mxu0 %v1865_v62  ;;  %v1930_v62 = vld [vmem:[%s2400_s1 + $0x318] sm:$0xff] }
  0x37   :  { %1144 = vmatpush.bf16.msrb.mxu1 %v1873_v63  ;;  %v1938_v63 = vld [vmem:[%s2400_s1 + $0x358] sm:$0xff] }
  0x38   :  { %1157 = vmatpush.bf16.msrb.mxu2 %v1881_v0  ;;  %v1946_v0 = vld [vmem:[%s2400_s1 + $0x398] sm:$0xff] }
  0x39   :  { %1170 = vmatpush.bf16.msrb.mxu3 %v1889_v1  ;;  %v1954_v1 = vld [vmem:[%s2400_s1 + $0x3d8] sm:$0xff] }
  0x3a   :  { %1132 = vmatpush.bf16.msrb.mxu0 %v1864_v2  ;;  %v1929_v2 = vld [vmem:[%s2400_s1 + $0x310] sm:$0xff] }
  0x3b   :  { %1145 = vmatpush.bf16.msrb.mxu1 %v1872_v3  ;;  %v1937_v3 = vld [vmem:[%s2400_s1 + $0x350] sm:$0xff] }
  0x3c   :  { %1158 = vmatpush.bf16.msrb.mxu2 %v1880_v4  ;;  %v1945_v4 = vld [vmem:[%s2400_s1 + $0x390] sm:$0xff] }
  0x3d   :  { %1171 = vmatpush.bf16.msrb.mxu3 %v1888_v5  ;;  %v1953_v5 = vld [vmem:[%s2400_s1 + $0x3d0] sm:$0xff] }
  0x3e   :  { %1133 = vmatpush.bf16.msrb.mxu0 %v1863_v6  ;;  %v1928_v6 = vld [vmem:[%s2400_s1 + $0x308] sm:$0xff] }
  0x3f   :  { %1146 = vmatpush.bf16.msrb.mxu1 %v1871_v7  ;;  %v1936_v7 = vld [vmem:[%s2400_s1 + $0x348] sm:$0xff] }
  0x40   :  { %1159 = vmatpush.bf16.msrb.mxu2 %v1879_v8  ;;  %v1944_v8 = vld [vmem:[%s2400_s1 + $0x388] sm:$0xff] }
  0x41   :  { %1172 = vmatpush.bf16.msrb.mxu3 %v1887_v9  ;;  %1134 = vmatmul.bf16.vlgmr.msrb.gmra.mxu0 %v276_v50  ;;  %v1933_v50 = vld [vmem:[%s2400_s1 + $0x330] sm:$0xff]  ;;  %v1952_v9 = vld [vmem:[%s2400_s1 + $0x3c8] sm:$0xff] }
  0x42   :  { %1178 = vmatpush.bf16.msra.mxu0 %v1902_v10  ;;  %1147 = vmatmul.bf16.vlgmr.msrb.gmra.mxu1 %v277_v53  ;;  %v1957_v53 = vld [vmem:[%s2400_s1 + $0x3f0] sm:$0xff]  ;;  %v1927_v10 = vld [vmem:[%s2400_s1 + $0x300] sm:$0xff] }
  0x43   :  { %1191 = vmatpush.bf16.msra.mxu1 %v1910_v11  ;;  %1160 = vmatmul.bf16.vlgmr.msrb.gmra.mxu2 %v278_v49  ;;  %v285_v49 = vld [vmem:[#allocation1 + $0x1b] sm:$0xff] }
  0x44   :  { %1204 = vmatpush.bf16.msra.mxu2 %v1918_v12  ;;  %1173 = vmatmul.bf16.vlgmr.msrb.gmra.mxu3 %v279_v51  ;;  %v1941_v51 = vld [vmem:[%s2400_s1 + $0x370] sm:$0xff]  ;;  %v1935_v11 = vld [vmem:[%s2400_s1 + $0x340] sm:$0xff] }
  0x45   :  { %1217 = vmatpush.bf16.msra.mxu3 %v1926_v13  ;;  %v1943_v12 = vld [vmem:[%s2400_s1 + $0x380] sm:$0xff] }
  0x46   :  { %1179 = vmatpush.bf16.msra.mxu0 %v1901_v14  ;;  %v1951_v13 = vld [vmem:[%s2400_s1 + $0x3c0] sm:$0xff]  ;;  %s1990_s1 = smov [#allocation2]  }
  0x47   :  { %1192 = vmatpush.bf16.msra.mxu1 %v1909_v15  ;;  %v286_v14 = vld [vmem:[#allocation1 + $0x24] sm:$0xff]  ;;  %v287_v15 = vld [vmem:[#allocation1 + $0x2d] sm:$0xff]  ;;  %s1308_s11 = sshll.u32 %s1990_s1, 4  ;;  %s1309_s11 = int_to_ptr.vmem [resolvable:$true] %s1308_s11 }
  0x48   :  { %1205 = vmatpush.bf16.msra.mxu2 %v1917_v16  ;;  %v288_v16 = vld [vmem:[#allocation1 + $0x36] sm:$0xff] }
  0x49   :  { %1218 = vmatpush.bf16.msra.mxu3 %v1925_v17  ;;  %v289_v17 = vld [vmem:[#allocation1 + $0x3f] sm:$0xff] }
  0x4a   :  { %1180 = vmatpush.bf16.msra.mxu0 %v1900_v18 }
  0x4b   :  { %1193 = vmatpush.bf16.msra.mxu1 %v1908_v19 }
  0x4c   :  { %1206 = vmatpush.bf16.msra.mxu2 %v1916_v20 }
  0x4d   :  { %1219 = vmatpush.bf16.msra.mxu3 %v1924_v21 }
  0x4e   :  { %1181 = vmatpush.bf16.msra.mxu0 %v1899_v22 }
  0x4f   :  { %1194 = vmatpush.bf16.msra.mxu1 %v1907_v23 }
  0x50   :  { %1207 = vmatpush.bf16.msra.mxu2 %v1915_v24 }
  0x51   :  { %1220 = vmatpush.bf16.msra.mxu3 %v1923_v25 }
  0x52   :  { %1182 = vmatpush.bf16.msra.mxu0 %v1898_v26 }
  0x53   :  { %1195 = vmatpush.bf16.msra.mxu1 %v1906_v27 }
  0x54   :  { %1208 = vmatpush.bf16.msra.mxu2 %v1914_v28 }
  0x55   :  { %1221 = vmatpush.bf16.msra.mxu3 %v1922_v29 }
  0x56   :  { %1183 = vmatpush.bf16.msra.mxu0 %v1897_v30 }
  0x57   :  { %1196 = vmatpush.bf16.msra.mxu1 %v1905_v31 }
  0x58   :  { %1209 = vmatpush.bf16.msra.mxu2 %v1913_v32 }
  0x59   :  { %1222 = vmatpush.bf16.msra.mxu3 %v1921_v33 }
  0x5a   :  { %1184 = vmatpush.bf16.msra.mxu0 %v1896_v34 }
  0x5b   :  { %1197 = vmatpush.bf16.msra.mxu1 %v1904_v35 }
  0x5c   :  { %1210 = vmatpush.bf16.msra.mxu2 %v1912_v36 }
  0x5d   :  { %1223 = vmatpush.bf16.msra.mxu3 %v1920_v37 }
  0x5e   :  { %1185 = vmatpush.bf16.msra.mxu0 %v1895_v38 }
  0x5f   :  { %1198 = vmatpush.bf16.msra.mxu1 %v1903_v39 }
  0x60   :  { %1211 = vmatpush.bf16.msra.mxu2 %v1911_v40 }
  0x61   :  { %1224 = vmatpush.bf16.msra.mxu3 %v1919_v41  ;;  %1186 = vmatmul.bf16.vlgmr.msra.gmra.mxu0 %v282_v46 }
  0x62   :  { %1230 = vmatpush.bf16.msrb.mxu0 %v1934_v42  ;;  %1199 = vmatmul.bf16.vlgmr.msra.gmra.mxu1 %v283_v48 }
  0x63   :  { %1243 = vmatpush.bf16.msrb.mxu1 %v1942_v43  ;;  %1212 = vmatmul.bf16.vlgmr.msra.gmra.mxu2 %v284_v47 }
  0x64   :  { %1256 = vmatpush.bf16.msrb.mxu2 %v1950_v44  ;;  %1225 = vmatmul.bf16.vlgmr.msra.gmra.mxu3 %v285_v49 }
  0x65   :  { %1269 = vmatpush.bf16.msrb.mxu3 %v1958_v45 }
  0x66   :  { %1231 = vmatpush.bf16.msrb.mxu0 %v1933_v50 }
  0x67   :  { %1244 = vmatpush.bf16.msrb.mxu1 %v1941_v51 }
  0x68   :  { %1257 = vmatpush.bf16.msrb.mxu2 %v1949_v52 }
  0x69   :  { %1270 = vmatpush.bf16.msrb.mxu3 %v1957_v53 }
  0x6a   :  { %1232 = vmatpush.bf16.msrb.mxu0 %v1932_v54 }
  0x6b   :  { %1245 = vmatpush.bf16.msrb.mxu1 %v1940_v55 }
  0x6c   :  { %1258 = vmatpush.bf16.msrb.mxu2 %v1948_v56 }
  0x6d   :  { %1271 = vmatpush.bf16.msrb.mxu3 %v1956_v57 }
  0x6e   :  { %1233 = vmatpush.bf16.msrb.mxu0 %v1931_v58 }
  0x6f   :  { %1246 = vmatpush.bf16.msrb.mxu1 %v1939_v59 }
  0x70   :  { %1259 = vmatpush.bf16.msrb.mxu2 %v1947_v60 }
  0x71   :  { %1272 = vmatpush.bf16.msrb.mxu3 %v1955_v61 }
  0x72   :  { %1234 = vmatpush.bf16.msrb.mxu0 %v1930_v62 }
  0x73   :  { %1247 = vmatpush.bf16.msrb.mxu1 %v1938_v63 }
  0x74   :  { %1260 = vmatpush.bf16.msrb.mxu2 %v1946_v0 }
  0x75   :  { %1273 = vmatpush.bf16.msrb.mxu3 %v1954_v1 }
  0x76   :  { %1235 = vmatpush.bf16.msrb.mxu0 %v1929_v2 }
  0x77   :  { %1248 = vmatpush.bf16.msrb.mxu1 %v1937_v3 }
  0x78   :  { %1261 = vmatpush.bf16.msrb.mxu2 %v1945_v4 }
  0x79   :  { %1274 = vmatpush.bf16.msrb.mxu3 %v1953_v5 }
  0x7a   :  { %1236 = vmatpush.bf16.msrb.mxu0 %v1928_v6 }
  0x7b   :  { %1249 = vmatpush.bf16.msrb.mxu1 %v1936_v7 }
  0x7c   :  { %1262 = vmatpush.bf16.msrb.mxu2 %v1944_v8 }
  0x7d   :  { %1275 = vmatpush.bf16.msrb.mxu3 %v1952_v9 }
  0x7e   :  { %1237 = vmatpush.bf16.msrb.mxu0 %v1927_v10 }
  0x7f   :  { %1250 = vmatpush.bf16.msrb.mxu1 %v1935_v11 }
  0x80   :  { %1263 = vmatpush.bf16.msrb.mxu2 %v1943_v12 }
  0x81   :  { %1276 = vmatpush.bf16.msrb.mxu3 %v1951_v13  ;;  %1238 = vmatmul.bf16.vlgmr.msrb.gmra.mxu0 %v286_v14 }
  0x82   :  { %1251 = vmatmul.bf16.vlgmr.msrb.gmra.mxu1 %v287_v15 }
  0x83   :  { %1264 = vmatmul.bf16.vlgmr.msrb.gmra.mxu2 %v288_v16 }
  0x84   :  { %1277 = vmatmul.bf16.vlgmr.msrb.gmra.mxu3 %v289_v17 }
  0x9e   :  { %v1083_v18 = vpop.f32.mrf.mxu0 }
  0x9f   :  { %v1096_v19 = vpop.f32.mrf.mxu1 }
  0xa0   :  { %v1097_v20 = vadd.f32 %v1096_v19, %v1083_v18 }
  0xa6   :  { %v1109_v21 = vpop.f32.mrf.mxu2  ;;  %v1085_v24 = vpop.f32.mrf.mxu0 }
  0xa7   :  { %v1110_v22 = vadd.f32 %v1109_v21, %v1097_v20  ;;  %v1122_v23 = vpop.f32.mrf.mxu3  ;;  %v1098_v26 = vpop.f32.mrf.mxu1 }
  0xa9   :  { %v1123_v25 = vadd.f32 %v1122_v23, %v1110_v22 }
  0xae   :  { %v1111_v27 = vpop.f32.mrf.mxu2 }
  0xaf   :  { %v1124_v28 = vpop.f32.mrf.mxu3 }
  0xbe   :  { %v1135_v29 = vpop.f32.mrf.mxu0 }
  0xbf   :  { %v1148_v30 = vpop.f32.mrf.mxu1  ;;  %v1136_v39 = vadd.f32 %v1135_v29, %v1123_v25 }
  0xc1   :  { %v1149_v43 = vadd.f32 %v1148_v30, %v1136_v39 }
  0xc6   :  { %v1161_v31 = vpop.f32.mrf.mxu2  ;;  %v1137_v33 = vpop.f32.mrf.mxu0 }
  0xc7   :  { %v1174_v32 = vpop.f32.mrf.mxu3  ;;  %v1150_v34 = vpop.f32.mrf.mxu1  ;;  %v1162_v45 = vadd.f32 %v1161_v31, %v1149_v43 }
  0xc9   :  { %v1175_v48 = vadd.f32 %v1174_v32, %v1162_v45 }
  0xce   :  { %v1163_v35 = vpop.f32.mrf.mxu2 }
  0xcf   :  { %v1176_v36 = vpop.f32.mrf.mxu3 }
  0xde   :  { %v1187_v37 = vpop.f32.mrf.mxu0 }
  0xdf   :  { %v1200_v38 = vpop.f32.mrf.mxu1  ;;  %v1188_v49 = vadd.f32 %v1187_v37, %v1175_v48 }
  0xe1   :  { %v1201_v50 = vadd.f32 %v1200_v38, %v1188_v49 }
  0xe6   :  { %v1213_v40 = vpop.f32.mrf.mxu2  ;;  %v1189_v42 = vpop.f32.mrf.mxu0 }
  0xe7   :  { %v1226_v41 = vpop.f32.mrf.mxu3  ;;  %v1202_v44 = vpop.f32.mrf.mxu1  ;;  %v1214_v51 = vadd.f32 %v1213_v40, %v1201_v50 }
  0xe9   :  { %v1227_v52 = vadd.f32 %v1226_v41, %v1214_v51 }
  0xee   :  { %v1215_v46 = vpop.f32.mrf.mxu2 }
  0xef   :  { %v1228_v47 = vpop.f32.mrf.mxu3 }
  0xfe   :  { %v1239_v53 = vpop.f32.mrf.mxu0 }
  0xff   :  { %v1252_v54 = vpop.f32.mrf.mxu1  ;;  %v1240_v55 = vadd.f32 %v1239_v53, %v1227_v52 }
 0x101   :  { %v1253_v56 = vadd.f32 %v1252_v54, %v1240_v55 }
 0x106   :  { %v1265_v57 = vpop.f32.mrf.mxu2  ;;  %v1241_v60 = vpop.f32.mrf.mxu0 }
 0x107   :  { %v1278_v58 = vpop.f32.mrf.mxu3  ;;  %v1266_v59 = vadd.f32 %v1265_v57, %v1253_v56  ;;  %v1254_v61 = vpop.f32.mrf.mxu1 }
 0x109   :  { %v1279_v62 = vadd.f32 %v1278_v58, %v1266_v59 }
 0x10b   :  { %v1282_v63 = vsub.f32 0.0, %v1279_v62 }
 0x10d   :  { %v1283_v0 = vmul.f32 1.442695, %v1282_v63 }
 0x10e   :  { %v1267_v1 = vpop.f32.mrf.mxu2 }
 0x10f   :  { %v1280_v2 = vpop.f32.mrf.mxu3  ;;  %1960 = vpow2.f32 %v1283_v0 }
 0x115   :  { %v1961_v3 = vpop.eup %1960 }
 0x116   :  { %v1285_v4 = vadd.f32 1.0, %v1961_v3 }
 0x118   :  { %1962 = vrcp.f32 %v1285_v4  ;;  %v1297_v8 = vand.u32 2147483648, %v1285_v4  ;;  %v1295_v10 = vand.u32 2147483647, %v1285_v4  ;;  %vm1291_vm1 = vweird.f32 %v1285_v4 }
 0x11a   :  { %v1298_v12 = vor.u32 1.1754944e-38, %v1297_v8  ;;  %vm1296_vm4 = vcmp.eq.f32.partialorder %v1295_v10, 8.507059e+37 }
 0x11e   :  { %v1963_v5 = vpop.eup %1962 }
 0x11f   :  { %v1287_v6 = vmul.f32 %v1963_v5, %v1285_v4  ;;  %vm1292_vm0 = vweird.f32 %v1963_v5 }
 0x120   :  { %vm1293_vm2 = vmor %vm1291_vm1, %vm1292_vm0 }
 0x121   :  { %v1288_v7 = vsub.f32 1.0, %v1287_v6 }
 0x123   :  { %v1289_v9 = vmul.f32 %v1963_v5, %v1288_v7 }
 0x125   :  { %v1290_v11 = vadd.f32 %v1963_v5, %v1289_v9 }
 0x127   :  { %v1294_v13 = vsel %vm1293_vm2, %v1963_v5, %v1290_v11 }
 0x128   :  { %v1299_v14 = vsel %vm1296_vm4, %v1298_v12, %v1294_v13 }
 0x129   :  { %1302 = vst.msk [vmem:[#allocation2] sm:$0x1] %vm1301_vm3, %v1299_v14 }
 0x12a   :  { %1313 = dma.vmem_to_hbm [thread:$0]  %s1309_s11, 16, %s1311_s14, [#allocation3]  }
 0x12b   :  { %1988 = dma.done.wait [#allocation3], 16  }
 0x12c   :  { %1989 = vsyncadd [#allocation3], 4294967280 }
 0x12d   :  { %1318 = vsyncpa [#allocation3], 1 }

</bundles_post_ra>
